<compile_context>
chip_gen: v5e
topology: v5e:2x2
jax: 0.10.0
libtpu: 0.0.40
codegen_flags: <defaults>
</compile_context>

<pallas_src>
import math

import jax
import jax.numpy as jnp
from jax.experimental import pallas as pl
from jax.experimental.pallas import tpu as pltpu  # noqa: F401  (kept for TPU-specific tuning hooks)

LN_EPS = 1e-5


def _layer_norm(x, gamma, beta):
    mu = jnp.mean(x, axis=-1, keepdims=True)
    var = jnp.mean(jnp.square(x - mu), axis=-1, keepdims=True)
    return (x - mu) * jax.lax.rsqrt(var + LN_EPS) * gamma + beta


def _dense(x, w, b):
    return jnp.dot(x, w, preferred_element_type=jnp.float32) + b


# ---------------- fused Critic kernel (embed + encoder + TwinQ) --------------
def make_critic_kernel(B, T, D, n_head, n_layer):
    S = 2 * T
    dh = D // n_head
    scale = 1.0 / math.sqrt(dh)

    def kernel(obs_ref, act_ref, ws_ref, bs_ref, wa_ref, ba_ref, pos_ref,
               ln1g_ref, ln1b_ref,
               wq_ref, bq_ref, wk_ref, bk_ref, wv_ref, bv_ref,
               wo_ref, bo_ref, ln2g_ref, ln2b_ref,
               wfc_ref, bfc_ref, wpr_ref, bpr_ref,
               qlng_ref, qlnb_ref,
               w11_ref, b11_ref, w12_ref, b12_ref,
               w21_ref, b21_ref, w22_ref, b22_ref,
               q_out_ref):
        # ---- state/action embeddings, batch folded into rows ----------------
        s = _dense(obs_ref[...], ws_ref[...], bs_ref[...])        # (B*T, D)
        a = _dense(act_ref[...], wa_ref[...], ba_ref[...])        # (B*T, D)
        # grouped layout per batch: [states(T) ; actions(T)]
        x3 = jnp.concatenate([s.reshape(B, T, D), a.reshape(B, T, D)], axis=1)
        x3 = x3 + pos_ref[...]                                    # pos already grouped
        x = x3.reshape(B * S, D)

        # ---- causal mask in interleaved coordinates, built in-kernel ---------
        ridx = jax.lax.broadcasted_iota(jnp.int32, (S, S), 0)
        cidx = jax.lax.broadcasted_iota(jnp.int32, (S, S), 1)
        p_r = jnp.where(ridx < T, 2 * ridx, 2 * (ridx - T) + 1)   # interleaved pos of row
        p_c = jnp.where(cidx < T, 2 * cidx, 2 * (cidx - T) + 1)   # interleaved pos of col
        mask = p_r >= p_c                                         # (S, S) bool

        # ---- transformer encoder blocks --------------------------------------
        for l in range(n_layer):
            xn = _layer_norm(x, ln1g_ref[l], ln1b_ref[l])          # (B*S, D)
            attn = jnp.zeros((B * S, D), jnp.float32)
            for h in range(n_head):
                qh = _dense(xn, wq_ref[l, h], bq_ref[l, h]).reshape(B, S, dh)
                kh = _dense(xn, wk_ref[l, h], bk_ref[l, h]).reshape(B, S, dh)
                vh = _dense(xn, wv_ref[l, h], bv_ref[l, h]).reshape(B, S, dh)
                # contract last dims directly; no kh.T materialization
                sc = jnp.einsum('bqd,bkd->bqk', qh, kh,
                                preferred_element_type=jnp.float32) * scale
                sc = jnp.where(mask, sc, -1e30)
                sc = sc - jnp.max(sc, axis=-1, keepdims=True)
                e = jnp.exp(sc)
                p = e * pl.reciprocal(jnp.sum(e, axis=-1, keepdims=True),
                                      approx=True)
                ctx = jnp.einsum('bqk,bkd->bqd', p, vh,
                                 preferred_element_type=jnp.float32)
                # per-head output projection, accumulated (no concat over heads)
                attn = attn + jnp.dot(ctx.reshape(B * S, dh), wo_ref[l, h],
                                      preferred_element_type=jnp.float32)
            x = x + attn + bo_ref[l]
            xn2 = _layer_norm(x, ln2g_ref[l], ln2b_ref[l])
            hmid = jax.nn.gelu(_dense(xn2, wfc_ref[l], bfc_ref[l]))
            x = x + _dense(hmid, wpr_ref[l], bpr_ref[l])

        # ---- TwinQHead on action tokens (grouped rows T..2T-1) ----------------
        xa = x.reshape(B, S, D)[:, T:, :].reshape(B * T, D)
        xa = _layer_norm(xa, qlng_ref[...], qlnb_ref[...])
        t = jnp.tanh(xa)
        h1 = jnp.maximum(_dense(t, w11_ref[...], b11_ref[...]), 0.0)
        q1 = jnp.sum(h1 * w12_ref[...], axis=-1, keepdims=True) + b12_ref[...]
        h2 = jnp.maximum(_dense(t, w21_ref[...], b21_ref[...]), 0.0)
        q2 = jnp.sum(h2 * w22_ref[...], axis=-1, keepdims=True) + b22_ref[...]
        q_out_ref[...] = jnp.concatenate([q1, q2], axis=-1)        # (B*T, 2)

    return kernel


# ---------------- parameter init (deterministic, synthetic) ------------------
def init_params(key, obs_dim, action_dim, n_embd, n_head, n_layer, max_len):
    D, H, L = n_embd, n_head, n_layer
    dh = D // H
    keys = iter(jax.random.split(key, 32))

    def w(shape, scale=0.02):
        return (scale * jax.random.normal(next(keys), shape)).astype(jnp.float32)

    zeros = lambda shape: jnp.zeros(shape, jnp.float32)
    ones = lambda shape: jnp.ones(shape, jnp.float32)

    return {
        "ws": w((obs_dim, D)), "bs": zeros((1, D)),
        "wa": w((action_dim, D)), "ba": zeros((1, D)),
        "pos": w((1, 2 * max_len, D)),
        "blk": {
            "ln1g": ones((L, 1, D)), "ln1b": zeros((L, 1, D)),
            "wq": w((L, H, D, dh)), "bq": zeros((L, H, 1, dh)),
            "wk": w((L, H, D, dh)), "bk": zeros((L, H, 1, dh)),
            "wv": w((L, H, D, dh)), "bv": zeros((L, H, 1, dh)),
            "wo": w((L, H, dh, D)), "bo": zeros((L, 1, D)),
            "ln2g": ones((L, 1, D)), "ln2b": zeros((L, 1, D)),
            "wfc": w((L, D, 4 * D)), "bfc": zeros((L, 1, 4 * D)),
            "wpr": w((L, 4 * D, D)), "bpr": zeros((L, 1, D)),
        },
        "q": {
            "lng": ones((1, D)), "lnb": zeros((1, D)),
            "w11": w((D, D)), "b11": zeros((1, D)),
            "w12": w((1, D)), "b12": zeros((1, 1)),
            "w21": w((D, D)), "b21": zeros((1, D)),
            "w22": w((1, D)), "b22": zeros((1, 1)),
        },
    }


# ---------------- Critic forward (target=False) ------------------------------
def critic_forward(params, obs_seq, action_seq):
    if obs_seq.ndim == 2:
        obs_seq = obs_seq[:, None, :]
    if action_seq.ndim == 2:
        action_seq = action_seq[:, None, :]
    B, T, obs_dim = obs_seq.shape
    act_dim = action_seq.shape[-1]
    D = params["ws"].shape[1]
    S = 2 * T
    blk, qp = params["blk"], params["q"]
    n_layer, n_head = blk["wq"].shape[0], blk["wq"].shape[1]

    # positional embedding rows rearranged to the grouped layout (tiny param op)
    pos = params["pos"][0, :S]
    pos_g = jnp.concatenate([pos[0::2], pos[1::2]], axis=0)       # (S, D)

    kernel = make_critic_kernel(B, T, D, n_head, n_layer)

    q_out = pl.pallas_call(
        kernel,
        out_shape=jax.ShapeDtypeStruct((B * T, 2), jnp.float32),
    )(obs_seq.reshape(B * T, obs_dim), action_seq.reshape(B * T, act_dim),
      params["ws"], params["bs"], params["wa"], params["ba"], pos_g,
      blk["ln1g"], blk["ln1b"],
      blk["wq"], blk["bq"], blk["wk"], blk["bk"], blk["wv"], blk["bv"],
      blk["wo"], blk["bo"], blk["ln2g"], blk["ln2b"],
      blk["wfc"], blk["bfc"], blk["wpr"], blk["bpr"],
      qp["lng"], qp["lnb"],
      qp["w11"], qp["b11"], qp["w12"], qp["b12"],
      qp["w21"], qp["b21"], qp["w22"], qp["b22"])

    q = q_out.reshape(B, T, 2)
    return q[..., 0:1], q[..., 1:2]


if __name__ == "__main__":
    B, T = 2, 8                       # attention_length = T
    obs_dim, action_dim = 16, 4
    n_embd, n_head, n_layer = 32, 4, 2

    key = jax.random.PRNGKey(0)
    kp, ko, ka = jax.random.split(key, 3)
    params = init_params(kp, obs_dim, action_dim, n_embd, n_head, n_layer, T)
    obs_seq = jax.random.normal(ko, (B, T, obs_dim), jnp.float32)
    action_seq = jax.random.normal(ka, (B, T, action_dim), jnp.float32)

    fwd = jax.jit(critic_forward)
    q1, q2 = fwd(params, obs_seq, action_seq)
    jax.block_until_ready((q1, q2))
    assert q1.shape == (B, T, 1) and q2.shape == (B, T, 1)
    assert bool(jnp.all(jnp.isfinite(q1))) and bool(jnp.all(jnp.isfinite(q2)))
    print("KERNEL_OK")
</pallas_src>

<mosaic_0001>
module attributes {stable_mosaic.version = 11 : i64} {
  func.func @kernel(%arg0: memref<16x16xf32, #tpu.memory_space<vmem>>, %arg1: memref<16x4xf32, #tpu.memory_space<vmem>>, %arg2: memref<16x32xf32, #tpu.memory_space<vmem>>, %arg3: memref<1x32xf32, #tpu.memory_space<vmem>>, %arg4: memref<4x32xf32, #tpu.memory_space<vmem>>, %arg5: memref<1x32xf32, #tpu.memory_space<vmem>>, %arg6: memref<16x32xf32, #tpu.memory_space<vmem>>, %arg7: memref<2x1x32xf32, #tpu.memory_space<vmem>>, %arg8: memref<2x1x32xf32, #tpu.memory_space<vmem>>, %arg9: memref<2x4x32x8xf32, #tpu.memory_space<vmem>>, %arg10: memref<2x4x1x8xf32, #tpu.memory_space<vmem>>, %arg11: memref<2x4x32x8xf32, #tpu.memory_space<vmem>>, %arg12: memref<2x4x1x8xf32, #tpu.memory_space<vmem>>, %arg13: memref<2x4x32x8xf32, #tpu.memory_space<vmem>>, %arg14: memref<2x4x1x8xf32, #tpu.memory_space<vmem>>, %arg15: memref<2x4x8x32xf32, #tpu.memory_space<vmem>>, %arg16: memref<2x1x32xf32, #tpu.memory_space<vmem>>, %arg17: memref<2x1x32xf32, #tpu.memory_space<vmem>>, %arg18: memref<2x1x32xf32, #tpu.memory_space<vmem>>, %arg19: memref<2x32x128xf32, #tpu.memory_space<vmem>>, %arg20: memref<2x1x128xf32, #tpu.memory_space<vmem>>, %arg21: memref<2x128x32xf32, #tpu.memory_space<vmem>>, %arg22: memref<2x1x32xf32, #tpu.memory_space<vmem>>, %arg23: memref<1x32xf32, #tpu.memory_space<vmem>>, %arg24: memref<1x32xf32, #tpu.memory_space<vmem>>, %arg25: memref<32x32xf32, #tpu.memory_space<vmem>>, %arg26: memref<1x32xf32, #tpu.memory_space<vmem>>, %arg27: memref<1x32xf32, #tpu.memory_space<vmem>>, %arg28: memref<1x1xf32, #tpu.memory_space<vmem>>, %arg29: memref<32x32xf32, #tpu.memory_space<vmem>>, %arg30: memref<1x32xf32, #tpu.memory_space<vmem>>, %arg31: memref<1x32xf32, #tpu.memory_space<vmem>>, %arg32: memref<1x1xf32, #tpu.memory_space<vmem>>, %arg33: memref<16x2xf32, #tpu.memory_space<vmem>>) attributes {dimension_semantics = [], scalar_prefetch = 0 : i64, scratch_operands = 0 : i64, tpu.core_type = #tpu.core_type<tc>} {
    %c0 = arith.constant 0 : index
    %c0_0 = arith.constant 0 : index
    %0 = vector.load %arg0[%c0, %c0_0] : memref<16x16xf32, #tpu.memory_space<vmem>>, vector<16x16xf32>
    %c0_1 = arith.constant 0 : index
    %c0_2 = arith.constant 0 : index
    %1 = vector.load %arg2[%c0_1, %c0_2] : memref<16x32xf32, #tpu.memory_space<vmem>>, vector<16x32xf32>
    %c0_3 = arith.constant 0 : index
    %c0_4 = arith.constant 0 : index
    %2 = vector.load %arg3[%c0_3, %c0_4] : memref<1x32xf32, #tpu.memory_space<vmem>>, vector<1x32xf32>
    %cst = arith.constant dense<0.000000e+00> : vector<16x32xf32>
    %3 = tpu.matmul %0, %1, %cst {dimension_numbers = #tpu.dot_dimension_numbers<[1], [0], [0], [1], [0, 0, 1, 1], [], []>} : vector<16x16xf32>, vector<16x32xf32>, vector<16x32xf32> -> vector<16x32xf32>
    %4 = vector.broadcast %2 : vector<1x32xf32> to vector<16x32xf32>
    %5 = arith.addf %3, %4 : vector<16x32xf32>
    %c0_5 = arith.constant 0 : index
    %c0_6 = arith.constant 0 : index
    %6 = vector.load %arg1[%c0_5, %c0_6] : memref<16x4xf32, #tpu.memory_space<vmem>>, vector<16x4xf32>
    %c0_7 = arith.constant 0 : index
    %c0_8 = arith.constant 0 : index
    %7 = vector.load %arg4[%c0_7, %c0_8] : memref<4x32xf32, #tpu.memory_space<vmem>>, vector<4x32xf32>
    %c0_9 = arith.constant 0 : index
    %c0_10 = arith.constant 0 : index
    %8 = vector.load %arg5[%c0_9, %c0_10] : memref<1x32xf32, #tpu.memory_space<vmem>>, vector<1x32xf32>
    %cst_11 = arith.constant dense<0.000000e+00> : vector<16x32xf32>
    %9 = tpu.matmul %6, %7, %cst_11 {dimension_numbers = #tpu.dot_dimension_numbers<[1], [0], [0], [1], [0, 0, 1, 1], [], []>} : vector<16x4xf32>, vector<4x32xf32>, vector<16x32xf32> -> vector<16x32xf32>
    %10 = vector.broadcast %8 : vector<1x32xf32> to vector<16x32xf32>
    %11 = arith.addf %9, %10 : vector<16x32xf32>
    %12 = vector.shape_cast %5 : vector<16x32xf32> to vector<2x8x32xf32>
    %13 = vector.shape_cast %11 : vector<16x32xf32> to vector<2x8x32xf32>
    %14 = tpu.concatenate %12, %13 in 1 : vector<2x8x32xf32>, vector<2x8x32xf32> -> vector<2x16x32xf32>
    %c0_12 = arith.constant 0 : index
    %c0_13 = arith.constant 0 : index
    %15 = vector.load %arg6[%c0_12, %c0_13] : memref<16x32xf32, #tpu.memory_space<vmem>>, vector<16x32xf32>
    %16 = vector.shape_cast %15 : vector<16x32xf32> to vector<1x16x32xf32>
    %17 = vector.broadcast %16 : vector<1x16x32xf32> to vector<2x16x32xf32>
    %18 = arith.addf %14, %17 : vector<2x16x32xf32>
    %19 = vector.shape_cast %18 : vector<2x16x32xf32> to vector<32x32xf32>
    %20 = tpu.iota {dimensions = array<i32: 0>} : vector<16x16xi32>
    %21 = tpu.iota {dimensions = array<i32: 1>} : vector<16x16xi32>
    %c8_i32 = arith.constant 8 : i32
    %22 = vector.broadcast %c8_i32 : i32 to vector<16x16xi32>
    %23 = arith.cmpi slt, %20, %22 : vector<16x16xi32>
    %c2_i32 = arith.constant 2 : i32
    %24 = vector.broadcast %c2_i32 : i32 to vector<16x16xi32>
    %25 = arith.muli %24, %20 : vector<16x16xi32>
    %c8_i32_14 = arith.constant 8 : i32
    %26 = vector.broadcast %c8_i32_14 : i32 to vector<16x16xi32>
    %27 = arith.subi %20, %26 : vector<16x16xi32>
    %c2_i32_15 = arith.constant 2 : i32
    %28 = vector.broadcast %c2_i32_15 : i32 to vector<16x16xi32>
    %29 = arith.muli %28, %27 : vector<16x16xi32>
    %c1_i32 = arith.constant 1 : i32
    %30 = vector.broadcast %c1_i32 : i32 to vector<16x16xi32>
    %31 = arith.addi %29, %30 : vector<16x16xi32>
    %32 = arith.select %23, %25, %31 : vector<16x16xi1>, vector<16x16xi32>
    %c8_i32_16 = arith.constant 8 : i32
    %33 = vector.broadcast %c8_i32_16 : i32 to vector<16x16xi32>
    %34 = arith.cmpi slt, %21, %33 : vector<16x16xi32>
    %c2_i32_17 = arith.constant 2 : i32
    %35 = vector.broadcast %c2_i32_17 : i32 to vector<16x16xi32>
    %36 = arith.muli %35, %21 : vector<16x16xi32>
    %c8_i32_18 = arith.constant 8 : i32
    %37 = vector.broadcast %c8_i32_18 : i32 to vector<16x16xi32>
    %38 = arith.subi %21, %37 : vector<16x16xi32>
    %c2_i32_19 = arith.constant 2 : i32
    %39 = vector.broadcast %c2_i32_19 : i32 to vector<16x16xi32>
    %40 = arith.muli %39, %38 : vector<16x16xi32>
    %c1_i32_20 = arith.constant 1 : i32
    %41 = vector.broadcast %c1_i32_20 : i32 to vector<16x16xi32>
    %42 = arith.addi %40, %41 : vector<16x16xi32>
    %43 = arith.select %34, %36, %42 : vector<16x16xi1>, vector<16x16xi32>
    %44 = arith.cmpi sge, %32, %43 : vector<16x16xi32>
    %c0_21 = arith.constant 0 : index
    %c0_22 = arith.constant 0 : index
    %c0_23 = arith.constant 0 : index
    %45 = vector.load %arg7[%c0_21, %c0_22, %c0_23] : memref<2x1x32xf32, #tpu.memory_space<vmem>>, vector<1x1x32xf32>
    %46 = vector.shape_cast %45 : vector<1x1x32xf32> to vector<1x32xf32>
    %c0_24 = arith.constant 0 : index
    %c0_25 = arith.constant 0 : index
    %c0_26 = arith.constant 0 : index
    %47 = vector.load %arg8[%c0_24, %c0_25, %c0_26] : memref<2x1x32xf32, #tpu.memory_space<vmem>>, vector<1x1x32xf32>
    %48 = vector.shape_cast %47 : vector<1x1x32xf32> to vector<1x32xf32>
    %cst_27 = arith.constant dense<0.000000e+00> : vector<32xf32>
    %49 = vector.multi_reduction <add>, %19, %cst_27 [1] : vector<32x32xf32> to vector<32xf32>
    %50 = vector.shape_cast %49 : vector<32xf32> to vector<32x1xf32>
    %cst_28 = arith.constant 3.200000e+01 : f32
    %51 = vector.broadcast %cst_28 : f32 to vector<32x1xf32>
    %52 = arith.divf %50, %51 : vector<32x1xf32>
    %53 = vector.broadcast %52 : vector<32x1xf32> to vector<32x32xf32>
    %54 = arith.subf %19, %53 : vector<32x32xf32>
    %55 = arith.mulf %54, %54 : vector<32x32xf32>
    %cst_29 = arith.constant dense<0.000000e+00> : vector<32xf32>
    %56 = vector.multi_reduction <add>, %55, %cst_29 [1] : vector<32x32xf32> to vector<32xf32>
    %57 = vector.shape_cast %56 : vector<32xf32> to vector<32x1xf32>
    %cst_30 = arith.constant 3.200000e+01 : f32
    %58 = vector.broadcast %cst_30 : f32 to vector<32x1xf32>
    %59 = arith.divf %57, %58 : vector<32x1xf32>
    %60 = vector.broadcast %52 : vector<32x1xf32> to vector<32x32xf32>
    %61 = arith.subf %19, %60 : vector<32x32xf32>
    %cst_31 = arith.constant 9.99999974E-6 : f32
    %62 = vector.broadcast %cst_31 : f32 to vector<32x1xf32>
    %63 = arith.addf %59, %62 : vector<32x1xf32>
    %64 = math.rsqrt %63 : vector<32x1xf32>
    %65 = vector.broadcast %64 : vector<32x1xf32> to vector<32x32xf32>
    %66 = arith.mulf %61, %65 : vector<32x32xf32>
    %67 = vector.broadcast %46 : vector<1x32xf32> to vector<32x32xf32>
    %68 = arith.mulf %66, %67 : vector<32x32xf32>
    %69 = vector.broadcast %48 : vector<1x32xf32> to vector<32x32xf32>
    %70 = arith.addf %68, %69 : vector<32x32xf32>
    %cst_32 = arith.constant 0.000000e+00 : f32
    %71 = vector.broadcast %cst_32 : f32 to vector<32x32xf32>
    %c0_33 = arith.constant 0 : index
    %c0_34 = arith.constant 0 : index
    %c0_35 = arith.constant 0 : index
    %c0_36 = arith.constant 0 : index
    %72 = vector.load %arg9[%c0_33, %c0_34, %c0_35, %c0_36] : memref<2x4x32x8xf32, #tpu.memory_space<vmem>>, vector<1x1x32x8xf32>
    %73 = vector.shape_cast %72 : vector<1x1x32x8xf32> to vector<32x8xf32>
    %c0_37 = arith.constant 0 : index
    %c0_38 = arith.constant 0 : index
    %c0_39 = arith.constant 0 : index
    %c0_40 = arith.constant 0 : index
    %74 = vector.load %arg10[%c0_37, %c0_38, %c0_39, %c0_40] : memref<2x4x1x8xf32, #tpu.memory_space<vmem>>, vector<1x1x1x8xf32>
    %75 = vector.shape_cast %74 : vector<1x1x1x8xf32> to vector<1x8xf32>
    %cst_41 = arith.constant dense<0.000000e+00> : vector<32x8xf32>
    %76 = tpu.matmul %70, %73, %cst_41 {dimension_numbers = #tpu.dot_dimension_numbers<[1], [0], [0], [1], [0, 0, 1, 1], [], []>} : vector<32x32xf32>, vector<32x8xf32>, vector<32x8xf32> -> vector<32x8xf32>
    %77 = vector.broadcast %75 : vector<1x8xf32> to vector<32x8xf32>
    %78 = arith.addf %76, %77 : vector<32x8xf32>
    %79 = vector.shape_cast %78 : vector<32x8xf32> to vector<2x16x8xf32>
    %c0_42 = arith.constant 0 : index
    %c0_43 = arith.constant 0 : index
    %c0_44 = arith.constant 0 : index
    %c0_45 = arith.constant 0 : index
    %80 = vector.load %arg11[%c0_42, %c0_43, %c0_44, %c0_45] : memref<2x4x32x8xf32, #tpu.memory_space<vmem>>, vector<1x1x32x8xf32>
    %81 = vector.shape_cast %80 : vector<1x1x32x8xf32> to vector<32x8xf32>
    %c0_46 = arith.constant 0 : index
    %c0_47 = arith.constant 0 : index
    %c0_48 = arith.constant 0 : index
    %c0_49 = arith.constant 0 : index
    %82 = vector.load %arg12[%c0_46, %c0_47, %c0_48, %c0_49] : memref<2x4x1x8xf32, #tpu.memory_space<vmem>>, vector<1x1x1x8xf32>
    %83 = vector.shape_cast %82 : vector<1x1x1x8xf32> to vector<1x8xf32>
    %cst_50 = arith.constant dense<0.000000e+00> : vector<32x8xf32>
    %84 = tpu.matmul %70, %81, %cst_50 {dimension_numbers = #tpu.dot_dimension_numbers<[1], [0], [0], [1], [0, 0, 1, 1], [], []>} : vector<32x32xf32>, vector<32x8xf32>, vector<32x8xf32> -> vector<32x8xf32>
    %85 = vector.broadcast %83 : vector<1x8xf32> to vector<32x8xf32>
    %86 = arith.addf %84, %85 : vector<32x8xf32>
    %87 = vector.shape_cast %86 : vector<32x8xf32> to vector<2x16x8xf32>
    %c0_51 = arith.constant 0 : index
    %c0_52 = arith.constant 0 : index
    %c0_53 = arith.constant 0 : index
    %c0_54 = arith.constant 0 : index
    %88 = vector.load %arg13[%c0_51, %c0_52, %c0_53, %c0_54] : memref<2x4x32x8xf32, #tpu.memory_space<vmem>>, vector<1x1x32x8xf32>
    %89 = vector.shape_cast %88 : vector<1x1x32x8xf32> to vector<32x8xf32>
    %c0_55 = arith.constant 0 : index
    %c0_56 = arith.constant 0 : index
    %c0_57 = arith.constant 0 : index
    %c0_58 = arith.constant 0 : index
    %90 = vector.load %arg14[%c0_55, %c0_56, %c0_57, %c0_58] : memref<2x4x1x8xf32, #tpu.memory_space<vmem>>, vector<1x1x1x8xf32>
    %91 = vector.shape_cast %90 : vector<1x1x1x8xf32> to vector<1x8xf32>
    %cst_59 = arith.constant dense<0.000000e+00> : vector<32x8xf32>
    %92 = tpu.matmul %70, %89, %cst_59 {dimension_numbers = #tpu.dot_dimension_numbers<[1], [0], [0], [1], [0, 0, 1, 1], [], []>} : vector<32x32xf32>, vector<32x8xf32>, vector<32x8xf32> -> vector<32x8xf32>
    %93 = vector.broadcast %91 : vector<1x8xf32> to vector<32x8xf32>
    %94 = arith.addf %92, %93 : vector<32x8xf32>
    %95 = vector.shape_cast %94 : vector<32x8xf32> to vector<2x16x8xf32>
    "tpu.trace_start"() <{level = 10 : i32, message = "bqd,bkd->bqk"}> : () -> ()
    %cst_60 = arith.constant dense<0.000000e+00> : vector<2x16x16xf32>
    %96 = tpu.matmul %79, %87, %cst_60 {dimension_numbers = #tpu.dot_dimension_numbers<[2], [2], [1], [1], [0, 0, 0, 1, 1, 1], [0], [0]>} : vector<2x16x8xf32>, vector<2x16x8xf32>, vector<2x16x16xf32> -> vector<2x16x16xf32>
    "tpu.trace_stop"() : () -> ()
    %cst_61 = arith.constant 0.353553385 : f32
    %97 = vector.broadcast %cst_61 : f32 to vector<2x16x16xf32>
    %98 = arith.mulf %96, %97 : vector<2x16x16xf32>
    %cst_62 = arith.constant -1.000000e+30 : f32
    %99 = vector.shape_cast %44 : vector<16x16xi1> to vector<1x16x16xi1>
    %100 = vector.broadcast %99 : vector<1x16x16xi1> to vector<2x16x16xi1>
    %101 = vector.broadcast %cst_62 : f32 to vector<2x16x16xf32>
    %102 = arith.select %100, %98, %101 : vector<2x16x16xi1>, vector<2x16x16xf32>
    %cst_63 = arith.constant dense<0xFF800000> : vector<2x16xf32>
    %103 = vector.multi_reduction <maximumf>, %102, %cst_63 [2] : vector<2x16x16xf32> to vector<2x16xf32>
    %104 = vector.shape_cast %103 : vector<2x16xf32> to vector<2x16x1xf32>
    %105 = vector.broadcast %104 : vector<2x16x1xf32> to vector<2x16x16xf32>
    %106 = arith.subf %102, %105 : vector<2x16x16xf32>
    %107 = math.exp %106 : vector<2x16x16xf32>
    %cst_64 = arith.constant dense<0.000000e+00> : vector<2x16xf32>
    %108 = vector.multi_reduction <add>, %107, %cst_64 [2] : vector<2x16x16xf32> to vector<2x16xf32>
    %109 = vector.shape_cast %108 : vector<2x16xf32> to vector<2x16x1xf32>
    %110 = tpu.reciprocal %109 {approx = true} : vector<2x16x1xf32> -> vector<2x16x1xf32>
    %111 = vector.broadcast %110 : vector<2x16x1xf32> to vector<2x16x16xf32>
    %112 = arith.mulf %107, %111 : vector<2x16x16xf32>
    "tpu.trace_start"() <{level = 10 : i32, message = "bqk,bkd->bqd"}> : () -> ()
    %cst_65 = arith.constant dense<0.000000e+00> : vector<2x16x8xf32>
    %113 = tpu.matmul %112, %95, %cst_65 {dimension_numbers = #tpu.dot_dimension_numbers<[2], [1], [1], [2], [0, 0, 0, 1, 1, 2], [0], [0]>} : vector<2x16x16xf32>, vector<2x16x8xf32>, vector<2x16x8xf32> -> vector<2x16x8xf32>
    "tpu.trace_stop"() : () -> ()
    %114 = vector.shape_cast %113 : vector<2x16x8xf32> to vector<32x8xf32>
    %c0_66 = arith.constant 0 : index
    %c0_67 = arith.constant 0 : index
    %c0_68 = arith.constant 0 : index
    %c0_69 = arith.constant 0 : index
    %115 = vector.load %arg15[%c0_66, %c0_67, %c0_68, %c0_69] : memref<2x4x8x32xf32, #tpu.memory_space<vmem>>, vector<1x1x8x32xf32>
    %116 = vector.shape_cast %115 : vector<1x1x8x32xf32> to vector<8x32xf32>
    %cst_70 = arith.constant dense<0.000000e+00> : vector<32x32xf32>
    %117 = tpu.matmul %114, %116, %cst_70 {dimension_numbers = #tpu.dot_dimension_numbers<[1], [0], [0], [1], [0, 0, 1, 1], [], []>} : vector<32x8xf32>, vector<8x32xf32>, vector<32x32xf32> -> vector<32x32xf32>
    %118 = arith.addf %71, %117 : vector<32x32xf32>
    %c0_71 = arith.constant 0 : index
    %c1 = arith.constant 1 : index
    %c0_72 = arith.constant 0 : index
    %c0_73 = arith.constant 0 : index
    %119 = vector.load %arg9[%c0_71, %c1, %c0_72, %c0_73] : memref<2x4x32x8xf32, #tpu.memory_space<vmem>>, vector<1x1x32x8xf32>
    %120 = vector.shape_cast %119 : vector<1x1x32x8xf32> to vector<32x8xf32>
    %c0_74 = arith.constant 0 : index
    %c1_75 = arith.constant 1 : index
    %c0_76 = arith.constant 0 : index
    %c0_77 = arith.constant 0 : index
    %121 = vector.load %arg10[%c0_74, %c1_75, %c0_76, %c0_77] : memref<2x4x1x8xf32, #tpu.memory_space<vmem>>, vector<1x1x1x8xf32>
    %122 = vector.shape_cast %121 : vector<1x1x1x8xf32> to vector<1x8xf32>
    %cst_78 = arith.constant dense<0.000000e+00> : vector<32x8xf32>
    %123 = tpu.matmul %70, %120, %cst_78 {dimension_numbers = #tpu.dot_dimension_numbers<[1], [0], [0], [1], [0, 0, 1, 1], [], []>} : vector<32x32xf32>, vector<32x8xf32>, vector<32x8xf32> -> vector<32x8xf32>
    %124 = vector.broadcast %122 : vector<1x8xf32> to vector<32x8xf32>
    %125 = arith.addf %123, %124 : vector<32x8xf32>
    %126 = vector.shape_cast %125 : vector<32x8xf32> to vector<2x16x8xf32>
    %c0_79 = arith.constant 0 : index
    %c1_80 = arith.constant 1 : index
    %c0_81 = arith.constant 0 : index
    %c0_82 = arith.constant 0 : index
    %127 = vector.load %arg11[%c0_79, %c1_80, %c0_81, %c0_82] : memref<2x4x32x8xf32, #tpu.memory_space<vmem>>, vector<1x1x32x8xf32>
    %128 = vector.shape_cast %127 : vector<1x1x32x8xf32> to vector<32x8xf32>
    %c0_83 = arith.constant 0 : index
    %c1_84 = arith.constant 1 : index
    %c0_85 = arith.constant 0 : index
    %c0_86 = arith.constant 0 : index
    %129 = vector.load %arg12[%c0_83, %c1_84, %c0_85, %c0_86] : memref<2x4x1x8xf32, #tpu.memory_space<vmem>>, vector<1x1x1x8xf32>
    %130 = vector.shape_cast %129 : vector<1x1x1x8xf32> to vector<1x8xf32>
    %cst_87 = arith.constant dense<0.000000e+00> : vector<32x8xf32>
    %131 = tpu.matmul %70, %128, %cst_87 {dimension_numbers = #tpu.dot_dimension_numbers<[1], [0], [0], [1], [0, 0, 1, 1], [], []>} : vector<32x32xf32>, vector<32x8xf32>, vector<32x8xf32> -> vector<32x8xf32>
    %132 = vector.broadcast %130 : vector<1x8xf32> to vector<32x8xf32>
    %133 = arith.addf %131, %132 : vector<32x8xf32>
    %134 = vector.shape_cast %133 : vector<32x8xf32> to vector<2x16x8xf32>
    %c0_88 = arith.constant 0 : index
    %c1_89 = arith.constant 1 : index
    %c0_90 = arith.constant 0 : index
    %c0_91 = arith.constant 0 : index
    %135 = vector.load %arg13[%c0_88, %c1_89, %c0_90, %c0_91] : memref<2x4x32x8xf32, #tpu.memory_space<vmem>>, vector<1x1x32x8xf32>
    %136 = vector.shape_cast %135 : vector<1x1x32x8xf32> to vector<32x8xf32>
    %c0_92 = arith.constant 0 : index
    %c1_93 = arith.constant 1 : index
    %c0_94 = arith.constant 0 : index
    %c0_95 = arith.constant 0 : index
    %137 = vector.load %arg14[%c0_92, %c1_93, %c0_94, %c0_95] : memref<2x4x1x8xf32, #tpu.memory_space<vmem>>, vector<1x1x1x8xf32>
    %138 = vector.shape_cast %137 : vector<1x1x1x8xf32> to vector<1x8xf32>
    %cst_96 = arith.constant dense<0.000000e+00> : vector<32x8xf32>
    %139 = tpu.matmul %70, %136, %cst_96 {dimension_numbers = #tpu.dot_dimension_numbers<[1], [0], [0], [1], [0, 0, 1, 1], [], []>} : vector<32x32xf32>, vector<32x8xf32>, vector<32x8xf32> -> vector<32x8xf32>
    %140 = vector.broadcast %138 : vector<1x8xf32> to vector<32x8xf32>
    %141 = arith.addf %139, %140 : vector<32x8xf32>
    %142 = vector.shape_cast %141 : vector<32x8xf32> to vector<2x16x8xf32>
    "tpu.trace_start"() <{level = 10 : i32, message = "bqd,bkd->bqk"}> : () -> ()
    %cst_97 = arith.constant dense<0.000000e+00> : vector<2x16x16xf32>
    %143 = tpu.matmul %126, %134, %cst_97 {dimension_numbers = #tpu.dot_dimension_numbers<[2], [2], [1], [1], [0, 0, 0, 1, 1, 1], [0], [0]>} : vector<2x16x8xf32>, vector<2x16x8xf32>, vector<2x16x16xf32> -> vector<2x16x16xf32>
    "tpu.trace_stop"() : () -> ()
    %cst_98 = arith.constant 0.353553385 : f32
    %144 = vector.broadcast %cst_98 : f32 to vector<2x16x16xf32>
    %145 = arith.mulf %143, %144 : vector<2x16x16xf32>
    %cst_99 = arith.constant -1.000000e+30 : f32
    %146 = vector.shape_cast %44 : vector<16x16xi1> to vector<1x16x16xi1>
    %147 = vector.broadcast %146 : vector<1x16x16xi1> to vector<2x16x16xi1>
    %148 = vector.broadcast %cst_99 : f32 to vector<2x16x16xf32>
    %149 = arith.select %147, %145, %148 : vector<2x16x16xi1>, vector<2x16x16xf32>
    %cst_100 = arith.constant dense<0xFF800000> : vector<2x16xf32>
    %150 = vector.multi_reduction <maximumf>, %149, %cst_100 [2] : vector<2x16x16xf32> to vector<2x16xf32>
    %151 = vector.shape_cast %150 : vector<2x16xf32> to vector<2x16x1xf32>
    %152 = vector.broadcast %151 : vector<2x16x1xf32> to vector<2x16x16xf32>
    %153 = arith.subf %149, %152 : vector<2x16x16xf32>
    %154 = math.exp %153 : vector<2x16x16xf32>
    %cst_101 = arith.constant dense<0.000000e+00> : vector<2x16xf32>
    %155 = vector.multi_reduction <add>, %154, %cst_101 [2] : vector<2x16x16xf32> to vector<2x16xf32>
    %156 = vector.shape_cast %155 : vector<2x16xf32> to vector<2x16x1xf32>
    %157 = tpu.reciprocal %156 {approx = true} : vector<2x16x1xf32> -> vector<2x16x1xf32>
    %158 = vector.broadcast %157 : vector<2x16x1xf32> to vector<2x16x16xf32>
    %159 = arith.mulf %154, %158 : vector<2x16x16xf32>
    "tpu.trace_start"() <{level = 10 : i32, message = "bqk,bkd->bqd"}> : () -> ()
    %cst_102 = arith.constant dense<0.000000e+00> : vector<2x16x8xf32>
    %160 = tpu.matmul %159, %142, %cst_102 {dimension_numbers = #tpu.dot_dimension_numbers<[2], [1], [1], [2], [0, 0, 0, 1, 1, 2], [0], [0]>} : vector<2x16x16xf32>, vector<2x16x8xf32>, vector<2x16x8xf32> -> vector<2x16x8xf32>
    "tpu.trace_stop"() : () -> ()
    %161 = vector.shape_cast %160 : vector<2x16x8xf32> to vector<32x8xf32>
    %c0_103 = arith.constant 0 : index
    %c1_104 = arith.constant 1 : index
    %c0_105 = arith.constant 0 : index
    %c0_106 = arith.constant 0 : index
    %162 = vector.load %arg15[%c0_103, %c1_104, %c0_105, %c0_106] : memref<2x4x8x32xf32, #tpu.memory_space<vmem>>, vector<1x1x8x32xf32>
    %163 = vector.shape_cast %162 : vector<1x1x8x32xf32> to vector<8x32xf32>
    %cst_107 = arith.constant dense<0.000000e+00> : vector<32x32xf32>
    %164 = tpu.matmul %161, %163, %cst_107 {dimension_numbers = #tpu.dot_dimension_numbers<[1], [0], [0], [1], [0, 0, 1, 1], [], []>} : vector<32x8xf32>, vector<8x32xf32>, vector<32x32xf32> -> vector<32x32xf32>
    %165 = arith.addf %118, %164 : vector<32x32xf32>
    %c0_108 = arith.constant 0 : index
    %c2 = arith.constant 2 : index
    %c0_109 = arith.constant 0 : index
    %c0_110 = arith.constant 0 : index
    %166 = vector.load %arg9[%c0_108, %c2, %c0_109, %c0_110] : memref<2x4x32x8xf32, #tpu.memory_space<vmem>>, vector<1x1x32x8xf32>
    %167 = vector.shape_cast %166 : vector<1x1x32x8xf32> to vector<32x8xf32>
    %c0_111 = arith.constant 0 : index
    %c2_112 = arith.constant 2 : index
    %c0_113 = arith.constant 0 : index
    %c0_114 = arith.constant 0 : index
    %168 = vector.load %arg10[%c0_111, %c2_112, %c0_113, %c0_114] : memref<2x4x1x8xf32, #tpu.memory_space<vmem>>, vector<1x1x1x8xf32>
    %169 = vector.shape_cast %168 : vector<1x1x1x8xf32> to vector<1x8xf32>
    %cst_115 = arith.constant dense<0.000000e+00> : vector<32x8xf32>
    %170 = tpu.matmul %70, %167, %cst_115 {dimension_numbers = #tpu.dot_dimension_numbers<[1], [0], [0], [1], [0, 0, 1, 1], [], []>} : vector<32x32xf32>, vector<32x8xf32>, vector<32x8xf32> -> vector<32x8xf32>
    %171 = vector.broadcast %169 : vector<1x8xf32> to vector<32x8xf32>
    %172 = arith.addf %170, %171 : vector<32x8xf32>
    %173 = vector.shape_cast %172 : vector<32x8xf32> to vector<2x16x8xf32>
    %c0_116 = arith.constant 0 : index
    %c2_117 = arith.constant 2 : index
    %c0_118 = arith.constant 0 : index
    %c0_119 = arith.constant 0 : index
    %174 = vector.load %arg11[%c0_116, %c2_117, %c0_118, %c0_119] : memref<2x4x32x8xf32, #tpu.memory_space<vmem>>, vector<1x1x32x8xf32>
    %175 = vector.shape_cast %174 : vector<1x1x32x8xf32> to vector<32x8xf32>
    %c0_120 = arith.constant 0 : index
    %c2_121 = arith.constant 2 : index
    %c0_122 = arith.constant 0 : index
    %c0_123 = arith.constant 0 : index
    %176 = vector.load %arg12[%c0_120, %c2_121, %c0_122, %c0_123] : memref<2x4x1x8xf32, #tpu.memory_space<vmem>>, vector<1x1x1x8xf32>
    %177 = vector.shape_cast %176 : vector<1x1x1x8xf32> to vector<1x8xf32>
    %cst_124 = arith.constant dense<0.000000e+00> : vector<32x8xf32>
    %178 = tpu.matmul %70, %175, %cst_124 {dimension_numbers = #tpu.dot_dimension_numbers<[1], [0], [0], [1], [0, 0, 1, 1], [], []>} : vector<32x32xf32>, vector<32x8xf32>, vector<32x8xf32> -> vector<32x8xf32>
    %179 = vector.broadcast %177 : vector<1x8xf32> to vector<32x8xf32>
    %180 = arith.addf %178, %179 : vector<32x8xf32>
    %181 = vector.shape_cast %180 : vector<32x8xf32> to vector<2x16x8xf32>
    %c0_125 = arith.constant 0 : index
    %c2_126 = arith.constant 2 : index
    %c0_127 = arith.constant 0 : index
    %c0_128 = arith.constant 0 : index
    %182 = vector.load %arg13[%c0_125, %c2_126, %c0_127, %c0_128] : memref<2x4x32x8xf32, #tpu.memory_space<vmem>>, vector<1x1x32x8xf32>
    %183 = vector.shape_cast %182 : vector<1x1x32x8xf32> to vector<32x8xf32>
    %c0_129 = arith.constant 0 : index
    %c2_130 = arith.constant 2 : index
    %c0_131 = arith.constant 0 : index
    %c0_132 = arith.constant 0 : index
    %184 = vector.load %arg14[%c0_129, %c2_130, %c0_131, %c0_132] : memref<2x4x1x8xf32, #tpu.memory_space<vmem>>, vector<1x1x1x8xf32>
    %185 = vector.shape_cast %184 : vector<1x1x1x8xf32> to vector<1x8xf32>
    %cst_133 = arith.constant dense<0.000000e+00> : vector<32x8xf32>
    %186 = tpu.matmul %70, %183, %cst_133 {dimension_numbers = #tpu.dot_dimension_numbers<[1], [0], [0], [1], [0, 0, 1, 1], [], []>} : vector<32x32xf32>, vector<32x8xf32>, vector<32x8xf32> -> vector<32x8xf32>
    %187 = vector.broadcast %185 : vector<1x8xf32> to vector<32x8xf32>
    %188 = arith.addf %186, %187 : vector<32x8xf32>
    %189 = vector.shape_cast %188 : vector<32x8xf32> to vector<2x16x8xf32>
    "tpu.trace_start"() <{level = 10 : i32, message = "bqd,bkd->bqk"}> : () -> ()
    %cst_134 = arith.constant dense<0.000000e+00> : vector<2x16x16xf32>
    %190 = tpu.matmul %173, %181, %cst_134 {dimension_numbers = #tpu.dot_dimension_numbers<[2], [2], [1], [1], [0, 0, 0, 1, 1, 1], [0], [0]>} : vector<2x16x8xf32>, vector<2x16x8xf32>, vector<2x16x16xf32> -> vector<2x16x16xf32>
    "tpu.trace_stop"() : () -> ()
    %cst_135 = arith.constant 0.353553385 : f32
    %191 = vector.broadcast %cst_135 : f32 to vector<2x16x16xf32>
    %192 = arith.mulf %190, %191 : vector<2x16x16xf32>
    %cst_136 = arith.constant -1.000000e+30 : f32
    %193 = vector.shape_cast %44 : vector<16x16xi1> to vector<1x16x16xi1>
    %194 = vector.broadcast %193 : vector<1x16x16xi1> to vector<2x16x16xi1>
    %195 = vector.broadcast %cst_136 : f32 to vector<2x16x16xf32>
    %196 = arith.select %194, %192, %195 : vector<2x16x16xi1>, vector<2x16x16xf32>
    %cst_137 = arith.constant dense<0xFF800000> : vector<2x16xf32>
    %197 = vector.multi_reduction <maximumf>, %196, %cst_137 [2] : vector<2x16x16xf32> to vector<2x16xf32>
    %198 = vector.shape_cast %197 : vector<2x16xf32> to vector<2x16x1xf32>
    %199 = vector.broadcast %198 : vector<2x16x1xf32> to vector<2x16x16xf32>
    %200 = arith.subf %196, %199 : vector<2x16x16xf32>
    %201 = math.exp %200 : vector<2x16x16xf32>
    %cst_138 = arith.constant dense<0.000000e+00> : vector<2x16xf32>
    %202 = vector.multi_reduction <add>, %201, %cst_138 [2] : vector<2x16x16xf32> to vector<2x16xf32>
    %203 = vector.shape_cast %202 : vector<2x16xf32> to vector<2x16x1xf32>
    %204 = tpu.reciprocal %203 {approx = true} : vector<2x16x1xf32> -> vector<2x16x1xf32>
    %205 = vector.broadcast %204 : vector<2x16x1xf32> to vector<2x16x16xf32>
    %206 = arith.mulf %201, %205 : vector<2x16x16xf32>
    "tpu.trace_start"() <{level = 10 : i32, message = "bqk,bkd->bqd"}> : () -> ()
    %cst_139 = arith.constant dense<0.000000e+00> : vector<2x16x8xf32>
    %207 = tpu.matmul %206, %189, %cst_139 {dimension_numbers = #tpu.dot_dimension_numbers<[2], [1], [1], [2], [0, 0, 0, 1, 1, 2], [0], [0]>} : vector<2x16x16xf32>, vector<2x16x8xf32>, vector<2x16x8xf32> -> vector<2x16x8xf32>
    "tpu.trace_stop"() : () -> ()
    %208 = vector.shape_cast %207 : vector<2x16x8xf32> to vector<32x8xf32>
    %c0_140 = arith.constant 0 : index
    %c2_141 = arith.constant 2 : index
    %c0_142 = arith.constant 0 : index
    %c0_143 = arith.constant 0 : index
    %209 = vector.load %arg15[%c0_140, %c2_141, %c0_142, %c0_143] : memref<2x4x8x32xf32, #tpu.memory_space<vmem>>, vector<1x1x8x32xf32>
    %210 = vector.shape_cast %209 : vector<1x1x8x32xf32> to vector<8x32xf32>
    %cst_144 = arith.constant dense<0.000000e+00> : vector<32x32xf32>
    %211 = tpu.matmul %208, %210, %cst_144 {dimension_numbers = #tpu.dot_dimension_numbers<[1], [0], [0], [1], [0, 0, 1, 1], [], []>} : vector<32x8xf32>, vector<8x32xf32>, vector<32x32xf32> -> vector<32x32xf32>
    %212 = arith.addf %165, %211 : vector<32x32xf32>
    %c0_145 = arith.constant 0 : index
    %c3 = arith.constant 3 : index
    %c0_146 = arith.constant 0 : index
    %c0_147 = arith.constant 0 : index
    %213 = vector.load %arg9[%c0_145, %c3, %c0_146, %c0_147] : memref<2x4x32x8xf32, #tpu.memory_space<vmem>>, vector<1x1x32x8xf32>
    %214 = vector.shape_cast %213 : vector<1x1x32x8xf32> to vector<32x8xf32>
    %c0_148 = arith.constant 0 : index
    %c3_149 = arith.constant 3 : index
    %c0_150 = arith.constant 0 : index
    %c0_151 = arith.constant 0 : index
    %215 = vector.load %arg10[%c0_148, %c3_149, %c0_150, %c0_151] : memref<2x4x1x8xf32, #tpu.memory_space<vmem>>, vector<1x1x1x8xf32>
    %216 = vector.shape_cast %215 : vector<1x1x1x8xf32> to vector<1x8xf32>
    %cst_152 = arith.constant dense<0.000000e+00> : vector<32x8xf32>
    %217 = tpu.matmul %70, %214, %cst_152 {dimension_numbers = #tpu.dot_dimension_numbers<[1], [0], [0], [1], [0, 0, 1, 1], [], []>} : vector<32x32xf32>, vector<32x8xf32>, vector<32x8xf32> -> vector<32x8xf32>
    %218 = vector.broadcast %216 : vector<1x8xf32> to vector<32x8xf32>
    %219 = arith.addf %217, %218 : vector<32x8xf32>
    %220 = vector.shape_cast %219 : vector<32x8xf32> to vector<2x16x8xf32>
    %c0_153 = arith.constant 0 : index
    %c3_154 = arith.constant 3 : index
    %c0_155 = arith.constant 0 : index
    %c0_156 = arith.constant 0 : index
    %221 = vector.load %arg11[%c0_153, %c3_154, %c0_155, %c0_156] : memref<2x4x32x8xf32, #tpu.memory_space<vmem>>, vector<1x1x32x8xf32>
    %222 = vector.shape_cast %221 : vector<1x1x32x8xf32> to vector<32x8xf32>
    %c0_157 = arith.constant 0 : index
    %c3_158 = arith.constant 3 : index
    %c0_159 = arith.constant 0 : index
    %c0_160 = arith.constant 0 : index
    %223 = vector.load %arg12[%c0_157, %c3_158, %c0_159, %c0_160] : memref<2x4x1x8xf32, #tpu.memory_space<vmem>>, vector<1x1x1x8xf32>
    %224 = vector.shape_cast %223 : vector<1x1x1x8xf32> to vector<1x8xf32>
    %cst_161 = arith.constant dense<0.000000e+00> : vector<32x8xf32>
    %225 = tpu.matmul %70, %222, %cst_161 {dimension_numbers = #tpu.dot_dimension_numbers<[1], [0], [0], [1], [0, 0, 1, 1], [], []>} : vector<32x32xf32>, vector<32x8xf32>, vector<32x8xf32> -> vector<32x8xf32>
    %226 = vector.broadcast %224 : vector<1x8xf32> to vector<32x8xf32>
    %227 = arith.addf %225, %226 : vector<32x8xf32>
    %228 = vector.shape_cast %227 : vector<32x8xf32> to vector<2x16x8xf32>
    %c0_162 = arith.constant 0 : index
    %c3_163 = arith.constant 3 : index
    %c0_164 = arith.constant 0 : index
    %c0_165 = arith.constant 0 : index
    %229 = vector.load %arg13[%c0_162, %c3_163, %c0_164, %c0_165] : memref<2x4x32x8xf32, #tpu.memory_space<vmem>>, vector<1x1x32x8xf32>
    %230 = vector.shape_cast %229 : vector<1x1x32x8xf32> to vector<32x8xf32>
    %c0_166 = arith.constant 0 : index
    %c3_167 = arith.constant 3 : index
    %c0_168 = arith.constant 0 : index
    %c0_169 = arith.constant 0 : index
    %231 = vector.load %arg14[%c0_166, %c3_167, %c0_168, %c0_169] : memref<2x4x1x8xf32, #tpu.memory_space<vmem>>, vector<1x1x1x8xf32>
    %232 = vector.shape_cast %231 : vector<1x1x1x8xf32> to vector<1x8xf32>
    %cst_170 = arith.constant dense<0.000000e+00> : vector<32x8xf32>
    %233 = tpu.matmul %70, %230, %cst_170 {dimension_numbers = #tpu.dot_dimension_numbers<[1], [0], [0], [1], [0, 0, 1, 1], [], []>} : vector<32x32xf32>, vector<32x8xf32>, vector<32x8xf32> -> vector<32x8xf32>
    %234 = vector.broadcast %232 : vector<1x8xf32> to vector<32x8xf32>
    %235 = arith.addf %233, %234 : vector<32x8xf32>
    %236 = vector.shape_cast %235 : vector<32x8xf32> to vector<2x16x8xf32>
    "tpu.trace_start"() <{level = 10 : i32, message = "bqd,bkd->bqk"}> : () -> ()
    %cst_171 = arith.constant dense<0.000000e+00> : vector<2x16x16xf32>
    %237 = tpu.matmul %220, %228, %cst_171 {dimension_numbers = #tpu.dot_dimension_numbers<[2], [2], [1], [1], [0, 0, 0, 1, 1, 1], [0], [0]>} : vector<2x16x8xf32>, vector<2x16x8xf32>, vector<2x16x16xf32> -> vector<2x16x16xf32>
    "tpu.trace_stop"() : () -> ()
    %cst_172 = arith.constant 0.353553385 : f32
    %238 = vector.broadcast %cst_172 : f32 to vector<2x16x16xf32>
    %239 = arith.mulf %237, %238 : vector<2x16x16xf32>
    %cst_173 = arith.constant -1.000000e+30 : f32
    %240 = vector.shape_cast %44 : vector<16x16xi1> to vector<1x16x16xi1>
    %241 = vector.broadcast %240 : vector<1x16x16xi1> to vector<2x16x16xi1>
    %242 = vector.broadcast %cst_173 : f32 to vector<2x16x16xf32>
    %243 = arith.select %241, %239, %242 : vector<2x16x16xi1>, vector<2x16x16xf32>
    %cst_174 = arith.constant dense<0xFF800000> : vector<2x16xf32>
    %244 = vector.multi_reduction <maximumf>, %243, %cst_174 [2] : vector<2x16x16xf32> to vector<2x16xf32>
    %245 = vector.shape_cast %244 : vector<2x16xf32> to vector<2x16x1xf32>
    %246 = vector.broadcast %245 : vector<2x16x1xf32> to vector<2x16x16xf32>
    %247 = arith.subf %243, %246 : vector<2x16x16xf32>
    %248 = math.exp %247 : vector<2x16x16xf32>
    %cst_175 = arith.constant dense<0.000000e+00> : vector<2x16xf32>
    %249 = vector.multi_reduction <add>, %248, %cst_175 [2] : vector<2x16x16xf32> to vector<2x16xf32>
    %250 = vector.shape_cast %249 : vector<2x16xf32> to vector<2x16x1xf32>
    %251 = tpu.reciprocal %250 {approx = true} : vector<2x16x1xf32> -> vector<2x16x1xf32>
    %252 = vector.broadcast %251 : vector<2x16x1xf32> to vector<2x16x16xf32>
    %253 = arith.mulf %248, %252 : vector<2x16x16xf32>
    "tpu.trace_start"() <{level = 10 : i32, message = "bqk,bkd->bqd"}> : () -> ()
    %cst_176 = arith.constant dense<0.000000e+00> : vector<2x16x8xf32>
    %254 = tpu.matmul %253, %236, %cst_176 {dimension_numbers = #tpu.dot_dimension_numbers<[2], [1], [1], [2], [0, 0, 0, 1, 1, 2], [0], [0]>} : vector<2x16x16xf32>, vector<2x16x8xf32>, vector<2x16x8xf32> -> vector<2x16x8xf32>
    "tpu.trace_stop"() : () -> ()
    %255 = vector.shape_cast %254 : vector<2x16x8xf32> to vector<32x8xf32>
    %c0_177 = arith.constant 0 : index
    %c3_178 = arith.constant 3 : index
    %c0_179 = arith.constant 0 : index
    %c0_180 = arith.constant 0 : index
    %256 = vector.load %arg15[%c0_177, %c3_178, %c0_179, %c0_180] : memref<2x4x8x32xf32, #tpu.memory_space<vmem>>, vector<1x1x8x32xf32>
    %257 = vector.shape_cast %256 : vector<1x1x8x32xf32> to vector<8x32xf32>
    %cst_181 = arith.constant dense<0.000000e+00> : vector<32x32xf32>
    %258 = tpu.matmul %255, %257, %cst_181 {dimension_numbers = #tpu.dot_dimension_numbers<[1], [0], [0], [1], [0, 0, 1, 1], [], []>} : vector<32x8xf32>, vector<8x32xf32>, vector<32x32xf32> -> vector<32x32xf32>
    %259 = arith.addf %212, %258 : vector<32x32xf32>
    %260 = arith.addf %19, %259 : vector<32x32xf32>
    %c0_182 = arith.constant 0 : index
    %c0_183 = arith.constant 0 : index
    %c0_184 = arith.constant 0 : index
    %261 = vector.load %arg16[%c0_182, %c0_183, %c0_184] : memref<2x1x32xf32, #tpu.memory_space<vmem>>, vector<1x1x32xf32>
    %262 = vector.shape_cast %261 : vector<1x1x32xf32> to vector<1x32xf32>
    %263 = vector.broadcast %262 : vector<1x32xf32> to vector<32x32xf32>
    %264 = arith.addf %260, %263 : vector<32x32xf32>
    %c0_185 = arith.constant 0 : index
    %c0_186 = arith.constant 0 : index
    %c0_187 = arith.constant 0 : index
    %265 = vector.load %arg17[%c0_185, %c0_186, %c0_187] : memref<2x1x32xf32, #tpu.memory_space<vmem>>, vector<1x1x32xf32>
    %266 = vector.shape_cast %265 : vector<1x1x32xf32> to vector<1x32xf32>
    %c0_188 = arith.constant 0 : index
    %c0_189 = arith.constant 0 : index
    %c0_190 = arith.constant 0 : index
    %267 = vector.load %arg18[%c0_188, %c0_189, %c0_190] : memref<2x1x32xf32, #tpu.memory_space<vmem>>, vector<1x1x32xf32>
    %268 = vector.shape_cast %267 : vector<1x1x32xf32> to vector<1x32xf32>
    %cst_191 = arith.constant dense<0.000000e+00> : vector<32xf32>
    %269 = vector.multi_reduction <add>, %264, %cst_191 [1] : vector<32x32xf32> to vector<32xf32>
    %270 = vector.shape_cast %269 : vector<32xf32> to vector<32x1xf32>
    %cst_192 = arith.constant 3.200000e+01 : f32
    %271 = vector.broadcast %cst_192 : f32 to vector<32x1xf32>
    %272 = arith.divf %270, %271 : vector<32x1xf32>
    %273 = vector.broadcast %272 : vector<32x1xf32> to vector<32x32xf32>
    %274 = arith.subf %264, %273 : vector<32x32xf32>
    %275 = arith.mulf %274, %274 : vector<32x32xf32>
    %cst_193 = arith.constant dense<0.000000e+00> : vector<32xf32>
    %276 = vector.multi_reduction <add>, %275, %cst_193 [1] : vector<32x32xf32> to vector<32xf32>
    %277 = vector.shape_cast %276 : vector<32xf32> to vector<32x1xf32>
    %cst_194 = arith.constant 3.200000e+01 : f32
    %278 = vector.broadcast %cst_194 : f32 to vector<32x1xf32>
    %279 = arith.divf %277, %278 : vector<32x1xf32>
    %280 = vector.broadcast %272 : vector<32x1xf32> to vector<32x32xf32>
    %281 = arith.subf %264, %280 : vector<32x32xf32>
    %cst_195 = arith.constant 9.99999974E-6 : f32
    %282 = vector.broadcast %cst_195 : f32 to vector<32x1xf32>
    %283 = arith.addf %279, %282 : vector<32x1xf32>
    %284 = math.rsqrt %283 : vector<32x1xf32>
    %285 = vector.broadcast %284 : vector<32x1xf32> to vector<32x32xf32>
    %286 = arith.mulf %281, %285 : vector<32x32xf32>
    %287 = vector.broadcast %266 : vector<1x32xf32> to vector<32x32xf32>
    %288 = arith.mulf %286, %287 : vector<32x32xf32>
    %289 = vector.broadcast %268 : vector<1x32xf32> to vector<32x32xf32>
    %290 = arith.addf %288, %289 : vector<32x32xf32>
    %c0_196 = arith.constant 0 : index
    %c0_197 = arith.constant 0 : index
    %c0_198 = arith.constant 0 : index
    %291 = vector.load %arg19[%c0_196, %c0_197, %c0_198] : memref<2x32x128xf32, #tpu.memory_space<vmem>>, vector<1x32x128xf32>
    %292 = vector.shape_cast %291 : vector<1x32x128xf32> to vector<32x128xf32>
    %c0_199 = arith.constant 0 : index
    %c0_200 = arith.constant 0 : index
    %c0_201 = arith.constant 0 : index
    %293 = vector.load %arg20[%c0_199, %c0_200, %c0_201] : memref<2x1x128xf32, #tpu.memory_space<vmem>>, vector<1x1x128xf32>
    %294 = vector.shape_cast %293 : vector<1x1x128xf32> to vector<1x128xf32>
    %cst_202 = arith.constant dense<0.000000e+00> : vector<32x128xf32>
    %295 = tpu.matmul %290, %292, %cst_202 {dimension_numbers = #tpu.dot_dimension_numbers<[1], [0], [0], [1], [0, 0, 1, 1], [], []>} : vector<32x32xf32>, vector<32x128xf32>, vector<32x128xf32> -> vector<32x128xf32>
    %296 = vector.broadcast %294 : vector<1x128xf32> to vector<32x128xf32>
    %297 = arith.addf %295, %296 : vector<32x128xf32>
    %298 = arith.mulf %297, %297 : vector<32x128xf32>
    %299 = arith.mulf %297, %298 : vector<32x128xf32>
    %cst_203 = arith.constant 4.471500e-02 : f32
    %300 = vector.broadcast %cst_203 : f32 to vector<32x128xf32>
    %301 = arith.mulf %300, %299 : vector<32x128xf32>
    %302 = arith.addf %297, %301 : vector<32x128xf32>
    %cst_204 = arith.constant 0.797884583 : f32
    %303 = vector.broadcast %cst_204 : f32 to vector<32x128xf32>
    %304 = arith.mulf %303, %302 : vector<32x128xf32>
    %305 = math.tanh %304 : vector<32x128xf32>
    %cst_205 = arith.constant 1.000000e+00 : f32
    %306 = vector.broadcast %cst_205 : f32 to vector<32x128xf32>
    %307 = arith.addf %306, %305 : vector<32x128xf32>
    %cst_206 = arith.constant 5.000000e-01 : f32
    %308 = vector.broadcast %cst_206 : f32 to vector<32x128xf32>
    %309 = arith.mulf %308, %307 : vector<32x128xf32>
    %310 = arith.mulf %297, %309 : vector<32x128xf32>
    %c0_207 = arith.constant 0 : index
    %c0_208 = arith.constant 0 : index
    %c0_209 = arith.constant 0 : index
    %311 = vector.load %arg21[%c0_207, %c0_208, %c0_209] : memref<2x128x32xf32, #tpu.memory_space<vmem>>, vector<1x128x32xf32>
    %312 = vector.shape_cast %311 : vector<1x128x32xf32> to vector<128x32xf32>
    %c0_210 = arith.constant 0 : index
    %c0_211 = arith.constant 0 : index
    %c0_212 = arith.constant 0 : index
    %313 = vector.load %arg22[%c0_210, %c0_211, %c0_212] : memref<2x1x32xf32, #tpu.memory_space<vmem>>, vector<1x1x32xf32>
    %314 = vector.shape_cast %313 : vector<1x1x32xf32> to vector<1x32xf32>
    %cst_213 = arith.constant dense<0.000000e+00> : vector<32x32xf32>
    %315 = tpu.matmul %310, %312, %cst_213 {dimension_numbers = #tpu.dot_dimension_numbers<[1], [0], [0], [1], [0, 0, 1, 1], [], []>} : vector<32x128xf32>, vector<128x32xf32>, vector<32x32xf32> -> vector<32x32xf32>
    %316 = vector.broadcast %314 : vector<1x32xf32> to vector<32x32xf32>
    %317 = arith.addf %315, %316 : vector<32x32xf32>
    %318 = arith.addf %264, %317 : vector<32x32xf32>
    %c1_214 = arith.constant 1 : index
    %c0_215 = arith.constant 0 : index
    %c0_216 = arith.constant 0 : index
    %319 = vector.load %arg7[%c1_214, %c0_215, %c0_216] : memref<2x1x32xf32, #tpu.memory_space<vmem>>, vector<1x1x32xf32>
    %320 = vector.shape_cast %319 : vector<1x1x32xf32> to vector<1x32xf32>
    %c1_217 = arith.constant 1 : index
    %c0_218 = arith.constant 0 : index
    %c0_219 = arith.constant 0 : index
    %321 = vector.load %arg8[%c1_217, %c0_218, %c0_219] : memref<2x1x32xf32, #tpu.memory_space<vmem>>, vector<1x1x32xf32>
    %322 = vector.shape_cast %321 : vector<1x1x32xf32> to vector<1x32xf32>
    %cst_220 = arith.constant dense<0.000000e+00> : vector<32xf32>
    %323 = vector.multi_reduction <add>, %318, %cst_220 [1] : vector<32x32xf32> to vector<32xf32>
    %324 = vector.shape_cast %323 : vector<32xf32> to vector<32x1xf32>
    %cst_221 = arith.constant 3.200000e+01 : f32
    %325 = vector.broadcast %cst_221 : f32 to vector<32x1xf32>
    %326 = arith.divf %324, %325 : vector<32x1xf32>
    %327 = vector.broadcast %326 : vector<32x1xf32> to vector<32x32xf32>
    %328 = arith.subf %318, %327 : vector<32x32xf32>
    %329 = arith.mulf %328, %328 : vector<32x32xf32>
    %cst_222 = arith.constant dense<0.000000e+00> : vector<32xf32>
    %330 = vector.multi_reduction <add>, %329, %cst_222 [1] : vector<32x32xf32> to vector<32xf32>
    %331 = vector.shape_cast %330 : vector<32xf32> to vector<32x1xf32>
    %cst_223 = arith.constant 3.200000e+01 : f32
    %332 = vector.broadcast %cst_223 : f32 to vector<32x1xf32>
    %333 = arith.divf %331, %332 : vector<32x1xf32>
    %334 = vector.broadcast %326 : vector<32x1xf32> to vector<32x32xf32>
    %335 = arith.subf %318, %334 : vector<32x32xf32>
    %cst_224 = arith.constant 9.99999974E-6 : f32
    %336 = vector.broadcast %cst_224 : f32 to vector<32x1xf32>
    %337 = arith.addf %333, %336 : vector<32x1xf32>
    %338 = math.rsqrt %337 : vector<32x1xf32>
    %339 = vector.broadcast %338 : vector<32x1xf32> to vector<32x32xf32>
    %340 = arith.mulf %335, %339 : vector<32x32xf32>
    %341 = vector.broadcast %320 : vector<1x32xf32> to vector<32x32xf32>
    %342 = arith.mulf %340, %341 : vector<32x32xf32>
    %343 = vector.broadcast %322 : vector<1x32xf32> to vector<32x32xf32>
    %344 = arith.addf %342, %343 : vector<32x32xf32>
    %cst_225 = arith.constant 0.000000e+00 : f32
    %345 = vector.broadcast %cst_225 : f32 to vector<32x32xf32>
    %c1_226 = arith.constant 1 : index
    %c0_227 = arith.constant 0 : index
    %c0_228 = arith.constant 0 : index
    %c0_229 = arith.constant 0 : index
    %346 = vector.load %arg9[%c1_226, %c0_227, %c0_228, %c0_229] : memref<2x4x32x8xf32, #tpu.memory_space<vmem>>, vector<1x1x32x8xf32>
    %347 = vector.shape_cast %346 : vector<1x1x32x8xf32> to vector<32x8xf32>
    %c1_230 = arith.constant 1 : index
    %c0_231 = arith.constant 0 : index
    %c0_232 = arith.constant 0 : index
    %c0_233 = arith.constant 0 : index
    %348 = vector.load %arg10[%c1_230, %c0_231, %c0_232, %c0_233] : memref<2x4x1x8xf32, #tpu.memory_space<vmem>>, vector<1x1x1x8xf32>
    %349 = vector.shape_cast %348 : vector<1x1x1x8xf32> to vector<1x8xf32>
    %cst_234 = arith.constant dense<0.000000e+00> : vector<32x8xf32>
    %350 = tpu.matmul %344, %347, %cst_234 {dimension_numbers = #tpu.dot_dimension_numbers<[1], [0], [0], [1], [0, 0, 1, 1], [], []>} : vector<32x32xf32>, vector<32x8xf32>, vector<32x8xf32> -> vector<32x8xf32>
    %351 = vector.broadcast %349 : vector<1x8xf32> to vector<32x8xf32>
    %352 = arith.addf %350, %351 : vector<32x8xf32>
    %353 = vector.shape_cast %352 : vector<32x8xf32> to vector<2x16x8xf32>
    %c1_235 = arith.constant 1 : index
    %c0_236 = arith.constant 0 : index
    %c0_237 = arith.constant 0 : index
    %c0_238 = arith.constant 0 : index
    %354 = vector.load %arg11[%c1_235, %c0_236, %c0_237, %c0_238] : memref<2x4x32x8xf32, #tpu.memory_space<vmem>>, vector<1x1x32x8xf32>
    %355 = vector.shape_cast %354 : vector<1x1x32x8xf32> to vector<32x8xf32>
    %c1_239 = arith.constant 1 : index
    %c0_240 = arith.constant 0 : index
    %c0_241 = arith.constant 0 : index
    %c0_242 = arith.constant 0 : index
    %356 = vector.load %arg12[%c1_239, %c0_240, %c0_241, %c0_242] : memref<2x4x1x8xf32, #tpu.memory_space<vmem>>, vector<1x1x1x8xf32>
    %357 = vector.shape_cast %356 : vector<1x1x1x8xf32> to vector<1x8xf32>
    %cst_243 = arith.constant dense<0.000000e+00> : vector<32x8xf32>
    %358 = tpu.matmul %344, %355, %cst_243 {dimension_numbers = #tpu.dot_dimension_numbers<[1], [0], [0], [1], [0, 0, 1, 1], [], []>} : vector<32x32xf32>, vector<32x8xf32>, vector<32x8xf32> -> vector<32x8xf32>
    %359 = vector.broadcast %357 : vector<1x8xf32> to vector<32x8xf32>
    %360 = arith.addf %358, %359 : vector<32x8xf32>
    %361 = vector.shape_cast %360 : vector<32x8xf32> to vector<2x16x8xf32>
    %c1_244 = arith.constant 1 : index
    %c0_245 = arith.constant 0 : index
    %c0_246 = arith.constant 0 : index
    %c0_247 = arith.constant 0 : index
    %362 = vector.load %arg13[%c1_244, %c0_245, %c0_246, %c0_247] : memref<2x4x32x8xf32, #tpu.memory_space<vmem>>, vector<1x1x32x8xf32>
    %363 = vector.shape_cast %362 : vector<1x1x32x8xf32> to vector<32x8xf32>
    %c1_248 = arith.constant 1 : index
    %c0_249 = arith.constant 0 : index
    %c0_250 = arith.constant 0 : index
    %c0_251 = arith.constant 0 : index
    %364 = vector.load %arg14[%c1_248, %c0_249, %c0_250, %c0_251] : memref<2x4x1x8xf32, #tpu.memory_space<vmem>>, vector<1x1x1x8xf32>
    %365 = vector.shape_cast %364 : vector<1x1x1x8xf32> to vector<1x8xf32>
    %cst_252 = arith.constant dense<0.000000e+00> : vector<32x8xf32>
    %366 = tpu.matmul %344, %363, %cst_252 {dimension_numbers = #tpu.dot_dimension_numbers<[1], [0], [0], [1], [0, 0, 1, 1], [], []>} : vector<32x32xf32>, vector<32x8xf32>, vector<32x8xf32> -> vector<32x8xf32>
    %367 = vector.broadcast %365 : vector<1x8xf32> to vector<32x8xf32>
    %368 = arith.addf %366, %367 : vector<32x8xf32>
    %369 = vector.shape_cast %368 : vector<32x8xf32> to vector<2x16x8xf32>
    "tpu.trace_start"() <{level = 10 : i32, message = "bqd,bkd->bqk"}> : () -> ()
    %cst_253 = arith.constant dense<0.000000e+00> : vector<2x16x16xf32>
    %370 = tpu.matmul %353, %361, %cst_253 {dimension_numbers = #tpu.dot_dimension_numbers<[2], [2], [1], [1], [0, 0, 0, 1, 1, 1], [0], [0]>} : vector<2x16x8xf32>, vector<2x16x8xf32>, vector<2x16x16xf32> -> vector<2x16x16xf32>
    "tpu.trace_stop"() : () -> ()
    %cst_254 = arith.constant 0.353553385 : f32
    %371 = vector.broadcast %cst_254 : f32 to vector<2x16x16xf32>
    %372 = arith.mulf %370, %371 : vector<2x16x16xf32>
    %cst_255 = arith.constant -1.000000e+30 : f32
    %373 = vector.shape_cast %44 : vector<16x16xi1> to vector<1x16x16xi1>
    %374 = vector.broadcast %373 : vector<1x16x16xi1> to vector<2x16x16xi1>
    %375 = vector.broadcast %cst_255 : f32 to vector<2x16x16xf32>
    %376 = arith.select %374, %372, %375 : vector<2x16x16xi1>, vector<2x16x16xf32>
    %cst_256 = arith.constant dense<0xFF800000> : vector<2x16xf32>
    %377 = vector.multi_reduction <maximumf>, %376, %cst_256 [2] : vector<2x16x16xf32> to vector<2x16xf32>
    %378 = vector.shape_cast %377 : vector<2x16xf32> to vector<2x16x1xf32>
    %379 = vector.broadcast %378 : vector<2x16x1xf32> to vector<2x16x16xf32>
    %380 = arith.subf %376, %379 : vector<2x16x16xf32>
    %381 = math.exp %380 : vector<2x16x16xf32>
    %cst_257 = arith.constant dense<0.000000e+00> : vector<2x16xf32>
    %382 = vector.multi_reduction <add>, %381, %cst_257 [2] : vector<2x16x16xf32> to vector<2x16xf32>
    %383 = vector.shape_cast %382 : vector<2x16xf32> to vector<2x16x1xf32>
    %384 = tpu.reciprocal %383 {approx = true} : vector<2x16x1xf32> -> vector<2x16x1xf32>
    %385 = vector.broadcast %384 : vector<2x16x1xf32> to vector<2x16x16xf32>
    %386 = arith.mulf %381, %385 : vector<2x16x16xf32>
    "tpu.trace_start"() <{level = 10 : i32, message = "bqk,bkd->bqd"}> : () -> ()
    %cst_258 = arith.constant dense<0.000000e+00> : vector<2x16x8xf32>
    %387 = tpu.matmul %386, %369, %cst_258 {dimension_numbers = #tpu.dot_dimension_numbers<[2], [1], [1], [2], [0, 0, 0, 1, 1, 2], [0], [0]>} : vector<2x16x16xf32>, vector<2x16x8xf32>, vector<2x16x8xf32> -> vector<2x16x8xf32>
    "tpu.trace_stop"() : () -> ()
    %388 = vector.shape_cast %387 : vector<2x16x8xf32> to vector<32x8xf32>
    %c1_259 = arith.constant 1 : index
    %c0_260 = arith.constant 0 : index
    %c0_261 = arith.constant 0 : index
    %c0_262 = arith.constant 0 : index
    %389 = vector.load %arg15[%c1_259, %c0_260, %c0_261, %c0_262] : memref<2x4x8x32xf32, #tpu.memory_space<vmem>>, vector<1x1x8x32xf32>
    %390 = vector.shape_cast %389 : vector<1x1x8x32xf32> to vector<8x32xf32>
    %cst_263 = arith.constant dense<0.000000e+00> : vector<32x32xf32>
    %391 = tpu.matmul %388, %390, %cst_263 {dimension_numbers = #tpu.dot_dimension_numbers<[1], [0], [0], [1], [0, 0, 1, 1], [], []>} : vector<32x8xf32>, vector<8x32xf32>, vector<32x32xf32> -> vector<32x32xf32>
    %392 = arith.addf %345, %391 : vector<32x32xf32>
    %c1_264 = arith.constant 1 : index
    %c1_265 = arith.constant 1 : index
    %c0_266 = arith.constant 0 : index
    %c0_267 = arith.constant 0 : index
    %393 = vector.load %arg9[%c1_264, %c1_265, %c0_266, %c0_267] : memref<2x4x32x8xf32, #tpu.memory_space<vmem>>, vector<1x1x32x8xf32>
    %394 = vector.shape_cast %393 : vector<1x1x32x8xf32> to vector<32x8xf32>
    %c1_268 = arith.constant 1 : index
    %c1_269 = arith.constant 1 : index
    %c0_270 = arith.constant 0 : index
    %c0_271 = arith.constant 0 : index
    %395 = vector.load %arg10[%c1_268, %c1_269, %c0_270, %c0_271] : memref<2x4x1x8xf32, #tpu.memory_space<vmem>>, vector<1x1x1x8xf32>
    %396 = vector.shape_cast %395 : vector<1x1x1x8xf32> to vector<1x8xf32>
    %cst_272 = arith.constant dense<0.000000e+00> : vector<32x8xf32>
    %397 = tpu.matmul %344, %394, %cst_272 {dimension_numbers = #tpu.dot_dimension_numbers<[1], [0], [0], [1], [0, 0, 1, 1], [], []>} : vector<32x32xf32>, vector<32x8xf32>, vector<32x8xf32> -> vector<32x8xf32>
    %398 = vector.broadcast %396 : vector<1x8xf32> to vector<32x8xf32>
    %399 = arith.addf %397, %398 : vector<32x8xf32>
    %400 = vector.shape_cast %399 : vector<32x8xf32> to vector<2x16x8xf32>
    %c1_273 = arith.constant 1 : index
    %c1_274 = arith.constant 1 : index
    %c0_275 = arith.constant 0 : index
    %c0_276 = arith.constant 0 : index
    %401 = vector.load %arg11[%c1_273, %c1_274, %c0_275, %c0_276] : memref<2x4x32x8xf32, #tpu.memory_space<vmem>>, vector<1x1x32x8xf32>
    %402 = vector.shape_cast %401 : vector<1x1x32x8xf32> to vector<32x8xf32>
    %c1_277 = arith.constant 1 : index
    %c1_278 = arith.constant 1 : index
    %c0_279 = arith.constant 0 : index
    %c0_280 = arith.constant 0 : index
    %403 = vector.load %arg12[%c1_277, %c1_278, %c0_279, %c0_280] : memref<2x4x1x8xf32, #tpu.memory_space<vmem>>, vector<1x1x1x8xf32>
    %404 = vector.shape_cast %403 : vector<1x1x1x8xf32> to vector<1x8xf32>
    %cst_281 = arith.constant dense<0.000000e+00> : vector<32x8xf32>
    %405 = tpu.matmul %344, %402, %cst_281 {dimension_numbers = #tpu.dot_dimension_numbers<[1], [0], [0], [1], [0, 0, 1, 1], [], []>} : vector<32x32xf32>, vector<32x8xf32>, vector<32x8xf32> -> vector<32x8xf32>
    %406 = vector.broadcast %404 : vector<1x8xf32> to vector<32x8xf32>
    %407 = arith.addf %405, %406 : vector<32x8xf32>
    %408 = vector.shape_cast %407 : vector<32x8xf32> to vector<2x16x8xf32>
    %c1_282 = arith.constant 1 : index
    %c1_283 = arith.constant 1 : index
    %c0_284 = arith.constant 0 : index
    %c0_285 = arith.constant 0 : index
    %409 = vector.load %arg13[%c1_282, %c1_283, %c0_284, %c0_285] : memref<2x4x32x8xf32, #tpu.memory_space<vmem>>, vector<1x1x32x8xf32>
    %410 = vector.shape_cast %409 : vector<1x1x32x8xf32> to vector<32x8xf32>
    %c1_286 = arith.constant 1 : index
    %c1_287 = arith.constant 1 : index
    %c0_288 = arith.constant 0 : index
    %c0_289 = arith.constant 0 : index
    %411 = vector.load %arg14[%c1_286, %c1_287, %c0_288, %c0_289] : memref<2x4x1x8xf32, #tpu.memory_space<vmem>>, vector<1x1x1x8xf32>
    %412 = vector.shape_cast %411 : vector<1x1x1x8xf32> to vector<1x8xf32>
    %cst_290 = arith.constant dense<0.000000e+00> : vector<32x8xf32>
    %413 = tpu.matmul %344, %410, %cst_290 {dimension_numbers = #tpu.dot_dimension_numbers<[1], [0], [0], [1], [0, 0, 1, 1], [], []>} : vector<32x32xf32>, vector<32x8xf32>, vector<32x8xf32> -> vector<32x8xf32>
    %414 = vector.broadcast %412 : vector<1x8xf32> to vector<32x8xf32>
    %415 = arith.addf %413, %414 : vector<32x8xf32>
    %416 = vector.shape_cast %415 : vector<32x8xf32> to vector<2x16x8xf32>
    "tpu.trace_start"() <{level = 10 : i32, message = "bqd,bkd->bqk"}> : () -> ()
    %cst_291 = arith.constant dense<0.000000e+00> : vector<2x16x16xf32>
    %417 = tpu.matmul %400, %408, %cst_291 {dimension_numbers = #tpu.dot_dimension_numbers<[2], [2], [1], [1], [0, 0, 0, 1, 1, 1], [0], [0]>} : vector<2x16x8xf32>, vector<2x16x8xf32>, vector<2x16x16xf32> -> vector<2x16x16xf32>
    "tpu.trace_stop"() : () -> ()
    %cst_292 = arith.constant 0.353553385 : f32
    %418 = vector.broadcast %cst_292 : f32 to vector<2x16x16xf32>
    %419 = arith.mulf %417, %418 : vector<2x16x16xf32>
    %cst_293 = arith.constant -1.000000e+30 : f32
    %420 = vector.shape_cast %44 : vector<16x16xi1> to vector<1x16x16xi1>
    %421 = vector.broadcast %420 : vector<1x16x16xi1> to vector<2x16x16xi1>
    %422 = vector.broadcast %cst_293 : f32 to vector<2x16x16xf32>
    %423 = arith.select %421, %419, %422 : vector<2x16x16xi1>, vector<2x16x16xf32>
    %cst_294 = arith.constant dense<0xFF800000> : vector<2x16xf32>
    %424 = vector.multi_reduction <maximumf>, %423, %cst_294 [2] : vector<2x16x16xf32> to vector<2x16xf32>
    %425 = vector.shape_cast %424 : vector<2x16xf32> to vector<2x16x1xf32>
    %426 = vector.broadcast %425 : vector<2x16x1xf32> to vector<2x16x16xf32>
    %427 = arith.subf %423, %426 : vector<2x16x16xf32>
    %428 = math.exp %427 : vector<2x16x16xf32>
    %cst_295 = arith.constant dense<0.000000e+00> : vector<2x16xf32>
    %429 = vector.multi_reduction <add>, %428, %cst_295 [2] : vector<2x16x16xf32> to vector<2x16xf32>
    %430 = vector.shape_cast %429 : vector<2x16xf32> to vector<2x16x1xf32>
    %431 = tpu.reciprocal %430 {approx = true} : vector<2x16x1xf32> -> vector<2x16x1xf32>
    %432 = vector.broadcast %431 : vector<2x16x1xf32> to vector<2x16x16xf32>
    %433 = arith.mulf %428, %432 : vector<2x16x16xf32>
    "tpu.trace_start"() <{level = 10 : i32, message = "bqk,bkd->bqd"}> : () -> ()
    %cst_296 = arith.constant dense<0.000000e+00> : vector<2x16x8xf32>
    %434 = tpu.matmul %433, %416, %cst_296 {dimension_numbers = #tpu.dot_dimension_numbers<[2], [1], [1], [2], [0, 0, 0, 1, 1, 2], [0], [0]>} : vector<2x16x16xf32>, vector<2x16x8xf32>, vector<2x16x8xf32> -> vector<2x16x8xf32>
    "tpu.trace_stop"() : () -> ()
    %435 = vector.shape_cast %434 : vector<2x16x8xf32> to vector<32x8xf32>
    %c1_297 = arith.constant 1 : index
    %c1_298 = arith.constant 1 : index
    %c0_299 = arith.constant 0 : index
    %c0_300 = arith.constant 0 : index
    %436 = vector.load %arg15[%c1_297, %c1_298, %c0_299, %c0_300] : memref<2x4x8x32xf32, #tpu.memory_space<vmem>>, vector<1x1x8x32xf32>
    %437 = vector.shape_cast %436 : vector<1x1x8x32xf32> to vector<8x32xf32>
    %cst_301 = arith.constant dense<0.000000e+00> : vector<32x32xf32>
    %438 = tpu.matmul %435, %437, %cst_301 {dimension_numbers = #tpu.dot_dimension_numbers<[1], [0], [0], [1], [0, 0, 1, 1], [], []>} : vector<32x8xf32>, vector<8x32xf32>, vector<32x32xf32> -> vector<32x32xf32>
    %439 = arith.addf %392, %438 : vector<32x32xf32>
    %c1_302 = arith.constant 1 : index
    %c2_303 = arith.constant 2 : index
    %c0_304 = arith.constant 0 : index
    %c0_305 = arith.constant 0 : index
    %440 = vector.load %arg9[%c1_302, %c2_303, %c0_304, %c0_305] : memref<2x4x32x8xf32, #tpu.memory_space<vmem>>, vector<1x1x32x8xf32>
    %441 = vector.shape_cast %440 : vector<1x1x32x8xf32> to vector<32x8xf32>
    %c1_306 = arith.constant 1 : index
    %c2_307 = arith.constant 2 : index
    %c0_308 = arith.constant 0 : index
    %c0_309 = arith.constant 0 : index
    %442 = vector.load %arg10[%c1_306, %c2_307, %c0_308, %c0_309] : memref<2x4x1x8xf32, #tpu.memory_space<vmem>>, vector<1x1x1x8xf32>
    %443 = vector.shape_cast %442 : vector<1x1x1x8xf32> to vector<1x8xf32>
    %cst_310 = arith.constant dense<0.000000e+00> : vector<32x8xf32>
    %444 = tpu.matmul %344, %441, %cst_310 {dimension_numbers = #tpu.dot_dimension_numbers<[1], [0], [0], [1], [0, 0, 1, 1], [], []>} : vector<32x32xf32>, vector<32x8xf32>, vector<32x8xf32> -> vector<32x8xf32>
    %445 = vector.broadcast %443 : vector<1x8xf32> to vector<32x8xf32>
    %446 = arith.addf %444, %445 : vector<32x8xf32>
    %447 = vector.shape_cast %446 : vector<32x8xf32> to vector<2x16x8xf32>
    %c1_311 = arith.constant 1 : index
    %c2_312 = arith.constant 2 : index
    %c0_313 = arith.constant 0 : index
    %c0_314 = arith.constant 0 : index
    %448 = vector.load %arg11[%c1_311, %c2_312, %c0_313, %c0_314] : memref<2x4x32x8xf32, #tpu.memory_space<vmem>>, vector<1x1x32x8xf32>
    %449 = vector.shape_cast %448 : vector<1x1x32x8xf32> to vector<32x8xf32>
    %c1_315 = arith.constant 1 : index
    %c2_316 = arith.constant 2 : index
    %c0_317 = arith.constant 0 : index
    %c0_318 = arith.constant 0 : index
    %450 = vector.load %arg12[%c1_315, %c2_316, %c0_317, %c0_318] : memref<2x4x1x8xf32, #tpu.memory_space<vmem>>, vector<1x1x1x8xf32>
    %451 = vector.shape_cast %450 : vector<1x1x1x8xf32> to vector<1x8xf32>
    %cst_319 = arith.constant dense<0.000000e+00> : vector<32x8xf32>
    %452 = tpu.matmul %344, %449, %cst_319 {dimension_numbers = #tpu.dot_dimension_numbers<[1], [0], [0], [1], [0, 0, 1, 1], [], []>} : vector<32x32xf32>, vector<32x8xf32>, vector<32x8xf32> -> vector<32x8xf32>
    %453 = vector.broadcast %451 : vector<1x8xf32> to vector<32x8xf32>
    %454 = arith.addf %452, %453 : vector<32x8xf32>
    %455 = vector.shape_cast %454 : vector<32x8xf32> to vector<2x16x8xf32>
    %c1_320 = arith.constant 1 : index
    %c2_321 = arith.constant 2 : index
    %c0_322 = arith.constant 0 : index
    %c0_323 = arith.constant 0 : index
    %456 = vector.load %arg13[%c1_320, %c2_321, %c0_322, %c0_323] : memref<2x4x32x8xf32, #tpu.memory_space<vmem>>, vector<1x1x32x8xf32>
    %457 = vector.shape_cast %456 : vector<1x1x32x8xf32> to vector<32x8xf32>
    %c1_324 = arith.constant 1 : index
    %c2_325 = arith.constant 2 : index
    %c0_326 = arith.constant 0 : index
    %c0_327 = arith.constant 0 : index
    %458 = vector.load %arg14[%c1_324, %c2_325, %c0_326, %c0_327] : memref<2x4x1x8xf32, #tpu.memory_space<vmem>>, vector<1x1x1x8xf32>
    %459 = vector.shape_cast %458 : vector<1x1x1x8xf32> to vector<1x8xf32>
    %cst_328 = arith.constant dense<0.000000e+00> : vector<32x8xf32>
    %460 = tpu.matmul %344, %457, %cst_328 {dimension_numbers = #tpu.dot_dimension_numbers<[1], [0], [0], [1], [0, 0, 1, 1], [], []>} : vector<32x32xf32>, vector<32x8xf32>, vector<32x8xf32> -> vector<32x8xf32>
    %461 = vector.broadcast %459 : vector<1x8xf32> to vector<32x8xf32>
    %462 = arith.addf %460, %461 : vector<32x8xf32>
    %463 = vector.shape_cast %462 : vector<32x8xf32> to vector<2x16x8xf32>
    "tpu.trace_start"() <{level = 10 : i32, message = "bqd,bkd->bqk"}> : () -> ()
    %cst_329 = arith.constant dense<0.000000e+00> : vector<2x16x16xf32>
    %464 = tpu.matmul %447, %455, %cst_329 {dimension_numbers = #tpu.dot_dimension_numbers<[2], [2], [1], [1], [0, 0, 0, 1, 1, 1], [0], [0]>} : vector<2x16x8xf32>, vector<2x16x8xf32>, vector<2x16x16xf32> -> vector<2x16x16xf32>
    "tpu.trace_stop"() : () -> ()
    %cst_330 = arith.constant 0.353553385 : f32
    %465 = vector.broadcast %cst_330 : f32 to vector<2x16x16xf32>
    %466 = arith.mulf %464, %465 : vector<2x16x16xf32>
    %cst_331 = arith.constant -1.000000e+30 : f32
    %467 = vector.shape_cast %44 : vector<16x16xi1> to vector<1x16x16xi1>
    %468 = vector.broadcast %467 : vector<1x16x16xi1> to vector<2x16x16xi1>
    %469 = vector.broadcast %cst_331 : f32 to vector<2x16x16xf32>
    %470 = arith.select %468, %466, %469 : vector<2x16x16xi1>, vector<2x16x16xf32>
    %cst_332 = arith.constant dense<0xFF800000> : vector<2x16xf32>
    %471 = vector.multi_reduction <maximumf>, %470, %cst_332 [2] : vector<2x16x16xf32> to vector<2x16xf32>
    %472 = vector.shape_cast %471 : vector<2x16xf32> to vector<2x16x1xf32>
    %473 = vector.broadcast %472 : vector<2x16x1xf32> to vector<2x16x16xf32>
    %474 = arith.subf %470, %473 : vector<2x16x16xf32>
    %475 = math.exp %474 : vector<2x16x16xf32>
    %cst_333 = arith.constant dense<0.000000e+00> : vector<2x16xf32>
    %476 = vector.multi_reduction <add>, %475, %cst_333 [2] : vector<2x16x16xf32> to vector<2x16xf32>
    %477 = vector.shape_cast %476 : vector<2x16xf32> to vector<2x16x1xf32>
    %478 = tpu.reciprocal %477 {approx = true} : vector<2x16x1xf32> -> vector<2x16x1xf32>
    %479 = vector.broadcast %478 : vector<2x16x1xf32> to vector<2x16x16xf32>
    %480 = arith.mulf %475, %479 : vector<2x16x16xf32>
    "tpu.trace_start"() <{level = 10 : i32, message = "bqk,bkd->bqd"}> : () -> ()
    %cst_334 = arith.constant dense<0.000000e+00> : vector<2x16x8xf32>
    %481 = tpu.matmul %480, %463, %cst_334 {dimension_numbers = #tpu.dot_dimension_numbers<[2], [1], [1], [2], [0, 0, 0, 1, 1, 2], [0], [0]>} : vector<2x16x16xf32>, vector<2x16x8xf32>, vector<2x16x8xf32> -> vector<2x16x8xf32>
    "tpu.trace_stop"() : () -> ()
    %482 = vector.shape_cast %481 : vector<2x16x8xf32> to vector<32x8xf32>
    %c1_335 = arith.constant 1 : index
    %c2_336 = arith.constant 2 : index
    %c0_337 = arith.constant 0 : index
    %c0_338 = arith.constant 0 : index
    %483 = vector.load %arg15[%c1_335, %c2_336, %c0_337, %c0_338] : memref<2x4x8x32xf32, #tpu.memory_space<vmem>>, vector<1x1x8x32xf32>
    %484 = vector.shape_cast %483 : vector<1x1x8x32xf32> to vector<8x32xf32>
    %cst_339 = arith.constant dense<0.000000e+00> : vector<32x32xf32>
    %485 = tpu.matmul %482, %484, %cst_339 {dimension_numbers = #tpu.dot_dimension_numbers<[1], [0], [0], [1], [0, 0, 1, 1], [], []>} : vector<32x8xf32>, vector<8x32xf32>, vector<32x32xf32> -> vector<32x32xf32>
    %486 = arith.addf %439, %485 : vector<32x32xf32>
    %c1_340 = arith.constant 1 : index
    %c3_341 = arith.constant 3 : index
    %c0_342 = arith.constant 0 : index
    %c0_343 = arith.constant 0 : index
    %487 = vector.load %arg9[%c1_340, %c3_341, %c0_342, %c0_343] : memref<2x4x32x8xf32, #tpu.memory_space<vmem>>, vector<1x1x32x8xf32>
    %488 = vector.shape_cast %487 : vector<1x1x32x8xf32> to vector<32x8xf32>
    %c1_344 = arith.constant 1 : index
    %c3_345 = arith.constant 3 : index
    %c0_346 = arith.constant 0 : index
    %c0_347 = arith.constant 0 : index
    %489 = vector.load %arg10[%c1_344, %c3_345, %c0_346, %c0_347] : memref<2x4x1x8xf32, #tpu.memory_space<vmem>>, vector<1x1x1x8xf32>
    %490 = vector.shape_cast %489 : vector<1x1x1x8xf32> to vector<1x8xf32>
    %cst_348 = arith.constant dense<0.000000e+00> : vector<32x8xf32>
    %491 = tpu.matmul %344, %488, %cst_348 {dimension_numbers = #tpu.dot_dimension_numbers<[1], [0], [0], [1], [0, 0, 1, 1], [], []>} : vector<32x32xf32>, vector<32x8xf32>, vector<32x8xf32> -> vector<32x8xf32>
    %492 = vector.broadcast %490 : vector<1x8xf32> to vector<32x8xf32>
    %493 = arith.addf %491, %492 : vector<32x8xf32>
    %494 = vector.shape_cast %493 : vector<32x8xf32> to vector<2x16x8xf32>
    %c1_349 = arith.constant 1 : index
    %c3_350 = arith.constant 3 : index
    %c0_351 = arith.constant 0 : index
    %c0_352 = arith.constant 0 : index
    %495 = vector.load %arg11[%c1_349, %c3_350, %c0_351, %c0_352] : memref<2x4x32x8xf32, #tpu.memory_space<vmem>>, vector<1x1x32x8xf32>
    %496 = vector.shape_cast %495 : vector<1x1x32x8xf32> to vector<32x8xf32>
    %c1_353 = arith.constant 1 : index
    %c3_354 = arith.constant 3 : index
    %c0_355 = arith.constant 0 : index
    %c0_356 = arith.constant 0 : index
    %497 = vector.load %arg12[%c1_353, %c3_354, %c0_355, %c0_356] : memref<2x4x1x8xf32, #tpu.memory_space<vmem>>, vector<1x1x1x8xf32>
    %498 = vector.shape_cast %497 : vector<1x1x1x8xf32> to vector<1x8xf32>
    %cst_357 = arith.constant dense<0.000000e+00> : vector<32x8xf32>
    %499 = tpu.matmul %344, %496, %cst_357 {dimension_numbers = #tpu.dot_dimension_numbers<[1], [0], [0], [1], [0, 0, 1, 1], [], []>} : vector<32x32xf32>, vector<32x8xf32>, vector<32x8xf32> -> vector<32x8xf32>
    %500 = vector.broadcast %498 : vector<1x8xf32> to vector<32x8xf32>
    %501 = arith.addf %499, %500 : vector<32x8xf32>
    %502 = vector.shape_cast %501 : vector<32x8xf32> to vector<2x16x8xf32>
    %c1_358 = arith.constant 1 : index
    %c3_359 = arith.constant 3 : index
    %c0_360 = arith.constant 0 : index
    %c0_361 = arith.constant 0 : index
    %503 = vector.load %arg13[%c1_358, %c3_359, %c0_360, %c0_361] : memref<2x4x32x8xf32, #tpu.memory_space<vmem>>, vector<1x1x32x8xf32>
    %504 = vector.shape_cast %503 : vector<1x1x32x8xf32> to vector<32x8xf32>
    %c1_362 = arith.constant 1 : index
    %c3_363 = arith.constant 3 : index
    %c0_364 = arith.constant 0 : index
    %c0_365 = arith.constant 0 : index
    %505 = vector.load %arg14[%c1_362, %c3_363, %c0_364, %c0_365] : memref<2x4x1x8xf32, #tpu.memory_space<vmem>>, vector<1x1x1x8xf32>
    %506 = vector.shape_cast %505 : vector<1x1x1x8xf32> to vector<1x8xf32>
    %cst_366 = arith.constant dense<0.000000e+00> : vector<32x8xf32>
    %507 = tpu.matmul %344, %504, %cst_366 {dimension_numbers = #tpu.dot_dimension_numbers<[1], [0], [0], [1], [0, 0, 1, 1], [], []>} : vector<32x32xf32>, vector<32x8xf32>, vector<32x8xf32> -> vector<32x8xf32>
    %508 = vector.broadcast %506 : vector<1x8xf32> to vector<32x8xf32>
    %509 = arith.addf %507, %508 : vector<32x8xf32>
    %510 = vector.shape_cast %509 : vector<32x8xf32> to vector<2x16x8xf32>
    "tpu.trace_start"() <{level = 10 : i32, message = "bqd,bkd->bqk"}> : () -> ()
    %cst_367 = arith.constant dense<0.000000e+00> : vector<2x16x16xf32>
    %511 = tpu.matmul %494, %502, %cst_367 {dimension_numbers = #tpu.dot_dimension_numbers<[2], [2], [1], [1], [0, 0, 0, 1, 1, 1], [0], [0]>} : vector<2x16x8xf32>, vector<2x16x8xf32>, vector<2x16x16xf32> -> vector<2x16x16xf32>
    "tpu.trace_stop"() : () -> ()
    %cst_368 = arith.constant 0.353553385 : f32
    %512 = vector.broadcast %cst_368 : f32 to vector<2x16x16xf32>
    %513 = arith.mulf %511, %512 : vector<2x16x16xf32>
    %cst_369 = arith.constant -1.000000e+30 : f32
    %514 = vector.shape_cast %44 : vector<16x16xi1> to vector<1x16x16xi1>
    %515 = vector.broadcast %514 : vector<1x16x16xi1> to vector<2x16x16xi1>
    %516 = vector.broadcast %cst_369 : f32 to vector<2x16x16xf32>
    %517 = arith.select %515, %513, %516 : vector<2x16x16xi1>, vector<2x16x16xf32>
    %cst_370 = arith.constant dense<0xFF800000> : vector<2x16xf32>
    %518 = vector.multi_reduction <maximumf>, %517, %cst_370 [2] : vector<2x16x16xf32> to vector<2x16xf32>
    %519 = vector.shape_cast %518 : vector<2x16xf32> to vector<2x16x1xf32>
    %520 = vector.broadcast %519 : vector<2x16x1xf32> to vector<2x16x16xf32>
    %521 = arith.subf %517, %520 : vector<2x16x16xf32>
    %522 = math.exp %521 : vector<2x16x16xf32>
    %cst_371 = arith.constant dense<0.000000e+00> : vector<2x16xf32>
    %523 = vector.multi_reduction <add>, %522, %cst_371 [2] : vector<2x16x16xf32> to vector<2x16xf32>
    %524 = vector.shape_cast %523 : vector<2x16xf32> to vector<2x16x1xf32>
    %525 = tpu.reciprocal %524 {approx = true} : vector<2x16x1xf32> -> vector<2x16x1xf32>
    %526 = vector.broadcast %525 : vector<2x16x1xf32> to vector<2x16x16xf32>
    %527 = arith.mulf %522, %526 : vector<2x16x16xf32>
    "tpu.trace_start"() <{level = 10 : i32, message = "bqk,bkd->bqd"}> : () -> ()
    %cst_372 = arith.constant dense<0.000000e+00> : vector<2x16x8xf32>
    %528 = tpu.matmul %527, %510, %cst_372 {dimension_numbers = #tpu.dot_dimension_numbers<[2], [1], [1], [2], [0, 0, 0, 1, 1, 2], [0], [0]>} : vector<2x16x16xf32>, vector<2x16x8xf32>, vector<2x16x8xf32> -> vector<2x16x8xf32>
    "tpu.trace_stop"() : () -> ()
    %529 = vector.shape_cast %528 : vector<2x16x8xf32> to vector<32x8xf32>
    %c1_373 = arith.constant 1 : index
    %c3_374 = arith.constant 3 : index
    %c0_375 = arith.constant 0 : index
    %c0_376 = arith.constant 0 : index
    %530 = vector.load %arg15[%c1_373, %c3_374, %c0_375, %c0_376] : memref<2x4x8x32xf32, #tpu.memory_space<vmem>>, vector<1x1x8x32xf32>
    %531 = vector.shape_cast %530 : vector<1x1x8x32xf32> to vector<8x32xf32>
    %cst_377 = arith.constant dense<0.000000e+00> : vector<32x32xf32>
    %532 = tpu.matmul %529, %531, %cst_377 {dimension_numbers = #tpu.dot_dimension_numbers<[1], [0], [0], [1], [0, 0, 1, 1], [], []>} : vector<32x8xf32>, vector<8x32xf32>, vector<32x32xf32> -> vector<32x32xf32>
    %533 = arith.addf %486, %532 : vector<32x32xf32>
    %534 = arith.addf %318, %533 : vector<32x32xf32>
    %c1_378 = arith.constant 1 : index
    %c0_379 = arith.constant 0 : index
    %c0_380 = arith.constant 0 : index
    %535 = vector.load %arg16[%c1_378, %c0_379, %c0_380] : memref<2x1x32xf32, #tpu.memory_space<vmem>>, vector<1x1x32xf32>
    %536 = vector.shape_cast %535 : vector<1x1x32xf32> to vector<1x32xf32>
    %537 = vector.broadcast %536 : vector<1x32xf32> to vector<32x32xf32>
    %538 = arith.addf %534, %537 : vector<32x32xf32>
    %c1_381 = arith.constant 1 : index
    %c0_382 = arith.constant 0 : index
    %c0_383 = arith.constant 0 : index
    %539 = vector.load %arg17[%c1_381, %c0_382, %c0_383] : memref<2x1x32xf32, #tpu.memory_space<vmem>>, vector<1x1x32xf32>
    %540 = vector.shape_cast %539 : vector<1x1x32xf32> to vector<1x32xf32>
    %c1_384 = arith.constant 1 : index
    %c0_385 = arith.constant 0 : index
    %c0_386 = arith.constant 0 : index
    %541 = vector.load %arg18[%c1_384, %c0_385, %c0_386] : memref<2x1x32xf32, #tpu.memory_space<vmem>>, vector<1x1x32xf32>
    %542 = vector.shape_cast %541 : vector<1x1x32xf32> to vector<1x32xf32>
    %cst_387 = arith.constant dense<0.000000e+00> : vector<32xf32>
    %543 = vector.multi_reduction <add>, %538, %cst_387 [1] : vector<32x32xf32> to vector<32xf32>
    %544 = vector.shape_cast %543 : vector<32xf32> to vector<32x1xf32>
    %cst_388 = arith.constant 3.200000e+01 : f32
    %545 = vector.broadcast %cst_388 : f32 to vector<32x1xf32>
    %546 = arith.divf %544, %545 : vector<32x1xf32>
    %547 = vector.broadcast %546 : vector<32x1xf32> to vector<32x32xf32>
    %548 = arith.subf %538, %547 : vector<32x32xf32>
    %549 = arith.mulf %548, %548 : vector<32x32xf32>
    %cst_389 = arith.constant dense<0.000000e+00> : vector<32xf32>
    %550 = vector.multi_reduction <add>, %549, %cst_389 [1] : vector<32x32xf32> to vector<32xf32>
    %551 = vector.shape_cast %550 : vector<32xf32> to vector<32x1xf32>
    %cst_390 = arith.constant 3.200000e+01 : f32
    %552 = vector.broadcast %cst_390 : f32 to vector<32x1xf32>
    %553 = arith.divf %551, %552 : vector<32x1xf32>
    %554 = vector.broadcast %546 : vector<32x1xf32> to vector<32x32xf32>
    %555 = arith.subf %538, %554 : vector<32x32xf32>
    %cst_391 = arith.constant 9.99999974E-6 : f32
    %556 = vector.broadcast %cst_391 : f32 to vector<32x1xf32>
    %557 = arith.addf %553, %556 : vector<32x1xf32>
    %558 = math.rsqrt %557 : vector<32x1xf32>
    %559 = vector.broadcast %558 : vector<32x1xf32> to vector<32x32xf32>
    %560 = arith.mulf %555, %559 : vector<32x32xf32>
    %561 = vector.broadcast %540 : vector<1x32xf32> to vector<32x32xf32>
    %562 = arith.mulf %560, %561 : vector<32x32xf32>
    %563 = vector.broadcast %542 : vector<1x32xf32> to vector<32x32xf32>
    %564 = arith.addf %562, %563 : vector<32x32xf32>
    %c1_392 = arith.constant 1 : index
    %c0_393 = arith.constant 0 : index
    %c0_394 = arith.constant 0 : index
    %565 = vector.load %arg19[%c1_392, %c0_393, %c0_394] : memref<2x32x128xf32, #tpu.memory_space<vmem>>, vector<1x32x128xf32>
    %566 = vector.shape_cast %565 : vector<1x32x128xf32> to vector<32x128xf32>
    %c1_395 = arith.constant 1 : index
    %c0_396 = arith.constant 0 : index
    %c0_397 = arith.constant 0 : index
    %567 = vector.load %arg20[%c1_395, %c0_396, %c0_397] : memref<2x1x128xf32, #tpu.memory_space<vmem>>, vector<1x1x128xf32>
    %568 = vector.shape_cast %567 : vector<1x1x128xf32> to vector<1x128xf32>
    %cst_398 = arith.constant dense<0.000000e+00> : vector<32x128xf32>
    %569 = tpu.matmul %564, %566, %cst_398 {dimension_numbers = #tpu.dot_dimension_numbers<[1], [0], [0], [1], [0, 0, 1, 1], [], []>} : vector<32x32xf32>, vector<32x128xf32>, vector<32x128xf32> -> vector<32x128xf32>
    %570 = vector.broadcast %568 : vector<1x128xf32> to vector<32x128xf32>
    %571 = arith.addf %569, %570 : vector<32x128xf32>
    %572 = arith.mulf %571, %571 : vector<32x128xf32>
    %573 = arith.mulf %571, %572 : vector<32x128xf32>
    %cst_399 = arith.constant 4.471500e-02 : f32
    %574 = vector.broadcast %cst_399 : f32 to vector<32x128xf32>
    %575 = arith.mulf %574, %573 : vector<32x128xf32>
    %576 = arith.addf %571, %575 : vector<32x128xf32>
    %cst_400 = arith.constant 0.797884583 : f32
    %577 = vector.broadcast %cst_400 : f32 to vector<32x128xf32>
    %578 = arith.mulf %577, %576 : vector<32x128xf32>
    %579 = math.tanh %578 : vector<32x128xf32>
    %cst_401 = arith.constant 1.000000e+00 : f32
    %580 = vector.broadcast %cst_401 : f32 to vector<32x128xf32>
    %581 = arith.addf %580, %579 : vector<32x128xf32>
    %cst_402 = arith.constant 5.000000e-01 : f32
    %582 = vector.broadcast %cst_402 : f32 to vector<32x128xf32>
    %583 = arith.mulf %582, %581 : vector<32x128xf32>
    %584 = arith.mulf %571, %583 : vector<32x128xf32>
    %c1_403 = arith.constant 1 : index
    %c0_404 = arith.constant 0 : index
    %c0_405 = arith.constant 0 : index
    %585 = vector.load %arg21[%c1_403, %c0_404, %c0_405] : memref<2x128x32xf32, #tpu.memory_space<vmem>>, vector<1x128x32xf32>
    %586 = vector.shape_cast %585 : vector<1x128x32xf32> to vector<128x32xf32>
    %c1_406 = arith.constant 1 : index
    %c0_407 = arith.constant 0 : index
    %c0_408 = arith.constant 0 : index
    %587 = vector.load %arg22[%c1_406, %c0_407, %c0_408] : memref<2x1x32xf32, #tpu.memory_space<vmem>>, vector<1x1x32xf32>
    %588 = vector.shape_cast %587 : vector<1x1x32xf32> to vector<1x32xf32>
    %cst_409 = arith.constant dense<0.000000e+00> : vector<32x32xf32>
    %589 = tpu.matmul %584, %586, %cst_409 {dimension_numbers = #tpu.dot_dimension_numbers<[1], [0], [0], [1], [0, 0, 1, 1], [], []>} : vector<32x128xf32>, vector<128x32xf32>, vector<32x32xf32> -> vector<32x32xf32>
    %590 = vector.broadcast %588 : vector<1x32xf32> to vector<32x32xf32>
    %591 = arith.addf %589, %590 : vector<32x32xf32>
    %592 = arith.addf %538, %591 : vector<32x32xf32>
    %593 = vector.shape_cast %592 : vector<32x32xf32> to vector<2x16x32xf32>
    %594 = vector.extract_strided_slice %593 {offsets = [0, 8, 0], sizes = [2, 8, 32], strides = [1, 1, 1]} : vector<2x16x32xf32> to vector<2x8x32xf32>
    %595 = vector.shape_cast %594 : vector<2x8x32xf32> to vector<16x32xf32>
    %c0_410 = arith.constant 0 : index
    %c0_411 = arith.constant 0 : index
    %596 = vector.load %arg23[%c0_410, %c0_411] : memref<1x32xf32, #tpu.memory_space<vmem>>, vector<1x32xf32>
    %c0_412 = arith.constant 0 : index
    %c0_413 = arith.constant 0 : index
    %597 = vector.load %arg24[%c0_412, %c0_413] : memref<1x32xf32, #tpu.memory_space<vmem>>, vector<1x32xf32>
    %cst_414 = arith.constant dense<0.000000e+00> : vector<16xf32>
    %598 = vector.multi_reduction <add>, %595, %cst_414 [1] : vector<16x32xf32> to vector<16xf32>
    %599 = vector.shape_cast %598 : vector<16xf32> to vector<16x1xf32>
    %cst_415 = arith.constant 3.200000e+01 : f32
    %600 = vector.broadcast %cst_415 : f32 to vector<16x1xf32>
    %601 = arith.divf %599, %600 : vector<16x1xf32>
    %602 = vector.broadcast %601 : vector<16x1xf32> to vector<16x32xf32>
    %603 = arith.subf %595, %602 : vector<16x32xf32>
    %604 = arith.mulf %603, %603 : vector<16x32xf32>
    %cst_416 = arith.constant dense<0.000000e+00> : vector<16xf32>
    %605 = vector.multi_reduction <add>, %604, %cst_416 [1] : vector<16x32xf32> to vector<16xf32>
    %606 = vector.shape_cast %605 : vector<16xf32> to vector<16x1xf32>
    %cst_417 = arith.constant 3.200000e+01 : f32
    %607 = vector.broadcast %cst_417 : f32 to vector<16x1xf32>
    %608 = arith.divf %606, %607 : vector<16x1xf32>
    %609 = vector.broadcast %601 : vector<16x1xf32> to vector<16x32xf32>
    %610 = arith.subf %595, %609 : vector<16x32xf32>
    %cst_418 = arith.constant 9.99999974E-6 : f32
    %611 = vector.broadcast %cst_418 : f32 to vector<16x1xf32>
    %612 = arith.addf %608, %611 : vector<16x1xf32>
    %613 = math.rsqrt %612 : vector<16x1xf32>
    %614 = vector.broadcast %613 : vector<16x1xf32> to vector<16x32xf32>
    %615 = arith.mulf %610, %614 : vector<16x32xf32>
    %616 = vector.broadcast %596 : vector<1x32xf32> to vector<16x32xf32>
    %617 = arith.mulf %615, %616 : vector<16x32xf32>
    %618 = vector.broadcast %597 : vector<1x32xf32> to vector<16x32xf32>
    %619 = arith.addf %617, %618 : vector<16x32xf32>
    %620 = math.tanh %619 : vector<16x32xf32>
    %c0_419 = arith.constant 0 : index
    %c0_420 = arith.constant 0 : index
    %621 = vector.load %arg25[%c0_419, %c0_420] : memref<32x32xf32, #tpu.memory_space<vmem>>, vector<32x32xf32>
    %c0_421 = arith.constant 0 : index
    %c0_422 = arith.constant 0 : index
    %622 = vector.load %arg26[%c0_421, %c0_422] : memref<1x32xf32, #tpu.memory_space<vmem>>, vector<1x32xf32>
    %cst_423 = arith.constant dense<0.000000e+00> : vector<16x32xf32>
    %623 = tpu.matmul %620, %621, %cst_423 {dimension_numbers = #tpu.dot_dimension_numbers<[1], [0], [0], [1], [0, 0, 1, 1], [], []>} : vector<16x32xf32>, vector<32x32xf32>, vector<16x32xf32> -> vector<16x32xf32>
    %624 = vector.broadcast %622 : vector<1x32xf32> to vector<16x32xf32>
    %625 = arith.addf %623, %624 : vector<16x32xf32>
    %cst_424 = arith.constant 0.000000e+00 : f32
    %626 = vector.broadcast %cst_424 : f32 to vector<16x32xf32>
    %627 = arith.maximumf %625, %626 : vector<16x32xf32>
    %c0_425 = arith.constant 0 : index
    %c0_426 = arith.constant 0 : index
    %628 = vector.load %arg27[%c0_425, %c0_426] : memref<1x32xf32, #tpu.memory_space<vmem>>, vector<1x32xf32>
    %629 = vector.broadcast %628 : vector<1x32xf32> to vector<16x32xf32>
    %630 = arith.mulf %627, %629 : vector<16x32xf32>
    %cst_427 = arith.constant dense<0.000000e+00> : vector<16xf32>
    %631 = vector.multi_reduction <add>, %630, %cst_427 [1] : vector<16x32xf32> to vector<16xf32>
    %632 = vector.shape_cast %631 : vector<16xf32> to vector<16x1xf32>
    %c0_428 = arith.constant 0 : index
    %c0_429 = arith.constant 0 : index
    %633 = vector.load %arg28[%c0_428, %c0_429] : memref<1x1xf32, #tpu.memory_space<vmem>>, vector<1x1xf32>
    %634 = vector.broadcast %633 : vector<1x1xf32> to vector<16x1xf32>
    %635 = arith.addf %632, %634 : vector<16x1xf32>
    %c0_430 = arith.constant 0 : index
    %c0_431 = arith.constant 0 : index
    %636 = vector.load %arg29[%c0_430, %c0_431] : memref<32x32xf32, #tpu.memory_space<vmem>>, vector<32x32xf32>
    %c0_432 = arith.constant 0 : index
    %c0_433 = arith.constant 0 : index
    %637 = vector.load %arg30[%c0_432, %c0_433] : memref<1x32xf32, #tpu.memory_space<vmem>>, vector<1x32xf32>
    %cst_434 = arith.constant dense<0.000000e+00> : vector<16x32xf32>
    %638 = tpu.matmul %620, %636, %cst_434 {dimension_numbers = #tpu.dot_dimension_numbers<[1], [0], [0], [1], [0, 0, 1, 1], [], []>} : vector<16x32xf32>, vector<32x32xf32>, vector<16x32xf32> -> vector<16x32xf32>
    %639 = vector.broadcast %637 : vector<1x32xf32> to vector<16x32xf32>
    %640 = arith.addf %638, %639 : vector<16x32xf32>
    %cst_435 = arith.constant 0.000000e+00 : f32
    %641 = vector.broadcast %cst_435 : f32 to vector<16x32xf32>
    %642 = arith.maximumf %640, %641 : vector<16x32xf32>
    %c0_436 = arith.constant 0 : index
    %c0_437 = arith.constant 0 : index
    %643 = vector.load %arg31[%c0_436, %c0_437] : memref<1x32xf32, #tpu.memory_space<vmem>>, vector<1x32xf32>
    %644 = vector.broadcast %643 : vector<1x32xf32> to vector<16x32xf32>
    %645 = arith.mulf %642, %644 : vector<16x32xf32>
    %cst_438 = arith.constant dense<0.000000e+00> : vector<16xf32>
    %646 = vector.multi_reduction <add>, %645, %cst_438 [1] : vector<16x32xf32> to vector<16xf32>
    %647 = vector.shape_cast %646 : vector<16xf32> to vector<16x1xf32>
    %c0_439 = arith.constant 0 : index
    %c0_440 = arith.constant 0 : index
    %648 = vector.load %arg32[%c0_439, %c0_440] : memref<1x1xf32, #tpu.memory_space<vmem>>, vector<1x1xf32>
    %649 = vector.broadcast %648 : vector<1x1xf32> to vector<16x1xf32>
    %650 = arith.addf %647, %649 : vector<16x1xf32>
    %651 = tpu.concatenate %635, %650 in 1 : vector<16x1xf32>, vector<16x1xf32> -> vector<16x2xf32>
    %c0_441 = arith.constant 0 : index
    %c0_442 = arith.constant 0 : index
    %652 = vector.load %arg33[%c0_441, %c0_442] : memref<16x2xf32, #tpu.memory_space<vmem>>, vector<16x2xf32>
    tpu.vector_store %arg33[%c0_441, %c0_442], %651 {strides = array<i32>} : memref<16x2xf32, #tpu.memory_space<vmem>>, vector<16x2xf32>,
    return
  }
}

</mosaic_0001>

<bundles_post_ra>
// kernel: critic_forward.1
= control target key start
LH: loop header
LB: loop body
LE: loop exit
PB: predicated region body
PF: predicated region fallthrough
CT: control target
= control target key end

     0   :  { %s4609_s3 = smov 2   ;;  %s4610_s7 = smov 4   ;;  %vm194_vm0 = vcmask 1043456   ;;  %vm187_vm1 = vcmask 31744   ;;  %vm150_vm2 = vcmask 130048   ;;  %vm252_vm3 = vcmask 261120   ;;  %s5771_s0 = inlined_call_operand.smem [shape: u32[34], index: -1, kind: input, shape index: {}] }
   0x1   :  { %s3922_s6 = sld [smem:[%s5771_s0 + %s4609_s3]]   ;;  %s4611_s11 = smov 1   ;;  %v4617_v27 = vmov 32.0  }
   0x2   :  { %s3924_s10 = sld [smem:[%s5771_s0 + %s4610_s7]]   ;;  %s4612_s18 = smov 5   ;;  %4423 = vrcp.f32 %v4617_v27 }
   0x3   :  { %s3921_s14 = sld [smem:[%s5771_s0 + %s4611_s11]]   ;;  %s4613_s22 = smov 3  }
   0x4   :  { %s1_s17 = sld [smem:[%s5771_s0]]   ;;  %s4614_s26 = smov 6  }
   0x5   :  { %s3925_s21 = sld [smem:[%s5771_s0 + %s4612_s18]]   ;;  %s4615_s30 = smov 7  }
   0x6   :  { %s3923_s25 = sld [smem:[%s5771_s0 + %s4613_s22]]   ;;  %s4616_s4 = smov 8  }
   0x7   :  { %v145_v0 = vld [vmem:[%s3922_s6 + $0x8] sm:$0xff]  ;;  %v144_v1 = vld [vmem:[%s3922_s6] sm:$0xff]  ;;  %s3926_s29 = sld [smem:[%s5771_s0 + %s4614_s26]]   ;;  %s4618_s8 = smov 12  }
   0x8   :  { %171 = vmatpush.msra.mxu0 %v145_v0  ;;  %v182_v2 = vld [vmem:[%s3924_s10] sm:$0xf]  ;;  %s4689_s3 = sld [smem:[%s5771_s0 + %s4615_s30]]   ;;  %v4424_v28 = vpop.eup %4423  ;;  %s4619_s13 = smov 11  }
   0x9   :  { %3956 = vmatpush.msk.msra.mxu1 %vm194_vm0, %v182_v2  ;;  %v180_v3 = vld [vmem:[%s3921_s14] sm:$0xff]  ;;  %4336 = vmatpush.msk.msra.mxu2 %vm194_vm0, %v182_v2  ;;  %v181_v4 = vld [vmem:[%s3921_s14 + $0x8] sm:$0xff]  ;;  %s4696_s7 = sld [smem:[%s5771_s0 + %s4616_s4]]   ;;  %v266_v29 = vmul.f32 32.0, %v4424_v28  ;;  %vm270_vm4 = vweird.f32 %v4424_v28  ;;  %s4624_s4 = smov 15  }
   0xa   :  { %3957 = vmatmul.msk.f32.vlgmr.msra.gmra.mxu1 %vm187_vm1, %v180_v3  ;;  %172 = vmatpush.msra.mxu0 %v144_v1  ;;  %v142_v5 = vld [vmem:[%s1_s17] sm:$0xff]  ;;  %v143_v6 = vld [vmem:[%s1_s17 + $0x8] sm:$0xff]  ;;  %s4731_s12 = sld [smem:[%s5771_s0 + %s4618_s8]]   ;;  %s4620_s17 = smov 9  }
   0xb   :  { %3954 = vmatmul.msk.f32.vlgmr.msra.gmra.mxu0 %vm150_vm2, %v142_v5  ;;  %3958 = vmatmul.msk.f32.vlgmr.msra.gmra.mxu2 %vm187_vm1, %v181_v4  ;;  %v4375_v7 = vld [vmem:[%s3925_s21] ss:$0 sm:$0xff]  ;;  %v267_v30 = vsub.f32 1.0, %v266_v29  ;;  %s4736_s16 = sld [smem:[%s5771_s0 + %s4619_s13]]   ;;  %s4621_s21 = smov 13   ;;  %vm485_vm1 = vcmask 64512  }
   0xc   :  { %v4376_v11 = vld [vmem:[%s3923_s25] ss:$0 sm:$0xff]  ;;  %s4741_s20 = sld [smem:[%s5771_s0 + %s4620_s17]]   ;;  %s4622_s25 = smov 14  }
   0xd   :  { %v222_v9 = vld [vmem:[%s3926_s29 + $0x8] sm:$0xff]  ;;  %v221_v16 = vld [vmem:[%s3926_s29] sm:$0xff]  ;;  %v268_v31 = vmul.f32 %v4424_v28, %v267_v30  ;;  %s4747_s24 = sld [smem:[%s5771_s0 + %s4621_s21]]   ;;  %s4623_s29 = smov 10  }
   0xe   :  { %v4377_v27 = vld [vmem:[%s4689_s3] ss:$0 sm:$0xff]  ;;  %s4772_s28 = sld [smem:[%s5771_s0 + %s4622_s25]]   ;;  %s4625_s9 = smov 16  }
   0xf   :  { %v269_v32 = vadd.f32 %v4424_v28, %v268_v31  ;;  %v4378_v31 = vld [vmem:[%s4696_s7] ss:$0 sm:$0xff]  ;;  %s4784_s2 = sld [smem:[%s5771_s0 + %s4623_s29]]   ;;  %s4626_s15 = smov 17  }
  0x10   :  { %s4890_s8 = sld [smem:[%s5771_s0 + %s4624_s4]]   ;;  %s4627_s21 = smov 18  }
  0x11   :  { %v4698_v33 = vsel %vm270_vm4, %v4424_v28, %v269_v32  ;;  %v414_v54 = vld [vmem:[%s4736_s16 + $0x18] sm:$0xff]  ;;  %v413_v55 = vld [vmem:[%s4736_s16 + $0x10] sm:$0xff]  ;;  %v412_v56 = vld [vmem:[%s4736_s16 + $0x8] sm:$0xff]  ;;  %s5106_s14 = sld [smem:[%s5771_s0 + %s4625_s9]]   ;;  %s4628_s26 = smov 20  }
  0x12   :  { %4337 = vmatpush.msra.mxu3 %v414_v54  ;;  %431 = vmatpush.msrb.mxu0 %v414_v54  ;;  %v411_v57 = vld [vmem:[%s4736_s16] sm:$0xff]  ;;  %v365_v58 = vld [vmem:[%s4741_s20 + $0x18] sm:$0xff]  ;;  %v364_v60 = vld [vmem:[%s4741_s20 + $0x10] sm:$0xff]  ;;  %s5144_s19 = sld [smem:[%s5771_s0 + %s4626_s15]]   ;;  %s4629_s1 = smov 19  }
  0x13   :  { %3955 = vmatmul.msk.f32.gmra.mxu0 %vm150_vm2, %v143_v6  ;;  %v451_v59 = vld [vmem:[%s4747_s24 + $0x18] sm:$0xff]  ;;  %394 = vmatpush.msrb.mxu2 %v365_v58  ;;  %v450_v61 = vld [vmem:[%s4747_s24 + $0x10] sm:$0xff]  ;;  %v363_v0 = vld [vmem:[%s4741_s20 + $0x8] sm:$0xff]  ;;  %s5151_s25 = sld [smem:[%s5771_s0 + %s4627_s21]]   ;;  %s4630_s9 = smov 21  }
  0x14   :  { %4338 = vmatpush.msra.mxu3 %v413_v55  ;;  %432 = vmatpush.msrb.mxu0 %v413_v55  ;;  %v449_v1 = vld [vmem:[%s4747_s24 + $0x8] sm:$0xff]  ;;  %v362_v3 = vld [vmem:[%s4741_s20] sm:$0xff]  ;;  %s5186_s30 = sld [smem:[%s5771_s0 + %s4628_s26]]   ;;  %s4631_s17 = smov 22  }
  0x15   :  { %468 = vmatpush.msrb.mxu1 %v451_v59  ;;  %395 = vmatpush.msrb.mxu2 %v364_v60  ;;  %v448_v4 = vld [vmem:[%s4747_s24] sm:$0xff]  ;;  %v3986_v55 = vld [vmem:[%s4741_s20 + $0x28] sm:$0xff]  ;;  %s5191_s6 = sld [smem:[%s5771_s0 + %s4629_s1]]  }
  0x16   :  { %4339 = vmatpush.msra.mxu3 %v412_v56  ;;  %433 = vmatpush.msrb.mxu0 %v412_v56  ;;  %v3985_v60 = vld [vmem:[%s4741_s20 + $0x20] sm:$0xff]  ;;  %s5202_s15 = sld [smem:[%s5771_s0 + %s4630_s9]]  }
  0x17   :  { %469 = vmatpush.msrb.mxu1 %v450_v61  ;;  %396 = vmatpush.msrb.mxu2 %v363_v0  ;;  %s5222_s22 = sld [smem:[%s5771_s0 + %s4631_s17]]  }
  0x18   :  { %4340 = vmatpush.msra.mxu3 %v411_v57  ;;  %434 = vmatpush.msrb.mxu0 %v411_v57 }
  0x19   :  { %470 = vmatpush.msrb.mxu1 %v449_v1  ;;  %397 = vmatpush.msrb.mxu2 %v362_v3 }
  0x1b   :  { %471 = vmatpush.msrb.mxu1 %v448_v4 }
  0x87   :  { %v215_v8 = vpop.f32.mrf.mxu1 }
  0x88   :  { %v216_v10 = vadd.f32 %v4375_v7, %v215_v8  ;;  %v174_v12 = vpop.f32.mrf.mxu0 }
  0x89   :  { %v175_v14 = vadd.f32 %v4376_v11, %v174_v12 }
  0x8a   :  { %v4672_v13 = vadd.f32 %v222_v9, %v216_v10 }
  0x8b   :  { %v4676_v17 = vadd.f32 %v221_v16, %v175_v14 }
  0x8c   :  { %v256_v15 = vsel %vm252_vm3, %v4672_v13, 0.0 }
  0x8d   :  { %257 = vadd.xlane.f32.xlu0 %v256_v15  ;;  %v253_v23 = vsel %vm252_vm3, %v4676_v17, 0.0 }
  0x8e   :  { %v218_v19 = vpop.f32.mrf.mxu2 }
  0x8f   :  { %v219_v22 = vadd.f32 %v4375_v7, %v218_v19 }
  0x90   :  { %v177_v18 = vpop.f32.mrf.mxu0 }
  0x91   :  { %v178_v20 = vadd.f32 %v4376_v11, %v177_v18  ;;  %v4684_v25 = vadd.f32 %v222_v9, %v219_v22 }
  0x93   :  { %v4678_v21 = vadd.f32 %v221_v16, %v178_v20  ;;  %v262_v26 = vsel %vm252_vm3, %v4684_v25, 0.0 }
  0x95   :  { %254 = vadd.xlane.f32.xlu0 %v253_v23  ;;  %v259_v24 = vsel %vm252_vm3, %v4678_v21, 0.0 }
  0x96   :  { %260 = vadd.xlane.f32.xlu1 %v259_v24 }
  0x9e   :  { %263 = vadd.xlane.f32.xlu1 %v262_v26 }
 0x100   :  { %v258_v34 = vpop.xlane.xlu0 %257 }
 0x101   :  { %v273_v35 = vmul.f32 %v4698_v33, %v258_v34 }
 0x103   :  { %v4702_v36 = vsub.f32 %v4672_v13, %v273_v35 }
 0x105   :  { %v281_v37 = vmul.f32 %v4702_v36, %v4702_v36 }
 0x107   :  { %v287_v38 = vsel %vm252_vm3, %v281_v37, 0.0 }
 0x108   :  { %288 = vadd.xlane.f32.xlu2 %v287_v38  ;;  %v255_v39 = vpop.xlane.xlu0 %254 }
 0x109   :  { %v272_v40 = vmul.f32 %v4698_v33, %v255_v39  ;;  %v261_v41 = vpop.xlane.xlu1 %260 }
 0x10a   :  { %v274_v42 = vmul.f32 %v4698_v33, %v261_v41 }
 0x10b   :  { %v4710_v43 = vsub.f32 %v4676_v17, %v272_v40 }
 0x10c   :  { %v4713_v44 = vsub.f32 %v4678_v21, %v274_v42 }
 0x10d   :  { %v280_v45 = vmul.f32 %v4710_v43, %v4710_v43 }
 0x10e   :  { %v282_v46 = vmul.f32 %v4713_v44, %v4713_v44 }
 0x10f   :  { %v284_v47 = vsel %vm252_vm3, %v280_v45, 0.0 }
 0x110   :  { %285 = vadd.xlane.f32.xlu2 %v284_v47  ;;  %v290_v48 = vsel %vm252_vm3, %v282_v46, 0.0 }
 0x111   :  { %v264_v49 = vpop.xlane.xlu1 %263  ;;  %291 = vadd.xlane.f32.xlu0 %v290_v48  ;;  %v3988_v48 = vld [vmem:[%s4741_s20 + $0x38] sm:$0xff] }
 0x112   :  { %v275_v50 = vmul.f32 %v4698_v33, %v264_v49  ;;  %v3987_v49 = vld [vmem:[%s4741_s20 + $0x30] sm:$0xff]  ;;  %693 = vmatpush.msra.mxu1 %v3988_v48 }
 0x114   :  { %v4723_v51 = vsub.f32 %v4684_v25, %v275_v50  ;;  %694 = vmatpush.msra.mxu1 %v3987_v49 }
 0x116   :  { %v283_v52 = vmul.f32 %v4723_v51, %v4723_v51  ;;  %695 = vmatpush.msra.mxu1 %v3986_v55 }
 0x118   :  { %v293_v53 = vsel %vm252_vm3, %v283_v52, 0.0  ;;  %696 = vmatpush.msra.mxu1 %v3985_v60 }
 0x119   :  { %294 = vadd.xlane.f32.xlu1 %v293_v53 }
 0x17b   :  { %v289_v62 = vpop.xlane.xlu2 %288 }
 0x17c   :  { %v297_v63 = vmul.f32 %v289_v62, %v4698_v33 }
 0x17e   :  { %v301_v2 = vadd.f32 1e-05, %v297_v63 }
 0x180   :  { %4425 = vrsqrt.f32 %v301_v2  ;;  %vm320_vm6 = vweird.f32 %v301_v2 }
 0x183   :  { %v286_v5 = vpop.xlane.xlu2 %285 }
 0x184   :  { %v296_v6 = vmul.f32 %v286_v5, %v4698_v33  ;;  %v292_v7 = vpop.xlane.xlu0 %291 }
 0x185   :  { %v298_v8 = vmul.f32 %v292_v7, %v4698_v33  ;;  %v4381_v7 = vld [vmem:[%s4784_s2] ss:$0 sm:$0xff] }
 0x186   :  { %v4426_v9 = vpop.eup %4425  ;;  %v300_v10 = vadd.f32 1e-05, %v296_v6 }
 0x187   :  { %v315_v11 = vmul.f32 %v4426_v9, %v301_v2  ;;  %v302_v12 = vadd.f32 1e-05, %v298_v8  ;;  %vm321_vm5 = vweird.f32 %v4426_v9 }
 0x188   :  { %4427 = vrsqrt.f32 %v300_v10  ;;  %vm322_vm7 = vmor %vm320_vm6, %vm321_vm5  ;;  %vm310_vm10 = vweird.f32 %v300_v10 }
 0x189   :  { %v316_v14 = vmul.f32 %v4426_v9, %v315_v11  ;;  %4429 = vrsqrt.f32 %v302_v12  ;;  %vm330_vm12 = vweird.f32 %v302_v12  ;;  %v4380_v11 = vld [vmem:[%s4772_s28] ss:$0 sm:$0xff] }
 0x18b   :  { %v317_v15 = vmul.f32 0.5, %v316_v14 }
 0x18c   :  { %v295_v16 = vpop.xlane.xlu1 %294 }
 0x18d   :  { %v318_v18 = vsub.f32 1.5, %v317_v15  ;;  %v299_v19 = vmul.f32 %v295_v16, %v4698_v33 }
 0x18e   :  { %v4428_v20 = vpop.eup %4427 }
 0x18f   :  { %v4430_v22 = vpop.eup %4429  ;;  %v319_v23 = vmul.f32 %v4426_v9, %v318_v18  ;;  %v305_v24 = vmul.f32 %v4428_v20, %v300_v10  ;;  %v303_v26 = vadd.f32 1e-05, %v299_v19  ;;  %vm311_vm8 = vweird.f32 %v4428_v20 }
 0x190   :  { %v325_v28 = vmul.f32 %v4430_v22, %v302_v12  ;;  %vm331_vm9 = vweird.f32 %v4430_v22  ;;  %vm312_vm11 = vmor %vm310_vm10, %vm311_vm8 }
 0x191   :  { %v323_v29 = vsel %vm322_vm7, %v4426_v9, %v319_v23  ;;  %v306_v30 = vmul.f32 %v4428_v20, %v305_v24  ;;  %4431 = vrsqrt.f32 %v303_v26  ;;  %vm332_vm13 = vmor %vm330_vm12, %vm331_vm9  ;;  %vm340_vm15 = vweird.f32 %v303_v26  ;;  %v3997_v24 = vld [vmem:[%s4736_s16 + $0x38] sm:$0xff] }
 0x192   :  { %v345_v32 = vmul.f32 %v323_v29, %v4702_v36  ;;  %v326_v34 = vmul.f32 %v4430_v22, %v325_v28  ;;  %v3996_v28 = vld [vmem:[%s4736_s16 + $0x30] sm:$0xff] }
 0x193   :  { %v307_v35 = vmul.f32 0.5, %v306_v30  ;;  %v3995_v30 = vld [vmem:[%s4736_s16 + $0x28] sm:$0xff] }
 0x194   :  { %v352_v37 = vmul.f32 %v4377_v27, %v345_v32  ;;  %v327_v38 = vmul.f32 0.5, %v326_v34  ;;  %v3994_v32 = vld [vmem:[%s4736_s16 + $0x20] sm:$0xff] }
 0x195   :  { %v308_v39 = vsub.f32 1.5, %v307_v35 }
 0x196   :  { %v4767_v40 = vadd.f32 %v4378_v31, %v352_v37  ;;  %v328_v41 = vsub.f32 1.5, %v327_v38  ;;  %v227_v38 = vlaneseq }
 0x197   :  { %v4432_v42 = vpop.eup %4431  ;;  %v309_v45 = vmul.f32 %v4428_v20, %v308_v39 }
 0x198   :  { %v329_v36 = vmul.f32 %v4430_v22, %v328_v41  ;;  %v335_v46 = vmul.f32 %v4432_v42, %v303_v26  ;;  %3966 = vmatmul.msk.f32.vlgmr.msra.gmra.mxu3 %vm252_vm3, %v4767_v40  ;;  %vm341_vm14 = vweird.f32 %v4432_v42  ;;  %v231_v39 = vand.u32 127, %v227_v38 }
 0x199   :  { %v313_v47 = vsel %vm312_vm11, %v4428_v20, %v309_v45  ;;  %vm342_vm0 = vmor %vm340_vm15, %vm341_vm14 }
 0x19a   :  { %v344_v50 = vmul.f32 %v313_v47, %v4710_v43  ;;  %v333_v52 = vsel %vm332_vm13, %v4430_v22, %v329_v36  ;;  %v336_v53 = vmul.f32 %v4432_v42, %v335_v46  ;;  %v228_v46 = vshrl.u32 %v227_v38, 7 }
 0x19b   :  { %v346_v54 = vmul.f32 %v333_v52, %v4713_v44  ;;  %v243_v47 = vmul.u32 2, %v231_v39  ;;  %vm242_vm4 = vcmp.lt.s32.totalorder %v231_v39, 8 }
 0x19c   :  { %v351_v56 = vmul.f32 %v4377_v27, %v344_v50  ;;  %v337_v57 = vmul.f32 0.5, %v336_v53  ;;  %v234_v49 = vmul.u32 2, %v228_v46 }
 0x19d   :  { %v353_v58 = vmul.f32 %v4377_v27, %v346_v54 }
 0x19e   :  { %v4786_v59 = vadd.f32 %v4378_v31, %v351_v56  ;;  %v338_v43 = vsub.f32 1.5, %v337_v57  ;;  %v239_v57 = vadd.s32 1, %v234_v49 }
 0x19f   :  { %v4789_v61 = vadd.f32 %v4378_v31, %v353_v58 }
 0x1a0   :  { %v339_v44 = vmul.f32 %v4432_v42, %v338_v43  ;;  %3961 = vmatmul.msk.f32.vlgmr.msrb.gmra.mxu2 %vm252_vm3, %v4786_v59  ;;  %3965 = vmatmul.msk.f32.vlgmr.msrb.gmra.mxu0 %vm252_vm3, %v4786_v59 }
 0x1a1   :  { %3969 = vmatmul.msk.f32.vlgmr.msrb.gmra.mxu1 %vm252_vm3, %v4786_v59  ;;  %3967 = vmatmul.msk.f32.gmra.mxu3 %vm252_vm3, %v4789_v61 }
 0x1a2   :  { %v343_v62 = vsel %vm342_vm0, %v4432_v42, %v339_v44  ;;  %v3960_v42 = vadd.s32 4294967288, %v231_v39 }
 0x1a3   :  { %v347_v63 = vmul.f32 %v343_v62, %v4723_v51  ;;  %v4379_v51 = vld [vmem:[%s4731_s12] ss:$0 sm:$0xff] }
 0x1a4   :  { %v245_v45 = vmul.u32 2, %v3960_v42 }
 0x1a5   :  { %v354_v0 = vmul.f32 %v4377_v27, %v347_v63 }
 0x1a6   :  { %v246_v48 = vadd.s32 1, %v245_v45 }
 0x1a7   :  { %v4800_v1 = vadd.f32 %v4378_v31, %v354_v0 }
 0x1a8   :  { %3962 = vmatmul.msk.f32.gmra.mxu2 %vm252_vm3, %v4767_v40  ;;  %v247_v50 = vsel %vm242_vm4, %v243_v47, %v246_v48 }
 0x1a9   :  { %3970 = vmatmul.msk.f32.gmra.mxu1 %vm252_vm3, %v4767_v40  ;;  %3968 = vmatmul.msk.f32.gmra.mxu3 %vm252_vm3, %v4800_v1  ;;  %vm4847_vm5 = vcmp.ge.s32.totalorder %v234_v49, %v247_v50  ;;  %vm4854_vm6 = vcmp.ge.s32.totalorder %v239_v57, %v247_v50  ;;  %v4382_v49 = vld [vmem:[%s4784_s2 + $0x1] ss:$0 sm:$0xff] }
 0x1b0   :  { %3963 = vmatmul.msk.f32.gmra.mxu2 %vm252_vm3, %v4789_v61 }
 0x1b1   :  { %3971 = vmatmul.msk.f32.gmra.mxu1 %vm252_vm3, %v4789_v61 }
 0x1b8   :  { %3964 = vmatmul.msk.f32.gmra.mxu2 %vm252_vm3, %v4800_v1 }
 0x1b9   :  { %3972 = vmatmul.msk.f32.gmra.mxu1 %vm252_vm3, %v4800_v1 }
 0x1c1   :  { %3990 = vmatmul.msk.f32.vlgmr.msra.gmra.mxu1 %vm252_vm3, %v4786_v59 }
 0x1c9   :  { %3991 = vmatmul.msk.f32.gmra.mxu1 %vm252_vm3, %v4767_v40 }
 0x1d1   :  { %3992 = vmatmul.msk.f32.gmra.mxu1 %vm252_vm3, %v4789_v61 }
 0x1d9   :  { %3993 = vmatmul.msk.f32.gmra.mxu1 %vm252_vm3, %v4800_v1 }
 0x21b   :  { %v439_v2 = vpop.f32.mrf.mxu3 }
 0x21c   :  { %v440_v3 = vadd.f32 %v4379_v51, %v439_v2 }
 0x21d   :  { %v436_v4 = vpop.f32.mrf.mxu0 }
 0x21e   :  { %v473_v5 = vpop.f32.mrf.mxu1  ;;  %3973 = vmatpush.xpose.msk.msra.mxu0 %vm485_vm1, %v440_v3  ;;  %v437_v6 = vadd.f32 %v4379_v51, %v436_v4  ;;  %v4383_v3 = vld [vmem:[%s4731_s12 + $0x1] ss:$0 sm:$0xff] }
 0x21f   :  { %v474_v15 = vadd.f32 %v4380_v11, %v473_v5 }
 0x222   :  { %3974 = vmatpush.xpose.msk.msra.mxu0 %vm485_vm1, %v437_v6 }
 0x223   :  { %v399_v8 = vpop.f32.mrf.mxu2 }
 0x224   :  { %v400_v9 = vadd.f32 %v4381_v7, %v399_v8  ;;  %v442_v10 = vpop.f32.mrf.mxu3 }
 0x225   :  { %v443_v23 = vadd.f32 %v4379_v51, %v442_v10 }
 0x226   :  { %v476_v12 = vpop.f32.mrf.mxu1  ;;  %3975 = vmatmul.msk.f32.vlgmr.msra.gmra.mxu0 %vm485_vm1, %v400_v9 }
 0x227   :  { %v477_v14 = vadd.f32 %v4380_v11, %v476_v12 }
 0x229   :  { %632 = vmatpush.msra.mxu2 %v477_v14 }
 0x22b   :  { %633 = vmatpush.msra.mxu2 %v474_v15  ;;  %v402_v16 = vpop.f32.mrf.mxu2 }
 0x22c   :  { %v403_v18 = vadd.f32 %v4381_v7, %v402_v16  ;;  %v445_v19 = vpop.f32.mrf.mxu3 }
 0x22d   :  { %v446_v20 = vadd.f32 %v4379_v51, %v445_v19 }
 0x22e   :  { %v479_v22 = vpop.f32.mrf.mxu1  ;;  %3976 = vmatmul.msk.f32.gmra.mxu0 %vm485_vm1, %v403_v18 }
 0x22f   :  { %3977 = vmatpush.xpose.msk.msrb.mxu0 %vm485_vm1, %v446_v20  ;;  %v480_v34 = vadd.f32 %v4380_v11, %v479_v22 }
 0x233   :  { %v405_v26 = vpop.f32.mrf.mxu2  ;;  %3978 = vmatpush.xpose.msk.msrb.mxu0 %vm485_vm1, %v443_v23 }
 0x234   :  { %v406_v27 = vadd.f32 %v4381_v7, %v405_v26 }
 0x236   :  { %v482_v29 = vpop.f32.mrf.mxu1  ;;  %3979 = vmatmul.msk.f32.vlgmr.msrb.gmra.mxu0 %vm485_vm1, %v406_v27 }
 0x237   :  { %732 = vmatpush.msra.mxu0 %v3997_v24  ;;  %v483_v31 = vadd.f32 %v4380_v11, %v482_v29 }
 0x239   :  { %733 = vmatpush.msra.mxu0 %v3996_v28  ;;  %661 = vmatpush.msrb.mxu3 %v483_v31 }
 0x23b   :  { %734 = vmatpush.msra.mxu0 %v3995_v30  ;;  %662 = vmatpush.msrb.mxu3 %v480_v34  ;;  %v408_v35 = vpop.f32.mrf.mxu2 }
 0x23c   :  { %v409_v37 = vadd.f32 %v4381_v7, %v408_v35 }
 0x23d   :  { %735 = vmatpush.msra.mxu0 %v3994_v32 }
 0x23e   :  { %3980 = vmatmul.msk.f32.gmra.mxu0 %vm485_vm1, %v409_v37 }
 0x246   :  { %3999 = vmatmul.msk.f32.vlgmr.msra.gmra.mxu0 %vm252_vm3, %v4786_v59 }
 0x24e   :  { %4000 = vmatmul.msk.f32.gmra.mxu0 %vm252_vm3, %v4767_v40 }
 0x256   :  { %4001 = vmatmul.msk.f32.gmra.mxu0 %vm252_vm3, %v4789_v61 }
 0x25e   :  { %4002 = vmatmul.msk.f32.gmra.mxu0 %vm252_vm3, %v4800_v1 }
 0x2a3   :  { %v515_v41 = vpop.f32.mrf.mxu0 }
 0x2a4   :  { %v556_v63 = vmul.f32 0.35355338, %v515_v41 }
 0x2a6   :  { %v564_v51 = vsel %vm4847_vm5, %v556_v63, -1e+30  ;;  %v4006_v63 = vld [vmem:[%s4747_s24 + $0x38] sm:$0xff] }
 0x2a7   :  { %v568_v2 = vsel %vm150_vm2, %v564_v51, -inf  ;;  %771 = vmatpush.msrb.mxu2 %v4006_v63 }
 0x2ab   :  { %v518_v36 = vpop.f32.mrf.mxu0 }
 0x2ac   :  { %v557_v16 = vmul.f32 0.35355338, %v518_v36  ;;  %v698_v36 = vpop.f32.mrf.mxu1 }
 0x2ae   :  { %v565_v20 = vsel %vm4854_vm6, %v557_v16, -1e+30 }
 0x2af   :  { %v571_v24 = vsel %vm150_vm2, %v565_v20, -inf }
 0x2b3   :  { %v550_v52 = vpop.f32.mrf.mxu0 }
 0x2b4   :  { %v558_v53 = vmul.f32 0.35355338, %v550_v52 }
 0x2b6   :  { %v566_v55 = vsel %vm4847_vm5, %v558_v53, -1e+30  ;;  %v699_v53 = vadd.f32 %v4382_v49, %v698_v36 }
 0x2b7   :  { %v574_v56 = vsel %vm150_vm2, %v566_v55, -inf }
 0x2b8   :  { %575 = vmax.xlane.f32.xlu2 %v574_v56  ;;  %v701_v56 = vpop.f32.mrf.mxu1 }
 0x2b9   :  { %v702_v57 = vadd.f32 %v4382_v49, %v701_v56 }
 0x2bb   :  { %v553_v58 = vpop.f32.mrf.mxu0 }
 0x2bc   :  { %v559_v43 = vmul.f32 0.35355338, %v553_v58 }
 0x2be   :  { %v567_v44 = vsel %vm4854_vm6, %v559_v43, -1e+30 }
 0x2bf   :  { %v577_v62 = vsel %vm150_vm2, %v567_v44, -inf }
 0x2c0   :  { %578 = vmax.xlane.f32.xlu0 %v577_v62  ;;  %v704_v58 = vpop.f32.mrf.mxu1 }
 0x2c1   :  { %v705_v43 = vadd.f32 %v4382_v49, %v704_v58 }
 0x2c3   :  { %v737_v0 = vpop.f32.mrf.mxu0 }
 0x2c4   :  { %v738_v6 = vadd.f32 %v4383_v3, %v737_v0  ;;  %v4005_v0 = vld [vmem:[%s4747_s24 + $0x30] sm:$0xff] }
 0x2c5   :  { %772 = vmatpush.msrb.mxu2 %v4005_v0 }
 0x2c8   :  { %569 = vmax.xlane.f32.xlu0 %v568_v2  ;;  %v4003_v2 = vld [vmem:[%s4747_s24 + $0x20] sm:$0xff] }
 0x2cb   :  { %v740_v4 = vpop.f32.mrf.mxu0 }
 0x2cc   :  { %v741_v5 = vadd.f32 %v4383_v3, %v740_v4 }
 0x2ce   :  { %4012 = vmatpush.xpose.msk.msra.mxu3 %vm485_vm1, %v741_v5 }
 0x2d2   :  { %4013 = vmatpush.xpose.msk.msra.mxu3 %vm485_vm1, %v738_v6 }
 0x2d3   :  { %v743_v29 = vpop.f32.mrf.mxu0 }
 0x2d4   :  { %v744_v42 = vadd.f32 %v4383_v3, %v743_v29 }
 0x2db   :  { %v746_v31 = vpop.f32.mrf.mxu0 }
 0x2dc   :  { %v747_v38 = vadd.f32 %v4383_v3, %v746_v31  ;;  %v670_v3 = vld [vmem:[%s4890_s8] sm:$0xff] }
 0x32b   :  { %v576_v7 = vpop.xlane.xlu2 %575 }
 0x32c   :  { %v582_v8 = vsub.f32 %v566_v55, %v576_v7 }
 0x32e   :  { %v588_v9 = vmul.f32 1.442695, %v582_v8 }
 0x330   :  { %4433 = vpow2.f32 %v588_v9 }
 0x333   :  { %v579_v10 = vpop.xlane.xlu0 %578 }
 0x334   :  { %v583_v11 = vsub.f32 %v567_v44, %v579_v10  ;;  %v707_v44 = vpop.f32.mrf.mxu1 }
 0x335   :  { %v708_v62 = vadd.f32 %v4382_v49, %v707_v44 }
 0x336   :  { %v4434_v12 = vpop.eup %4433  ;;  %v590_v14 = vmul.f32 1.442695, %v583_v11 }
 0x337   :  { %v598_v15 = vsel %vm150_vm2, %v4434_v12, 0.0 }
 0x338   :  { %4435 = vpow2.f32 %v590_v14  ;;  %599 = vadd.xlane.f32.xlu1 %v598_v15 }
 0x33b   :  { %v570_v18 = vpop.xlane.xlu0 %569 }
 0x33c   :  { %v580_v19 = vsub.f32 %v564_v51, %v570_v18  ;;  %v4004_v51 = vld [vmem:[%s4747_s24 + $0x28] sm:$0xff] }
 0x33d   :  { %773 = vmatpush.msrb.mxu2 %v4004_v51 }
 0x33e   :  { %v4436_v22 = vpop.eup %4435  ;;  %v584_v23 = vmul.f32 1.442695, %v580_v19 }
 0x33f   :  { %v601_v26 = vsel %vm150_vm2, %v4436_v22, 0.0  ;;  %774 = vmatpush.msrb.mxu2 %v4003_v2 }
 0x340   :  { %4437 = vpow2.f32 %v584_v23  ;;  %572 = vmax.xlane.f32.xlu1 %v571_v24  ;;  %602 = vadd.xlane.f32.xlu2 %v601_v26 }
 0x346   :  { %v4438_v27 = vpop.eup %4437 }
 0x347   :  { %v592_v28 = vsel %vm150_vm2, %v4438_v27, 0.0 }
 0x348   :  { %593 = vadd.xlane.f32.xlu2 %v592_v28 }
 0x3ab   :  { %v600_v30 = vpop.xlane.xlu1 %599 }
 0x3ac   :  { %4439 = vrcp.f32 %v600_v30 }
 0x3b2   :  { %v4440_v32 = vpop.eup %4439 }
 0x3b3   :  { %v573_v34 = vpop.xlane.xlu1 %572  ;;  %v603_v35 = vpop.xlane.xlu2 %602  ;;  %v610_v37 = vmul.f32 %v4440_v32, %v4434_v12 }
 0x3b4   :  { %v581_v39 = vsub.f32 %v565_v20, %v573_v34  ;;  %4441 = vrcp.f32 %v603_v35 }
 0x3b5   :  { %3983 = vmatmul.msk.f32.vlgmr.msrb.gmra.mxu3 %vm150_vm2, %v610_v37 }
 0x3b6   :  { %v586_v41 = vmul.f32 1.442695, %v581_v39  ;;  %4016 = vmatpush.xpose.msk.msrb.mxu3 %vm485_vm1, %v747_v38  ;;  %v4384_v39 = vld [vmem:[%s4772_s28 + $0x1] ss:$0 sm:$0xff] }
 0x3b8   :  { %4443 = vpow2.f32 %v586_v41 }
 0x3ba   :  { %v4442_v45 = vpop.eup %4441  ;;  %4017 = vmatpush.xpose.msk.msrb.mxu3 %vm485_vm1, %v744_v42 }
 0x3bb   :  { %v594_v46 = vpop.xlane.xlu2 %593  ;;  %v611_v47 = vmul.f32 %v4442_v45, %v4436_v22 }
 0x3bc   :  { %4445 = vrcp.f32 %v594_v46 }
 0x3bd   :  { %3984 = vmatmul.msk.f32.gmra.mxu3 %vm150_vm2, %v611_v47 }
 0x3be   :  { %v4444_v48 = vpop.eup %4443 }
 0x3bf   :  { %v595_v50 = vsel %vm150_vm2, %v4444_v48, 0.0 }
 0x3c0   :  { %596 = vadd.xlane.f32.xlu0 %v595_v50 }
 0x3c2   :  { %v4446_v52 = vpop.eup %4445 }
 0x3c3   :  { %v608_v55 = vmul.f32 %v4446_v52, %v4438_v27 }
 0x3c5   :  { %3981 = vmatmul.msk.f32.vlgmr.msra.gmra.mxu2 %vm150_vm2, %v608_v55  ;;  %4014 = vmatmul.msk.f32.vlgmr.msra.gmra.mxu3 %vm485_vm1, %v699_v53 }
 0x3c6   :  { %1038 = vmatpush.msra.mxu3 %v670_v3 }
 0x3cd   :  { %4015 = vmatmul.msk.f32.gmra.mxu3 %vm485_vm1, %v702_v57 }
 0x3d5   :  { %4018 = vmatmul.msk.f32.vlgmr.msrb.gmra.mxu3 %vm485_vm1, %v705_v43 }
 0x3dd   :  { %4019 = vmatmul.msk.f32.gmra.mxu3 %vm485_vm1, %v708_v62 }
 0x433   :  { %v597_v4 = vpop.xlane.xlu0 %596 }
 0x434   :  { %4447 = vrcp.f32 %v597_v4  ;;  %v4036_v4 = vld [vmem:[%s4741_s20 + $0x58] sm:$0xff] }
 0x438   :  { %v664_v5 = vpop.f32.mrf.mxu3 }
 0x43a   :  { %v4448_v6 = vpop.eup %4447 }
 0x43b   :  { %v609_v7 = vmul.f32 %v4448_v6, %v4444_v48  ;;  %v4035_v6 = vld [vmem:[%s4741_s20 + $0x50] sm:$0xff] }
 0x43d   :  { %3982 = vmatmul.msk.f32.gmra.mxu2 %vm150_vm2, %v609_v7  ;;  %v4044_v7 = vld [vmem:[%s4736_s16 + $0x50] sm:$0xff] }
 0x440   :  { %v667_v8 = vpop.f32.mrf.mxu3 }
 0x445   :  { %4008 = vmatmul.msk.f32.vlgmr.msrb.gmra.mxu2 %vm252_vm3, %v4786_v59 }
 0x448   :  { %v635_v9 = vpop.f32.mrf.mxu2  ;;  %v817_v10 = vpop.f32.mrf.mxu3 }
 0x449   :  { %v858_v11 = vmul.f32 0.35355338, %v817_v10  ;;  %4029 = vmatmul.msk.f32.vlgmr.msra.gmra.mxu3 %vm485_vm1, %v635_v9  ;;  %v4043_v9 = vld [vmem:[%s4736_s16 + $0x48] sm:$0xff] }
 0x44b   :  { %v862_v12 = vsel %vm4847_vm5, %v858_v11, -1e+30  ;;  %v4042_v11 = vld [vmem:[%s4736_s16 + $0x40] sm:$0xff] }
 0x44c   :  { %v866_v14 = vsel %vm150_vm2, %v862_v12, -inf }
 0x44d   :  { %867 = vmax.xlane.f32.xlu0 %v866_v14  ;;  %4009 = vmatmul.msk.f32.gmra.mxu2 %vm252_vm3, %v4767_v40  ;;  %v4033_v14 = vld [vmem:[%s4741_s20 + $0x40] sm:$0xff] }
 0x450   :  { %v820_v15 = vpop.f32.mrf.mxu3 }
 0x451   :  { %v859_v22 = vmul.f32 0.35355338, %v820_v15 }
 0x453   :  { %v863_v26 = vsel %vm4854_vm6, %v859_v22, -1e+30 }
 0x454   :  { %v869_v28 = vsel %vm150_vm2, %v863_v26, -inf }
 0x455   :  { %4010 = vmatmul.msk.f32.gmra.mxu2 %vm252_vm3, %v4789_v61 }
 0x458   :  { %v852_v16 = vpop.f32.mrf.mxu3 }
 0x459   :  { %v860_v18 = vmul.f32 0.35355338, %v852_v16 }
 0x45b   :  { %v864_v19 = vsel %vm4847_vm5, %v860_v18, -1e+30 }
 0x45c   :  { %v872_v20 = vsel %vm150_vm2, %v864_v19, -inf }
 0x45d   :  { %873 = vmax.xlane.f32.xlu1 %v872_v20  ;;  %4011 = vmatmul.msk.f32.gmra.mxu2 %vm252_vm3, %v4800_v1 }
 0x460   :  { %v855_v23 = vpop.f32.mrf.mxu3 }
 0x461   :  { %v861_v24 = vmul.f32 0.35355338, %v855_v23 }
 0x463   :  { %v865_v27 = vsel %vm4854_vm6, %v861_v24, -1e+30 }
 0x464   :  { %v875_v29 = vsel %vm150_vm2, %v865_v27, -inf }
 0x465   :  { %870 = vmax.xlane.f32.xlu1 %v869_v28  ;;  %876 = vmax.xlane.f32.xlu2 %v875_v29  ;;  %v4054_v29 = vld [vmem:[%s4747_s24 + $0x58] sm:$0xff] }
 0x4c0   :  { %v638_v30 = vpop.f32.mrf.mxu2  ;;  %v868_v31 = vpop.xlane.xlu0 %867 }
 0x4c1   :  { %v878_v32 = vsub.f32 %v862_v12, %v868_v31  ;;  %4030 = vmatmul.msk.f32.gmra.mxu3 %vm485_vm1, %v638_v30  ;;  %v4053_v30 = vld [vmem:[%s4747_s24 + $0x50] sm:$0xff]  ;;  %v4052_v31 = vld [vmem:[%s4747_s24 + $0x48] sm:$0xff] }
 0x4c3   :  { %v882_v34 = vmul.f32 1.442695, %v878_v32 }
 0x4c5   :  { %4449 = vpow2.f32 %v882_v34  ;;  %v4051_v34 = vld [vmem:[%s4747_s24 + $0x40] sm:$0xff] }
 0x4c8   :  { %v776_v35 = vpop.f32.mrf.mxu2 }
 0x4c9   :  { %4031 = vmatmul.msk.f32.gmra.mxu3 %vm485_vm1, %v664_v5  ;;  %v777_v46 = vadd.f32 %v4384_v39, %v776_v35  ;;  %v4045_v5 = vld [vmem:[%s4736_s16 + $0x58] sm:$0xff] }
 0x4cb   :  { %v4450_v37 = vpop.eup %4449 }
 0x4cc   :  { %v890_v38 = vsel %vm150_vm2, %v4450_v37, 0.0 }
 0x4cd   :  { %891 = vadd.xlane.f32.xlu1 %v890_v38 }
 0x4d0   :  { %v874_v41 = vpop.xlane.xlu1 %873  ;;  %v779_v42 = vpop.f32.mrf.mxu2 }
 0x4d1   :  { %v880_v45 = vsub.f32 %v864_v19, %v874_v41  ;;  %v780_v36 = vadd.f32 %v4384_v39, %v779_v42  ;;  %4032 = vmatmul.msk.f32.gmra.mxu3 %vm485_vm1, %v667_v8  ;;  %v4034_v8 = vld [vmem:[%s4741_s20 + $0x48] sm:$0xff]  ;;  %v4386_v41 = vld [vmem:[%s4731_s12 + $0x2] ss:$0 sm:$0xff] }
 0x4d3   :  { %v886_v47 = vmul.f32 1.442695, %v880_v45  ;;  %930 = vmatpush.msrb.mxu1 %v780_v36  ;;  %v4089_v36 = vld [vmem:[%s4736_s16 + $0x78] sm:$0xff] }
 0x4d5   :  { %4451 = vpow2.f32 %v886_v47  ;;  %931 = vmatpush.msrb.mxu1 %v777_v46  ;;  %v4088_v46 = vld [vmem:[%s4736_s16 + $0x70] sm:$0xff]  ;;  %v4385_v47 = vld [vmem:[%s4784_s2 + $0x2] ss:$0 sm:$0xff] }
 0x4d7   :  { %1074 = vmatpush.msra.mxu1 %v4036_v4 }
 0x4d8   :  { %v871_v48 = vpop.xlane.xlu1 %870  ;;  %v877_v49 = vpop.xlane.xlu2 %876 }
 0x4d9   :  { %v879_v50 = vsub.f32 %v863_v26, %v871_v48  ;;  %v881_v52 = vsub.f32 %v865_v27, %v877_v49  ;;  %v782_v53 = vpop.f32.mrf.mxu2  ;;  %1075 = vmatpush.msra.mxu1 %v4035_v6  ;;  %v4024_v27 = vld [vmem:[%s4890_s8 + $0x8] sm:$0xff] }
 0x4da   :  { %v783_v0 = vadd.f32 %v4384_v39, %v782_v53  ;;  %997 = vmatpush.msra.mxu2 %v4024_v27  ;;  %v4087_v48 = vld [vmem:[%s4736_s16 + $0x68] sm:$0xff] }
 0x4db   :  { %v4452_v55 = vpop.eup %4451  ;;  %v884_v56 = vmul.f32 1.442695, %v879_v50  ;;  %v888_v57 = vmul.f32 1.442695, %v881_v52  ;;  %1076 = vmatpush.msra.mxu1 %v4034_v8  ;;  %v4086_v50 = vld [vmem:[%s4736_s16 + $0x60] sm:$0xff] }
 0x4dc   :  { %v896_v58 = vsel %vm150_vm2, %v4452_v55, 0.0  ;;  %1152 = vmatpush.msrb.mxu2 %v4054_v29 }
 0x4dd   :  { %4453 = vpow2.f32 %v884_v56  ;;  %897 = vadd.xlane.f32.xlu2 %v896_v58  ;;  %1077 = vmatpush.msra.mxu1 %v4033_v14 }
 0x4de   :  { %4455 = vpow2.f32 %v888_v57  ;;  %1153 = vmatpush.msrb.mxu2 %v4053_v30 }
 0x4e0   :  { %1154 = vmatpush.msrb.mxu2 %v4052_v31 }
 0x4e1   :  { %v785_v43 = vpop.f32.mrf.mxu2 }
 0x4e2   :  { %v786_v44 = vadd.f32 %v4384_v39, %v785_v43  ;;  %1155 = vmatpush.msrb.mxu2 %v4051_v34 }
 0x4e3   :  { %v4454_v62 = vpop.eup %4453 }
 0x4e4   :  { %v4456_v63 = vpop.eup %4455  ;;  %959 = vmatpush.msrb.mxu0 %v786_v44  ;;  %v893_v51 = vsel %vm150_vm2, %v4454_v62, 0.0 }
 0x4e5   :  { %894 = vadd.xlane.f32.xlu2 %v893_v51  ;;  %v899_v2 = vsel %vm150_vm2, %v4456_v63, 0.0  ;;  %v4991_v51 = vpop.f32.mrf.mxu3 }
 0x4e6   :  { %900 = vadd.xlane.f32.xlu0 %v899_v2  ;;  %960 = vmatpush.msrb.mxu0 %v783_v0 }
 0x4e8   :  { %1113 = vmatpush.msra.mxu0 %v4045_v5 }
 0x4ea   :  { %1114 = vmatpush.msra.mxu0 %v4044_v7 }
 0x4ec   :  { %1115 = vmatpush.msra.mxu0 %v4043_v9 }
 0x4ee   :  { %1116 = vmatpush.msra.mxu0 %v4042_v11 }
 0x540   :  { %v892_v3 = vpop.xlane.xlu1 %891 }
 0x541   :  { %4457 = vrcp.f32 %v892_v3 }
 0x544   :  { %v4995_v3 = vpop.f32.mrf.mxu3 }
 0x547   :  { %v4458_v10 = vpop.eup %4457 }
 0x548   :  { %v906_v12 = vmul.f32 %v4458_v10, %v4450_v37 }
 0x54a   :  { %4020 = vmatmul.msk.f32.vlgmr.msrb.gmra.mxu1 %vm150_vm2, %v906_v12 }
 0x54c   :  { %v4999_v5 = vpop.f32.mrf.mxu3 }
 0x550   :  { %v898_v15 = vpop.xlane.xlu2 %897 }
 0x551   :  { %4459 = vrcp.f32 %v898_v15  ;;  %v4387_v15 = vld [vmem:[%s4772_s28 + $0x2] ss:$0 sm:$0xff] }
 0x554   :  { %v5005_v8 = vpop.f32.mrf.mxu3 }
 0x557   :  { %v4460_v16 = vpop.eup %4459 }
 0x558   :  { %v908_v18 = vmul.f32 %v4460_v16, %v4452_v55  ;;  %v895_v19 = vpop.xlane.xlu2 %894 }
 0x559   :  { %4461 = vrcp.f32 %v895_v19  ;;  %v901_v20 = vpop.xlane.xlu0 %900  ;;  %v4072_v19 = vld [vmem:[%s4890_s8 + $0x10] sm:$0xff] }
 0x55a   :  { %4463 = vrcp.f32 %v901_v20  ;;  %4022 = vmatmul.msk.f32.vlgmr.msrb.gmra.mxu0 %vm150_vm2, %v908_v18 }
 0x55f   :  { %v4462_v22 = vpop.eup %4461 }
 0x560   :  { %v4464_v23 = vpop.eup %4463  ;;  %v907_v24 = vmul.f32 %v4462_v22, %v4454_v62 }
 0x561   :  { %v909_v26 = vmul.f32 %v4464_v23, %v4456_v63 }
 0x562   :  { %4021 = vmatmul.msk.f32.gmra.mxu1 %vm150_vm2, %v907_v24 }
 0x563   :  { %4023 = vmatmul.msk.f32.gmra.mxu0 %vm150_vm2, %v909_v26 }
 0x56a   :  { %4038 = vmatmul.msk.f32.vlgmr.msra.gmra.mxu1 %vm252_vm3, %v4786_v59 }
 0x56b   :  { %4047 = vmatmul.msk.f32.vlgmr.msra.gmra.mxu0 %vm252_vm3, %v4786_v59 }
 0x572   :  { %4039 = vmatmul.msk.f32.gmra.mxu1 %vm252_vm3, %v4767_v40 }
 0x573   :  { %4048 = vmatmul.msk.f32.gmra.mxu0 %vm252_vm3, %v4767_v40 }
 0x57a   :  { %4040 = vmatmul.msk.f32.gmra.mxu1 %vm252_vm3, %v4789_v61 }
 0x57b   :  { %4049 = vmatmul.msk.f32.gmra.mxu0 %vm252_vm3, %v4789_v61 }
 0x582   :  { %4041 = vmatmul.msk.f32.gmra.mxu1 %vm252_vm3, %v4800_v1 }
 0x583   :  { %4050 = vmatmul.msk.f32.gmra.mxu0 %vm252_vm3, %v4800_v1 }
 0x5c7   :  { %v933_v28 = vpop.f32.mrf.mxu1 }
 0x5c8   :  { %4025 = vmatmul.msk.f32.vlgmr.msra.gmra.mxu2 %vm485_vm1, %v933_v28 }
 0x5c9   :  { %1457 = vmatpush.msra.mxu2 %v4089_v36 }
 0x5cb   :  { %1458 = vmatpush.msra.mxu2 %v4088_v46 }
 0x5cd   :  { %1459 = vmatpush.msra.mxu2 %v4087_v48 }
 0x5cf   :  { %1460 = vmatpush.msra.mxu2 %v4086_v50 }
 0x5d7   :  { %v962_v32 = vpop.f32.mrf.mxu0 }
 0x5df   :  { %v936_v35 = vpop.f32.mrf.mxu1 }
 0x5e0   :  { %v965_v37 = vpop.f32.mrf.mxu0  ;;  %4026 = vmatmul.msk.f32.gmra.mxu2 %vm485_vm1, %v936_v35 }
 0x5e7   :  { %v1079_v39 = vpop.f32.mrf.mxu1 }
 0x5e8   :  { %v1118_v38 = vpop.f32.mrf.mxu0  ;;  %4027 = vmatmul.msk.f32.gmra.mxu2 %vm485_vm1, %v962_v32  ;;  %v1080_v52 = vadd.f32 %v4385_v47, %v1079_v39 }
 0x5e9   :  { %v1119_v49 = vadd.f32 %v4386_v41, %v1118_v38 }
 0x5ef   :  { %v1082_v55 = vpop.f32.mrf.mxu1 }
 0x5f0   :  { %v1121_v42 = vpop.f32.mrf.mxu0  ;;  %4028 = vmatmul.msk.f32.gmra.mxu2 %vm485_vm1, %v965_v37  ;;  %v1083_v56 = vadd.f32 %v4385_v47, %v1082_v55 }
 0x5f1   :  { %v1122_v45 = vadd.f32 %v4386_v41, %v1121_v42 }
 0x5f3   :  { %4060 = vmatpush.xpose.msk.msrb.mxu3 %vm485_vm1, %v1122_v45  ;;  %v5022_v45 = vld [vmem:[%s4731_s12 + $0x3] ss:$0 sm:$0xff] }
 0x5f7   :  { %4061 = vmatpush.xpose.msk.msrb.mxu3 %vm485_vm1, %v1119_v49  ;;  %v1085_v43 = vpop.f32.mrf.mxu1 }
 0x5f8   :  { %v1124_v53 = vpop.f32.mrf.mxu0  ;;  %4056 = vmatmul.msk.f32.vlgmr.msrb.gmra.mxu2 %vm252_vm3, %v4786_v59  ;;  %v1086_v62 = vadd.f32 %v4385_v47, %v1085_v43 }
 0x5f9   :  { %v1125_v44 = vadd.f32 %v4386_v41, %v1124_v53 }
 0x5fa   :  { %4062 = vmatmul.msk.f32.vlgmr.msrb.gmra.mxu3 %vm485_vm1, %v1080_v52 }
 0x5ff   :  { %v1088_v63 = vpop.f32.mrf.mxu1 }
 0x600   :  { %v1127_v57 = vpop.f32.mrf.mxu0  ;;  %4057 = vmatmul.msk.f32.gmra.mxu2 %vm252_vm3, %v4767_v40  ;;  %v1089_v0 = vadd.f32 %v4385_v47, %v1088_v63 }
 0x601   :  { %v1128_v58 = vadd.f32 %v4386_v41, %v1127_v57 }
 0x602   :  { %4063 = vmatmul.msk.f32.gmra.mxu3 %vm485_vm1, %v1083_v56 }
 0x603   :  { %4064 = vmatpush.xpose.msk.msrb.mxu1 %vm485_vm1, %v1128_v58 }
 0x607   :  { %4065 = vmatpush.xpose.msk.msrb.mxu1 %vm485_vm1, %v1125_v44 }
 0x608   :  { %4058 = vmatmul.msk.f32.gmra.mxu2 %vm252_vm3, %v4789_v61 }
 0x60a   :  { %4066 = vmatmul.msk.f32.vlgmr.msrb.gmra.mxu1 %vm485_vm1, %v1086_v62 }
 0x60b   :  { %1378 = vmatpush.msra.mxu1 %v4072_v19  ;;  %v4078_v19 = vld [vmem:[%s4741_s20 + $0x68] sm:$0xff] }
 0x610   :  { %4059 = vmatmul.msk.f32.gmra.mxu2 %vm252_vm3, %v4800_v1 }
 0x612   :  { %4067 = vmatmul.msk.f32.gmra.mxu1 %vm485_vm1, %v1089_v0 }
 0x618   :  { %4091 = vmatmul.msk.f32.vlgmr.msra.gmra.mxu2 %vm252_vm3, %v4786_v59 }
 0x620   :  { %4092 = vmatmul.msk.f32.gmra.mxu2 %vm252_vm3, %v4767_v40 }
 0x628   :  { %4093 = vmatmul.msk.f32.gmra.mxu2 %vm252_vm3, %v4789_v61 }
 0x630   :  { %4094 = vmatmul.msk.f32.gmra.mxu2 %vm252_vm3, %v4800_v1 }
 0x64b   :  { %v4993_v2 = vpop.f32.mrf.mxu2 }
 0x663   :  { %v4997_v4 = vpop.f32.mrf.mxu2 }
 0x66b   :  { %v5001_v6 = vpop.f32.mrf.mxu2 }
 0x673   :  { %v5003_v7 = vpop.f32.mrf.mxu2 }
 0x67b   :  { %v1157_v9 = vpop.f32.mrf.mxu2 }
 0x67c   :  { %v1158_v22 = vadd.f32 %v4387_v15, %v1157_v9 }
 0x67d   :  { %v1198_v10 = vpop.f32.mrf.mxu3 }
 0x67e   :  { %v1239_v11 = vmul.f32 0.35355338, %v1198_v10 }
 0x680   :  { %v1243_v12 = vsel %vm4847_vm5, %v1239_v11, -1e+30 }
 0x681   :  { %v1247_v14 = vsel %vm150_vm2, %v1243_v12, -inf }
 0x682   :  { %1248 = vmax.xlane.f32.xlu0 %v1247_v14 }
 0x683   :  { %v1160_v16 = vpop.f32.mrf.mxu2 }
 0x684   :  { %v1161_v18 = vadd.f32 %v4387_v15, %v1160_v16  ;;  %v4080_v16 = vld [vmem:[%s4741_s20 + $0x78] sm:$0xff] }
 0x685   :  { %v1201_v20 = vpop.f32.mrf.mxu3 }
 0x686   :  { %v1240_v23 = vmul.f32 0.35355338, %v1201_v20  ;;  %1311 = vmatpush.msrb.mxu0 %v1161_v18  ;;  %v4079_v18 = vld [vmem:[%s4741_s20 + $0x70] sm:$0xff]  ;;  %v4077_v20 = vld [vmem:[%s4741_s20 + $0x60] sm:$0xff] }
 0x687   :  { %v1233_v24 = vpop.f32.mrf.mxu1 }
 0x688   :  { %v1241_v26 = vmul.f32 0.35355338, %v1233_v24  ;;  %1312 = vmatpush.msrb.mxu0 %v1158_v22  ;;  %v1244_v27 = vsel %vm4854_vm6, %v1240_v23, -1e+30  ;;  %v4098_v23 = vld [vmem:[%s4747_s24 + $0x78] sm:$0xff]  ;;  %v4097_v24 = vld [vmem:[%s4747_s24 + $0x70] sm:$0xff] }
 0x689   :  { %v1250_v28 = vsel %vm150_vm2, %v1244_v27, -inf }
 0x68a   :  { %1251 = vmax.xlane.f32.xlu1 %v1250_v28  ;;  %v1245_v29 = vsel %vm4847_vm5, %v1241_v26, -1e+30  ;;  %1418 = vmatpush.msra.mxu0 %v4080_v16  ;;  %v4096_v26 = vld [vmem:[%s4747_s24 + $0x68] sm:$0xff]  ;;  %v4095_v28 = vld [vmem:[%s4747_s24 + $0x60] sm:$0xff] }
 0x68b   :  { %v1253_v30 = vsel %vm150_vm2, %v1245_v29, -inf  ;;  %v1163_v31 = vpop.f32.mrf.mxu2 }
 0x68c   :  { %1254 = vmax.xlane.f32.xlu2 %v1253_v30  ;;  %v1164_v41 = vadd.f32 %v4387_v15, %v1163_v31  ;;  %1419 = vmatpush.msra.mxu0 %v4079_v18 }
 0x68e   :  { %1420 = vmatpush.msra.mxu0 %v4078_v19 }
 0x68f   :  { %v1236_v32 = vpop.f32.mrf.mxu1 }
 0x690   :  { %v1242_v34 = vmul.f32 0.35355338, %v1236_v32  ;;  %1421 = vmatpush.msra.mxu0 %v4077_v20 }
 0x692   :  { %v1246_v35 = vsel %vm4854_vm6, %v1242_v34, -1e+30 }
 0x693   :  { %v1256_v37 = vsel %vm150_vm2, %v1246_v35, -inf  ;;  %v1166_v38 = vpop.f32.mrf.mxu2 }
 0x694   :  { %1257 = vmax.xlane.f32.xlu0 %v1256_v37  ;;  %v1167_v39 = vadd.f32 %v4387_v15, %v1166_v38 }
 0x696   :  { %1340 = vmatpush.msra.mxu3 %v1167_v39 }
 0x698   :  { %1341 = vmatpush.msra.mxu3 %v1164_v41 }
 0x69a   :  { %1496 = vmatpush.msrb.mxu3 %v4098_v23 }
 0x69b   :  { %v1462_v42 = vpop.f32.mrf.mxu2 }
 0x69c   :  { %v1463_v47 = vadd.f32 %v5022_v45, %v1462_v42  ;;  %1497 = vmatpush.msrb.mxu3 %v4097_v24 }
 0x69e   :  { %1498 = vmatpush.msrb.mxu3 %v4096_v26 }
 0x6a0   :  { %1499 = vmatpush.msrb.mxu3 %v4095_v28 }
 0x6a3   :  { %v1465_v36 = vpop.f32.mrf.mxu2 }
 0x6a4   :  { %v1466_v46 = vadd.f32 %v5022_v45, %v1465_v36 }
 0x6a6   :  { %4104 = vmatpush.xpose.msk.msrb.mxu1 %vm485_vm1, %v1466_v46 }
 0x6aa   :  { %4105 = vmatpush.xpose.msk.msrb.mxu1 %vm485_vm1, %v1463_v47 }
 0x6ab   :  { %v1468_v22 = vpop.f32.mrf.mxu2 }
 0x6ac   :  { %v1469_v37 = vadd.f32 %v5022_v45, %v1468_v22 }
 0x6f5   :  { %v1249_v48 = vpop.xlane.xlu0 %1248 }
 0x6f6   :  { %v1259_v49 = vsub.f32 %v1243_v12, %v1249_v48 }
 0x6f8   :  { %v1263_v50 = vmul.f32 1.442695, %v1259_v49 }
 0x6fa   :  { %4465 = vpow2.f32 %v1263_v50 }
 0x6fd   :  { %v1252_v52 = vpop.xlane.xlu1 %1251 }
 0x6fe   :  { %v1260_v53 = vsub.f32 %v1244_v27, %v1252_v52  ;;  %v4389_v52 = vld [vmem:[%s4784_s2 + $0x3] ss:$0 sm:$0xff] }
 0x6ff   :  { %v1255_v55 = vpop.xlane.xlu2 %1254 }
 0x700   :  { %v4466_v56 = vpop.eup %4465  ;;  %v1265_v57 = vmul.f32 1.442695, %v1260_v53  ;;  %v1261_v58 = vsub.f32 %v1245_v29, %v1255_v55  ;;  %v1471_v29 = vpop.f32.mrf.mxu2 }
 0x701   :  { %v1271_v43 = vsel %vm150_vm2, %v4466_v56, 0.0  ;;  %v1472_v34 = vadd.f32 %v5022_v45, %v1471_v29 }
 0x702   :  { %4467 = vpow2.f32 %v1265_v57  ;;  %v1267_v44 = vmul.f32 1.442695, %v1261_v58  ;;  %1272 = vadd.xlane.f32.xlu1 %v1271_v43  ;;  %v4390_v57 = vld [vmem:[%s4772_s28 + $0x3] ss:$0 sm:$0xff] }
 0x704   :  { %4469 = vpow2.f32 %v1267_v44 }
 0x707   :  { %v1258_v62 = vpop.xlane.xlu0 %1257 }
 0x708   :  { %v4468_v63 = vpop.eup %4467  ;;  %v1262_v0 = vsub.f32 %v1246_v35, %v1258_v62 }
 0x709   :  { %v1274_v9 = vsel %vm150_vm2, %v4468_v63, 0.0 }
 0x70a   :  { %v4470_v10 = vpop.eup %4469  ;;  %v1269_v11 = vmul.f32 1.442695, %v1262_v0  ;;  %1275 = vadd.xlane.f32.xlu2 %v1274_v9 }
 0x70b   :  { %v1277_v12 = vsel %vm150_vm2, %v4470_v10, 0.0 }
 0x70c   :  { %4471 = vpow2.f32 %v1269_v11  ;;  %1278 = vadd.xlane.f32.xlu0 %v1277_v12 }
 0x712   :  { %v4472_v14 = vpop.eup %4471 }
 0x713   :  { %v1280_v15 = vsel %vm150_vm2, %v4472_v14, 0.0 }
 0x714   :  { %1281 = vadd.xlane.f32.xlu1 %v1280_v15 }
 0x775   :  { %v1273_v27 = vpop.xlane.xlu1 %1272 }
 0x776   :  { %4473 = vrcp.f32 %v1273_v27 }
 0x77c   :  { %v4474_v30 = vpop.eup %4473 }
 0x77d   :  { %v1287_v31 = vmul.f32 %v4474_v30, %v4466_v56  ;;  %v1276_v32 = vpop.xlane.xlu2 %1275 }
 0x77e   :  { %4475 = vrcp.f32 %v1276_v32 }
 0x77f   :  { %v1279_v35 = vpop.xlane.xlu0 %1278  ;;  %4068 = vmatmul.msk.f32.vlgmr.msrb.gmra.mxu0 %vm150_vm2, %v1287_v31 }
 0x780   :  { %4477 = vrcp.f32 %v1279_v35  ;;  %4108 = vmatpush.xpose.msk.msrb.mxu0 %vm485_vm1, %v1472_v34 }
 0x784   :  { %v4476_v38 = vpop.eup %4475  ;;  %4109 = vmatpush.xpose.msk.msrb.mxu0 %vm485_vm1, %v1469_v37 }
 0x785   :  { %v1288_v39 = vmul.f32 %v4476_v38, %v4468_v63 }
 0x786   :  { %v4478_v41 = vpop.eup %4477 }
 0x787   :  { %v1289_v42 = vmul.f32 %v4478_v41, %v4470_v10  ;;  %v1282_v36 = vpop.xlane.xlu1 %1281  ;;  %4069 = vmatmul.msk.f32.gmra.mxu0 %vm150_vm2, %v1288_v39 }
 0x788   :  { %4479 = vrcp.f32 %v1282_v36 }
 0x789   :  { %4070 = vmatmul.msk.f32.vlgmr.msra.gmra.mxu3 %vm150_vm2, %v1289_v42 }
 0x78e   :  { %v4480_v46 = vpop.eup %4479 }
 0x78f   :  { %4082 = vmatmul.msk.f32.vlgmr.msra.gmra.mxu0 %vm252_vm3, %v4786_v59  ;;  %v1290_v47 = vmul.f32 %v4480_v46, %v4472_v14 }
 0x791   :  { %4071 = vmatmul.msk.f32.gmra.mxu3 %vm150_vm2, %v1290_v47 }
 0x797   :  { %4083 = vmatmul.msk.f32.gmra.mxu0 %vm252_vm3, %v4767_v40 }
 0x799   :  { %4100 = vmatmul.msk.f32.vlgmr.msrb.gmra.mxu3 %vm252_vm3, %v4786_v59 }
 0x79f   :  { %4084 = vmatmul.msk.f32.gmra.mxu0 %vm252_vm3, %v4789_v61 }
 0x7a1   :  { %4101 = vmatmul.msk.f32.gmra.mxu3 %vm252_vm3, %v4767_v40 }
 0x7a7   :  { %4085 = vmatmul.msk.f32.gmra.mxu0 %vm252_vm3, %v4800_v1 }
 0x7a9   :  { %4102 = vmatmul.msk.f32.gmra.mxu3 %vm252_vm3, %v4789_v61 }
 0x7b1   :  { %4103 = vmatmul.msk.f32.gmra.mxu3 %vm252_vm3, %v4800_v1 }
 0x7fc   :  { %v1314_v45 = vpop.f32.mrf.mxu0 }
 0x7fd   :  { %4073 = vmatmul.msk.f32.vlgmr.msra.gmra.mxu1 %vm485_vm1, %v1314_v45 }
 0x804   :  { %v1317_v59 = vpop.f32.mrf.mxu0 }
 0x805   :  { %4074 = vmatmul.msk.f32.gmra.mxu1 %vm485_vm1, %v1317_v59 }
 0x80c   :  { %v1343_v48 = vpop.f32.mrf.mxu3  ;;  %v1423_v49 = vpop.f32.mrf.mxu0 }
 0x80d   :  { %4075 = vmatmul.msk.f32.gmra.mxu1 %vm485_vm1, %v1343_v48  ;;  %v1424_v61 = vadd.f32 %v4389_v52, %v1423_v49 }
 0x814   :  { %v1346_v40 = vpop.f32.mrf.mxu3  ;;  %v1426_v50 = vpop.f32.mrf.mxu0 }
 0x815   :  { %4076 = vmatmul.msk.f32.gmra.mxu1 %vm485_vm1, %v1346_v40  ;;  %v1427_v56 = vadd.f32 %v4389_v52, %v1426_v50 }
 0x81c   :  { %v1429_v53 = vpop.f32.mrf.mxu0  ;;  %v1501_v55 = vpop.f32.mrf.mxu3 }
 0x81d   :  { %v1430_v1 = vadd.f32 %v4389_v52, %v1429_v53  ;;  %4106 = vmatmul.msk.f32.vlgmr.msrb.gmra.mxu1 %vm485_vm1, %v1424_v61  ;;  %v1502_v63 = vadd.f32 %v4390_v57, %v1501_v55 }
 0x81f   :  { %4110 = vmatmul.msk.f32.vlgmr.msrb.gmra.mxu0 %vm485_vm1, %v1430_v1 }
 0x824   :  { %v1432_v58 = vpop.f32.mrf.mxu0  ;;  %v1504_v43 = vpop.f32.mrf.mxu3 }
 0x825   :  { %v1433_v44 = vadd.f32 %v4389_v52, %v1432_v58  ;;  %v1505_v62 = vadd.f32 %v4390_v57, %v1504_v43  ;;  %4107 = vmatmul.msk.f32.gmra.mxu1 %vm485_vm1, %v1427_v56 }
 0x827   :  { %4111 = vmatmul.msk.f32.gmra.mxu0 %vm485_vm1, %v1433_v44  ;;  %1655 = vmatpush.msrb.mxu2 %v1505_v62 }
 0x829   :  { %1656 = vmatpush.msrb.mxu2 %v1502_v63 }
 0x82c   :  { %v1507_v0 = vpop.f32.mrf.mxu3 }
 0x82d   :  { %v1508_v11 = vadd.f32 %v4390_v57, %v1507_v0 }
 0x834   :  { %v1510_v9 = vpop.f32.mrf.mxu3 }
 0x835   :  { %v1511_v10 = vadd.f32 %v4390_v57, %v1510_v9 }
 0x837   :  { %1684 = vmatpush.msra.mxu3 %v1511_v10 }
 0x839   :  { %1685 = vmatpush.msra.mxu3 %v1508_v11 }
 0x87a   :  { %v5074_v12 = vpop.f32.mrf.mxu1 }
 0x882   :  { %v5076_v14 = vpop.f32.mrf.mxu1 }
 0x88a   :  { %v5078_v15 = vpop.f32.mrf.mxu1 }
 0x892   :  { %v5080_v16 = vpop.f32.mrf.mxu1 }
 0x89a   :  { %v1542_v18 = vpop.f32.mrf.mxu1 }
 0x89b   :  { %v1583_v19 = vmul.f32 0.35355338, %v1542_v18 }
 0x89c   :  { %v1577_v20 = vpop.f32.mrf.mxu0 }
 0x89d   :  { %v1585_v22 = vmul.f32 0.35355338, %v1577_v20  ;;  %v1587_v23 = vsel %vm4847_vm5, %v1583_v19, -1e+30 }
 0x89e   :  { %v1591_v24 = vsel %vm150_vm2, %v1587_v23, -inf }
 0x89f   :  { %1592 = vmax.xlane.f32.xlu2 %v1591_v24  ;;  %v1589_v26 = vsel %vm4847_vm5, %v1585_v22, -1e+30  ;;  %v4116_v22 = vld [vmem:[%s4890_s8 + $0x18] sm:$0xff] }
 0x8a0   :  { %v1597_v27 = vsel %vm150_vm2, %v1589_v26, -inf  ;;  %1722 = vmatpush.msra.mxu1 %v4116_v22 }
 0x8a1   :  { %1598 = vmax.xlane.f32.xlu1 %v1597_v27 }
 0x8a2   :  { %v1545_v28 = vpop.f32.mrf.mxu1 }
 0x8a3   :  { %v1584_v29 = vmul.f32 0.35355338, %v1545_v28  ;;  %v1041_v28 = vadd.f32 %v4991_v51, %v4993_v2 }
 0x8a4   :  { %v1580_v30 = vpop.f32.mrf.mxu0 }
 0x8a5   :  { %v1586_v31 = vmul.f32 0.35355338, %v1580_v30  ;;  %v1588_v32 = vsel %vm4854_vm6, %v1584_v29, -1e+30  ;;  %v1392_v29 = vadd.f32 %v5074_v12, %v1041_v28  ;;  %v1047_v12 = vadd.f32 %v4999_v5, %v5001_v6 }
 0x8a6   :  { %v1594_v34 = vsel %vm150_vm2, %v1588_v32, -inf }
 0x8a7   :  { %1595 = vmax.xlane.f32.xlu0 %v1594_v34  ;;  %v1590_v35 = vsel %vm4854_vm6, %v1586_v31, -1e+30 }
 0x8a8   :  { %v1600_v37 = vsel %vm150_vm2, %v1590_v35, -inf }
 0x8a9   :  { %1601 = vmax.xlane.f32.xlu2 %v1600_v37 }
 0x912   :  { %v1593_v38 = vpop.xlane.xlu2 %1592 }
 0x913   :  { %v1603_v39 = vsub.f32 %v1587_v23, %v1593_v38 }
 0x914   :  { %v1599_v41 = vpop.xlane.xlu1 %1598 }
 0x915   :  { %v1607_v42 = vmul.f32 1.442695, %v1603_v39  ;;  %v1605_v36 = vsub.f32 %v1589_v26, %v1599_v41 }
 0x917   :  { %4481 = vpow2.f32 %v1607_v42  ;;  %v1611_v46 = vmul.f32 1.442695, %v1605_v36 }
 0x919   :  { %4483 = vpow2.f32 %v1611_v46  ;;  %v1050_v46 = vadd.f32 %v5005_v8, %v5003_v7 }
 0x91a   :  { %v1596_v47 = vpop.xlane.xlu0 %1595 }
 0x91b   :  { %v1604_v45 = vsub.f32 %v1588_v32, %v1596_v47  ;;  %v4391_v32 = vld [vmem:[%s5106_s14] ss:$0 sm:$0xff] }
 0x91c   :  { %v1602_v59 = vpop.xlane.xlu2 %1601 }
 0x91d   :  { %v4482_v48 = vpop.eup %4481  ;;  %v1609_v49 = vmul.f32 1.442695, %v1604_v45  ;;  %v1606_v40 = vsub.f32 %v1590_v35, %v1602_v59  ;;  %v1044_v35 = vadd.f32 %v4995_v3, %v4997_v4 }
 0x91e   :  { %v1615_v50 = vsel %vm150_vm2, %v4482_v48, 0.0 }
 0x91f   :  { %v4484_v52 = vpop.eup %4483  ;;  %4485 = vpow2.f32 %v1609_v49  ;;  %v1613_v61 = vmul.f32 1.442695, %v1606_v40  ;;  %1616 = vadd.xlane.f32.xlu0 %v1615_v50  ;;  %v1393_v38 = vadd.f32 %v5076_v14, %v1044_v35 }
 0x920   :  { %v1621_v53 = vsel %vm150_vm2, %v4484_v52, 0.0 }
 0x921   :  { %4487 = vpow2.f32 %v1613_v61  ;;  %1622 = vadd.xlane.f32.xlu2 %v1621_v53 }
 0x925   :  { %v4486_v55 = vpop.eup %4485 }
 0x926   :  { %v1618_v1 = vsel %vm150_vm2, %v4486_v55, 0.0 }
 0x927   :  { %v4488_v56 = vpop.eup %4487  ;;  %1619 = vadd.xlane.f32.xlu1 %v1618_v1 }
 0x928   :  { %v1624_v57 = vsel %vm150_vm2, %v4488_v56, 0.0 }
 0x929   :  { %1625 = vadd.xlane.f32.xlu0 %v1624_v57 }
 0x992   :  { %v1617_v58 = vpop.xlane.xlu0 %1616 }
 0x993   :  { %4489 = vrcp.f32 %v1617_v58 }
 0x994   :  { %v1623_v43 = vpop.xlane.xlu2 %1622 }
 0x995   :  { %4491 = vrcp.f32 %v1623_v43 }
 0x999   :  { %v4490_v44 = vpop.eup %4489 }
 0x99a   :  { %v1631_v62 = vmul.f32 %v4490_v44, %v4482_v48  ;;  %v1620_v63 = vpop.xlane.xlu1 %1619 }
 0x99b   :  { %v4492_v0 = vpop.eup %4491  ;;  %4493 = vrcp.f32 %v1620_v63 }
 0x99c   :  { %v1633_v9 = vmul.f32 %v4492_v0, %v4484_v52  ;;  %4112 = vmatmul.msk.f32.vlgmr.msrb.gmra.mxu2 %vm150_vm2, %v1631_v62  ;;  %v1626_v10 = vpop.xlane.xlu0 %1625  ;;  %v1859_v0 = vld [vmem:[%s5191_s6 + $0x18] sm:$0xff] }
 0x99d   :  { %4495 = vrcp.f32 %v1626_v10  ;;  %1888 = vmatpush.msra.mxu0 %v1859_v0  ;;  %v1857_v10 = vld [vmem:[%s5191_s6 + $0x8] sm:$0xff] }
 0x99e   :  { %4114 = vmatmul.msk.f32.vlgmr.msra.gmra.mxu3 %vm150_vm2, %v1633_v9  ;;  %v1858_v9 = vld [vmem:[%s5191_s6 + $0x10] sm:$0xff] }
 0x99f   :  { %1889 = vmatpush.msra.mxu0 %v1858_v9 }
 0x9a1   :  { %v4494_v11 = vpop.eup %4493  ;;  %1890 = vmatpush.msra.mxu0 %v1857_v10 }
 0x9a2   :  { %v1632_v18 = vmul.f32 %v4494_v11, %v4486_v55  ;;  %v1856_v11 = vld [vmem:[%s5191_s6] sm:$0xff] }
 0x9a3   :  { %v4496_v19 = vpop.eup %4495  ;;  %1891 = vmatpush.msra.mxu0 %v1856_v11 }
 0x9a4   :  { %4113 = vmatmul.msk.f32.gmra.mxu2 %vm150_vm2, %v1632_v18  ;;  %v1634_v20 = vmul.f32 %v4496_v19, %v4488_v56 }
 0x9a6   :  { %4115 = vmatmul.msk.f32.gmra.mxu3 %vm150_vm2, %v1634_v20 }
 0xa1f   :  { %v1658_v23 = vpop.f32.mrf.mxu2 }
 0xa20   :  { %4117 = vmatmul.msk.f32.vlgmr.msra.gmra.mxu1 %vm485_vm1, %v1658_v23 }
 0xa21   :  { %v1687_v26 = vpop.f32.mrf.mxu3 }
 0xa27   :  { %v1661_v24 = vpop.f32.mrf.mxu2 }
 0xa28   :  { %4118 = vmatmul.msk.f32.gmra.mxu1 %vm485_vm1, %v1661_v24 }
 0xa29   :  { %v1690_v27 = vpop.f32.mrf.mxu3 }
 0xa30   :  { %4119 = vmatmul.msk.f32.gmra.mxu1 %vm485_vm1, %v1687_v26 }
 0xa38   :  { %4120 = vmatmul.msk.f32.gmra.mxu1 %vm485_vm1, %v1690_v27 }
 0xa9d   :  { %v1724_v30 = vpop.f32.mrf.mxu1 }
 0xa9e   :  { %v1736_v31 = vadd.f32 %v1724_v30, %v1392_v29 }
 0xaa0   :  { %v1740_v34 = vadd.f32 %v1736_v31, %v4676_v17  ;;  %v1394_v17 = vadd.f32 %v5078_v15, %v1047_v12 }
 0xaa2   :  { %v5119_v37 = vadd.f32 %v4391_v32, %v1740_v34 }
 0xaa4   :  { %v1754_v39 = vsel %vm252_vm3, %v5119_v37, 0.0 }
 0xaa5   :  { %1755 = vadd.xlane.f32.xlu1 %v1754_v39  ;;  %v1727_v41 = vpop.f32.mrf.mxu1 }
 0xaa6   :  { %v1737_v51 = vadd.f32 %v1727_v41, %v1393_v38  ;;  %v4392_v38 = vld [vmem:[%s5144_s19] ss:$0 sm:$0xff] }
 0xaa8   :  { %v1741_v2 = vadd.f32 %v1737_v51, %v4672_v13  ;;  %v1395_v13 = vadd.f32 %v5080_v16, %v1050_v46  ;;  %v1956_v51 = vld [vmem:[%s5202_s15 + $0x78] sm:$0xff] }
 0xaa9   :  { %1961 = vmatpush.msra.mxu2 %v1956_v51 }
 0xaaa   :  { %v5127_v42 = vadd.f32 %v4391_v32, %v1741_v2  ;;  %v1955_v2 = vld [vmem:[%s5202_s15 + $0x70] sm:$0xff] }
 0xaab   :  { %1962 = vmatpush.msra.mxu2 %v1955_v2 }
 0xaac   :  { %v1757_v3 = vsel %vm252_vm3, %v5127_v42, 0.0 }
 0xaad   :  { %1758 = vadd.xlane.f32.xlu2 %v1757_v3  ;;  %v1730_v4 = vpop.f32.mrf.mxu1  ;;  %v4393_v3 = vld [vmem:[%s5151_s25] ss:$0 sm:$0xff] }
 0xaae   :  { %v1738_v14 = vadd.f32 %v1730_v4, %v1394_v17 }
 0xab0   :  { %v1742_v36 = vadd.f32 %v1738_v14, %v4678_v21  ;;  %v1954_v14 = vld [vmem:[%s5202_s15 + $0x68] sm:$0xff] }
 0xab1   :  { %1963 = vmatpush.msra.mxu2 %v1954_v14 }
 0xab2   :  { %v5135_v47 = vadd.f32 %v4391_v32, %v1742_v36 }
 0xab4   :  { %v1760_v5 = vsel %vm252_vm3, %v5135_v47, 0.0 }
 0xab5   :  { %1761 = vadd.xlane.f32.xlu0 %v1760_v5  ;;  %v1733_v6 = vpop.f32.mrf.mxu1 }
 0xab6   :  { %v1739_v15 = vadd.f32 %v1733_v6, %v1395_v13 }
 0xab8   :  { %v1743_v45 = vadd.f32 %v1739_v15, %v4684_v25 }
 0xaba   :  { %v5146_v21 = vadd.f32 %v4391_v32, %v1743_v45 }
 0xabc   :  { %v1763_v7 = vsel %vm252_vm3, %v5146_v21, 0.0 }
 0xabd   :  { %1764 = vadd.xlane.f32.xlu1 %v1763_v7 }
 0xb18   :  { %v1756_v8 = vpop.xlane.xlu1 %1755 }
 0xb19   :  { %v1766_v25 = vmul.f32 %v1756_v8, %v4698_v33 }
 0xb1b   :  { %v5157_v16 = vsub.f32 %v5119_v37, %v1766_v25 }
 0xb1d   :  { %v1774_v59 = vmul.f32 %v5157_v16, %v5157_v16 }
 0xb1f   :  { %v1778_v48 = vsel %vm252_vm3, %v1774_v59, 0.0 }
 0xb20   :  { %1779 = vadd.xlane.f32.xlu2 %v1778_v48  ;;  %v1759_v49 = vpop.xlane.xlu2 %1758 }
 0xb21   :  { %v1767_v40 = vmul.f32 %v1759_v49, %v4698_v33 }
 0xb23   :  { %v5164_v50 = vsub.f32 %v5127_v42, %v1767_v40 }
 0xb25   :  { %v1775_v52 = vmul.f32 %v5164_v50, %v5164_v50 }
 0xb27   :  { %v1781_v61 = vsel %vm252_vm3, %v1775_v52, 0.0 }
 0xb28   :  { %1782 = vadd.xlane.f32.xlu0 %v1781_v61  ;;  %v1762_v53 = vpop.xlane.xlu0 %1761 }
 0xb29   :  { %v1768_v55 = vmul.f32 %v1762_v53, %v4698_v33 }
 0xb2b   :  { %v5171_v1 = vsub.f32 %v5135_v47, %v1768_v55 }
 0xb2d   :  { %v1776_v56 = vmul.f32 %v5171_v1, %v5171_v1 }
 0xb2f   :  { %v1784_v57 = vsel %vm252_vm3, %v1776_v56, 0.0 }
 0xb30   :  { %1785 = vadd.xlane.f32.xlu1 %v1784_v57  ;;  %v1765_v58 = vpop.xlane.xlu1 %1764 }
 0xb31   :  { %v1769_v43 = vmul.f32 %v1765_v58, %v4698_v33 }
 0xb33   :  { %v5178_v44 = vsub.f32 %v5146_v21, %v1769_v43 }
 0xb35   :  { %v1777_v62 = vmul.f32 %v5178_v44, %v5178_v44 }
 0xb37   :  { %v1787_v63 = vsel %vm252_vm3, %v1777_v62, 0.0 }
 0xb38   :  { %1788 = vadd.xlane.f32.xlu2 %v1787_v63 }
 0xb93   :  { %v1780_v18 = vpop.xlane.xlu2 %1779 }
 0xb94   :  { %v1790_v19 = vmul.f32 %v1780_v18, %v4698_v33 }
 0xb96   :  { %v1794_v20 = vadd.f32 1e-05, %v1790_v19  ;;  %v1953_v19 = vld [vmem:[%s5202_s15 + $0x60] sm:$0xff] }
 0xb97   :  { %1964 = vmatpush.msra.mxu2 %v1953_v19 }
 0xb98   :  { %4497 = vrsqrt.f32 %v1794_v20  ;;  %vm1804_vm8 = vweird.f32 %v1794_v20 }
 0xb9b   :  { %v1783_v22 = vpop.xlane.xlu0 %1782 }
 0xb9c   :  { %v1791_v23 = vmul.f32 %v1783_v22, %v4698_v33  ;;  %v1950_v22 = vld [vmem:[%s5202_s15 + $0x48] sm:$0xff] }
 0xb9e   :  { %v4498_v24 = vpop.eup %4497  ;;  %v1795_v26 = vadd.f32 1e-05, %v1791_v23  ;;  %v1949_v23 = vld [vmem:[%s5202_s15 + $0x40] sm:$0xff] }
 0xb9f   :  { %v1799_v27 = vmul.f32 %v4498_v24, %v1794_v20  ;;  %vm1805_vm7 = vweird.f32 %v4498_v24  ;;  %v1952_v20 = vld [vmem:[%s5202_s15 + $0x58] sm:$0xff] }
 0xba0   :  { %4499 = vrsqrt.f32 %v1795_v26  ;;  %vm1806_vm9 = vmor %vm1804_vm8, %vm1805_vm7  ;;  %vm1814_vm11 = vweird.f32 %v1795_v26  ;;  %1965 = vmatpush.msra.mxu2 %v1952_v20  ;;  %v4395_v20 = vld [vmem:[%s5222_s22] ss:$0 sm:$0xff] }
 0xba1   :  { %v1800_v28 = vmul.f32 %v4498_v24, %v1799_v27  ;;  %v1946_v27 = vld [vmem:[%s5202_s15 + $0x28] sm:$0xff] }
 0xba3   :  { %v1801_v29 = vmul.f32 0.5, %v1800_v28  ;;  %v1786_v30 = vpop.xlane.xlu1 %1785  ;;  %v1945_v28 = vld [vmem:[%s5202_s15 + $0x20] sm:$0xff] }
 0xba4   :  { %v1792_v31 = vmul.f32 %v1786_v30, %v4698_v33  ;;  %v1943_v30 = vld [vmem:[%s5202_s15 + $0x10] sm:$0xff] }
 0xba5   :  { %v1802_v32 = vsub.f32 1.5, %v1801_v29  ;;  %v1944_v29 = vld [vmem:[%s5202_s15 + $0x18] sm:$0xff] }
 0xba6   :  { %v4500_v34 = vpop.eup %4499  ;;  %v1796_v35 = vadd.f32 1e-05, %v1792_v31  ;;  %v1942_v31 = vld [vmem:[%s5202_s15 + $0x8] sm:$0xff] }
 0xba7   :  { %v1803_v39 = vmul.f32 %v4498_v24, %v1802_v32  ;;  %v1809_v41 = vmul.f32 %v4500_v34, %v1795_v26  ;;  %vm1815_vm10 = vweird.f32 %v4500_v34  ;;  %v1947_v26 = vld [vmem:[%s5202_s15 + $0x30] sm:$0xff]  ;;  %v1941_v32 = vld [vmem:[%s5202_s15] sm:$0xff] }
 0xba8   :  { %4501 = vrsqrt.f32 %v1796_v35  ;;  %vm1816_vm12 = vmor %vm1814_vm11, %vm1815_vm10  ;;  %vm1824_vm14 = vweird.f32 %v1796_v35 }
 0xba9   :  { %v1807_v12 = vsel %vm1806_vm9, %v4498_v24, %v1803_v39  ;;  %v1810_v17 = vmul.f32 %v4500_v34, %v1809_v41  ;;  %v1948_v24 = vld [vmem:[%s5202_s15 + $0x38] sm:$0xff] }
 0xbaa   :  { %v1838_v4 = vmul.f32 %v1807_v12, %v5157_v16 }
 0xbab   :  { %v1811_v36 = vmul.f32 0.5, %v1810_v17  ;;  %v1789_v46 = vpop.xlane.xlu2 %1788 }
 0xbac   :  { %v1845_v13 = vmul.f32 %v4392_v38, %v1838_v4  ;;  %v1793_v5 = vmul.f32 %v1789_v46, %v4698_v33 }
 0xbad   :  { %v1812_v6 = vsub.f32 1.5, %v1811_v36 }
 0xbae   :  { %v4502_v15 = vpop.eup %4501  ;;  %v1852_v45 = vadd.f32 %v4393_v3, %v1845_v13  ;;  %v1797_v7 = vadd.f32 1e-05, %v1793_v5 }
 0xbaf   :  { %v1813_v8 = vmul.f32 %v4500_v34, %v1812_v6  ;;  %v1819_v25 = vmul.f32 %v4502_v15, %v1796_v35  ;;  %vm1825_vm13 = vweird.f32 %v4502_v15 }
 0xbb0   :  { %4503 = vrsqrt.f32 %v1797_v7  ;;  %4121 = vmatmul.msk.f32.vlgmr.msra.gmra.mxu0 %vm252_vm3, %v1852_v45  ;;  %vm1826_vm15 = vmor %vm1824_vm14, %vm1825_vm13  ;;  %vm1834_vm4 = vweird.f32 %v1797_v7 }
 0xbb1   :  { %v1817_v16 = vsel %vm1816_vm12, %v4500_v34, %v1813_v8  ;;  %v1820_v59 = vmul.f32 %v4502_v15, %v1819_v25  ;;  %v4394_v34 = vld [vmem:[%s5186_s30] ss:$0 sm:$0xff] }
 0xbb2   :  { %v1839_v48 = vmul.f32 %v1817_v16, %v5164_v50 }
 0xbb3   :  { %v1821_v49 = vmul.f32 0.5, %v1820_v59 }
 0xbb4   :  { %v1846_v40 = vmul.f32 %v4392_v38, %v1839_v48 }
 0xbb5   :  { %v1822_v52 = vsub.f32 1.5, %v1821_v49 }
 0xbb6   :  { %v4504_v61 = vpop.eup %4503  ;;  %v1853_v53 = vadd.f32 %v4393_v3, %v1846_v40 }
 0xbb7   :  { %v1823_v55 = vmul.f32 %v4502_v15, %v1822_v52  ;;  %v1829_v56 = vmul.f32 %v4504_v61, %v1797_v7  ;;  %vm1835_vm0 = vweird.f32 %v4504_v61 }
 0xbb8   :  { %4122 = vmatmul.msk.f32.gmra.mxu0 %vm252_vm3, %v1853_v53  ;;  %vm1836_vm7 = vmor %vm1834_vm4, %vm1835_vm0 }
 0xbb9   :  { %v1827_v57 = vsel %vm1826_vm15, %v4502_v15, %v1823_v55  ;;  %v1830_v58 = vmul.f32 %v4504_v61, %v1829_v56 }
 0xbba   :  { %v1840_v43 = vmul.f32 %v1827_v57, %v5171_v1 }
 0xbbb   :  { %v1831_v62 = vmul.f32 0.5, %v1830_v58 }
 0xbbc   :  { %v1847_v63 = vmul.f32 %v4392_v38, %v1840_v43 }
 0xbbd   :  { %v1832_v50 = vsub.f32 1.5, %v1831_v62 }
 0xbbe   :  { %v1854_v0 = vadd.f32 %v4393_v3, %v1847_v63 }
 0xbbf   :  { %v1833_v9 = vmul.f32 %v4504_v61, %v1832_v50 }
 0xbc0   :  { %4123 = vmatmul.msk.f32.gmra.mxu0 %vm252_vm3, %v1854_v0 }
 0xbc1   :  { %v1837_v10 = vsel %vm1836_vm7, %v4504_v61, %v1833_v9 }
 0xbc2   :  { %v1841_v11 = vmul.f32 %v1837_v10, %v5178_v44  ;;  %v1951_v44 = vld [vmem:[%s5202_s15 + $0x50] sm:$0xff] }
 0xbc3   :  { %1966 = vmatpush.msra.mxu2 %v1951_v44 }
 0xbc4   :  { %v1848_v1 = vmul.f32 %v4392_v38, %v1841_v11 }
 0xbc5   :  { %1967 = vmatpush.msra.mxu2 %v1950_v22 }
 0xbc6   :  { %v1855_v18 = vadd.f32 %v4393_v3, %v1848_v1 }
 0xbc7   :  { %1968 = vmatpush.msra.mxu2 %v1949_v23 }
 0xbc8   :  { %4124 = vmatmul.msk.f32.gmra.mxu0 %vm252_vm3, %v1855_v18 }
 0xbc9   :  { %1969 = vmatpush.msra.mxu2 %v1948_v24 }
 0xbcb   :  { %1970 = vmatpush.msra.mxu2 %v1947_v26 }
 0xbcd   :  { %1971 = vmatpush.msra.mxu2 %v1946_v27 }
 0xbcf   :  { %1972 = vmatpush.msra.mxu2 %v1945_v28 }
 0xbd1   :  { %1973 = vmatpush.msra.mxu2 %v1944_v29 }
 0xbd3   :  { %1974 = vmatpush.msra.mxu2 %v1943_v30 }
 0xbd5   :  { %1975 = vmatpush.msra.mxu2 %v1942_v31 }
 0xbd7   :  { %1976 = vmatpush.msra.mxu2 %v1941_v32 }
 0xc2d   :  { %v1893_v35 = vpop.f32.mrf.mxu0 }
 0xc2e   :  { %v1894_v38 = vadd.f32 %v4394_v34, %v1893_v35 }
 0xc30   :  { %v1905_v39 = vmul.f32 %v1894_v38, %v1894_v38 }
 0xc32   :  { %v1909_v41 = vmul.f32 %v1905_v39, %v1894_v38 }
 0xc34   :  { %v1913_v51 = vmul.f32 0.044715, %v1909_v41 }
 0xc35   :  { %v1896_v2 = vpop.f32.mrf.mxu0 }
 0xc36   :  { %v1917_v12 = vadd.f32 %v1913_v51, %v1894_v38  ;;  %v1897_v17 = vadd.f32 %v4394_v34, %v1896_v2 }
 0xc38   :  { %v1921_v3 = vmul.f32 0.7978846, %v1917_v12  ;;  %v1906_v4 = vmul.f32 %v1897_v17, %v1897_v17 }
 0xc3a   :  { %4505 = vtanh.f32 %v1921_v3  ;;  %v1910_v14 = vmul.f32 %v1906_v4, %v1897_v17 }
 0xc3c   :  { %v1914_v36 = vmul.f32 0.044715, %v1910_v14 }
 0xc3d   :  { %v1899_v46 = vpop.f32.mrf.mxu0 }
 0xc3e   :  { %v1900_v13 = vadd.f32 %v4394_v34, %v1899_v46  ;;  %v1918_v5 = vadd.f32 %v1914_v36, %v1897_v17 }
 0xc40   :  { %v4506_v6 = vpop.eup %4505  ;;  %v1907_v15 = vmul.f32 %v1900_v13, %v1900_v13  ;;  %v1922_v45 = vmul.f32 0.7978846, %v1918_v5 }
 0xc41   :  { %v1929_v7 = vadd.f32 1.0, %v4506_v6 }
 0xc42   :  { %v1911_v8 = vmul.f32 %v1907_v15, %v1900_v13  ;;  %4507 = vtanh.f32 %v1922_v45 }
 0xc43   :  { %v1933_v25 = vmul.f32 0.5, %v1929_v7 }
 0xc44   :  { %v1915_v16 = vmul.f32 0.044715, %v1911_v8 }
 0xc45   :  { %v1937_v59 = vmul.f32 %v1933_v25, %v1894_v38  ;;  %v1902_v48 = vpop.f32.mrf.mxu0  ;;  %v4130_v25 = vld [vmem:[%s4741_s20 + $0x98] sm:$0xff] }
 0xc46   :  { %v1903_v49 = vadd.f32 %v4394_v34, %v1902_v48  ;;  %v1919_v40 = vadd.f32 %v1915_v16, %v1900_v13  ;;  %v4139_v16 = vld [vmem:[%s4736_s16 + $0x98] sm:$0xff]  ;;  %2134 = vmatpush.msrb.mxu3 %v4130_v25  ;;  %v4129_v48 = vld [vmem:[%s4741_s20 + $0x90] sm:$0xff] }
 0xc47   :  { %1977 = vmatmul.f32.vlgmr.msra.gmra.mxu2 %v1937_v59  ;;  %v4148_v59 = vld [vmem:[%s4747_s24 + $0x98] sm:$0xff]  ;;  %2173 = vmatpush.msrb.mxu1 %v4139_v16 }
 0xc48   :  { %v4508_v52 = vpop.eup %4507  ;;  %v1908_v61 = vmul.f32 %v1903_v49, %v1903_v49  ;;  %v1923_v53 = vmul.f32 0.7978846, %v1919_v40  ;;  %2212 = vmatpush.msrb.mxu0 %v4148_v59  ;;  %v4147_v40 = vld [vmem:[%s4747_s24 + $0x90] sm:$0xff]  ;;  %2135 = vmatpush.msrb.mxu3 %v4129_v48 }
 0xc49   :  { %v1930_v55 = vadd.f32 1.0, %v4508_v52  ;;  %v4128_v52 = vld [vmem:[%s4741_s20 + $0x88] sm:$0xff] }
 0xc4a   :  { %v1912_v56 = vmul.f32 %v1908_v61, %v1903_v49  ;;  %4509 = vtanh.f32 %v1923_v53  ;;  %2213 = vmatpush.msrb.mxu0 %v4147_v40  ;;  %v4137_v61 = vld [vmem:[%s4736_s16 + $0x88] sm:$0xff]  ;;  %2136 = vmatpush.msrb.mxu3 %v4128_v52 }
 0xc4b   :  { %v1934_v57 = vmul.f32 0.5, %v1930_v55  ;;  %v4146_v53 = vld [vmem:[%s4747_s24 + $0x88] sm:$0xff]  ;;  %v4127_v55 = vld [vmem:[%s4741_s20 + $0x80] sm:$0xff] }
 0xc4c   :  { %v1916_v58 = vmul.f32 0.044715, %v1912_v56  ;;  %2214 = vmatpush.msrb.mxu0 %v4146_v53  ;;  %v4136_v56 = vld [vmem:[%s4736_s16 + $0x80] sm:$0xff]  ;;  %2137 = vmatpush.msrb.mxu3 %v4127_v55 }
 0xc4d   :  { %v1938_v43 = vmul.f32 %v1934_v57, %v1897_v17  ;;  %v4145_v57 = vld [vmem:[%s4747_s24 + $0x80] sm:$0xff] }
 0xc4e   :  { %v1920_v62 = vadd.f32 %v1916_v58, %v1903_v49  ;;  %2215 = vmatpush.msrb.mxu0 %v4145_v57 }
 0xc4f   :  { %1980 = vmatmul.f32.gmra.mxu2 %v1938_v43 }
 0xc50   :  { %v4510_v63 = vpop.eup %4509  ;;  %v1924_v50 = vmul.f32 0.7978846, %v1920_v62 }
 0xc51   :  { %v1931_v0 = vadd.f32 1.0, %v4510_v63 }
 0xc52   :  { %4511 = vtanh.f32 %v1924_v50 }
 0xc53   :  { %v1935_v9 = vmul.f32 0.5, %v1931_v0 }
 0xc55   :  { %v1939_v10 = vmul.f32 %v1935_v9, %v1900_v13 }
 0xc57   :  { %1983 = vmatmul.f32.gmra.mxu2 %v1939_v10 }
 0xc58   :  { %v4512_v11 = vpop.eup %4511 }
 0xc59   :  { %v1932_v1 = vadd.f32 1.0, %v4512_v11 }
 0xc5b   :  { %v1936_v18 = vmul.f32 0.5, %v1932_v1 }
 0xc5d   :  { %v1940_v19 = vmul.f32 %v1936_v18, %v1903_v49  ;;  %v4138_v49 = vld [vmem:[%s4736_s16 + $0x90] sm:$0xff] }
 0xc5e   :  { %2174 = vmatpush.msrb.mxu1 %v4138_v49 }
 0xc5f   :  { %1986 = vmatmul.f32.gmra.mxu2 %v1940_v19 }
 0xc60   :  { %2175 = vmatpush.msrb.mxu1 %v4137_v61 }
 0xc62   :  { %2176 = vmatpush.msrb.mxu1 %v4136_v56 }
 0xcca   :  { %v1978_v44 = vpop.f32.mrf.mxu2 }
 0xccb   :  { %v1979_v22 = vadd.f32 %v4395_v20, %v1978_v44 }
 0xccd   :  { %v5240_v23 = vadd.f32 %v1979_v22, %v5119_v37 }
 0xccf   :  { %v1998_v24 = vsel %vm252_vm3, %v5240_v23, 0.0 }
 0xcd0   :  { %1999 = vadd.xlane.f32.xlu0 %v1998_v24 }
 0xcd2   :  { %v1981_v26 = vpop.f32.mrf.mxu2 }
 0xcd3   :  { %v1982_v27 = vadd.f32 %v4395_v20, %v1981_v26 }
 0xcd5   :  { %v5245_v28 = vadd.f32 %v1982_v27, %v5127_v42  ;;  %v5303_v27 = vld [vmem:[%s4689_s3 + $0x1] ss:$0 sm:$0xff]  ;;  %s4632_s3 = smov 23  }
 0xcd7   :  { %v2001_v29 = vsel %vm252_vm3, %v5245_v28, 0.0 }
 0xcd8   :  { %2002 = vadd.xlane.f32.xlu1 %v2001_v29 }
 0xcda   :  { %v1984_v30 = vpop.f32.mrf.mxu2 }
 0xcdb   :  { %v1985_v31 = vadd.f32 %v4395_v20, %v1984_v30 }
 0xcdd   :  { %v5250_v32 = vadd.f32 %v1985_v31, %v5135_v47  ;;  %v4170_v31 = vld [vmem:[%s4741_s20 + $0xb8] sm:$0xff] }
 0xcde   :  { %2433 = vmatpush.msra.mxu0 %v4170_v31 }
 0xcdf   :  { %v2004_v37 = vsel %vm252_vm3, %v5250_v32, 0.0 }
 0xce0   :  { %2005 = vadd.xlane.f32.xlu2 %v2004_v37  ;;  %v4169_v37 = vld [vmem:[%s4741_s20 + $0xb0] sm:$0xff] }
 0xce1   :  { %2434 = vmatpush.msra.mxu0 %v4169_v37 }
 0xce2   :  { %v1987_v34 = vpop.f32.mrf.mxu2 }
 0xce3   :  { %v1988_v35 = vadd.f32 %v4395_v20, %v1987_v34  ;;  %v4397_v34 = vld [vmem:[%s4696_s7 + $0x1] ss:$0 sm:$0xff] }
 0xce5   :  { %v5255_v38 = vadd.f32 %v1988_v35, %v5146_v21 }
 0xce7   :  { %v2007_v42 = vsel %vm252_vm3, %v5255_v38, 0.0 }
 0xce8   :  { %2008 = vadd.xlane.f32.xlu0 %v2007_v42 }
 0xd43   :  { %v2000_v39 = vpop.xlane.xlu0 %1999 }
 0xd44   :  { %v2010_v41 = vmul.f32 %v2000_v39, %v4698_v33 }
 0xd46   :  { %v5261_v51 = vsub.f32 %v5240_v23, %v2010_v41  ;;  %v4168_v41 = vld [vmem:[%s4741_s20 + $0xa8] sm:$0xff] }
 0xd47   :  { %2435 = vmatpush.msra.mxu0 %v4168_v41 }
 0xd48   :  { %v2018_v47 = vmul.f32 %v5261_v51, %v5261_v51 }
 0xd4a   :  { %v2022_v2 = vsel %vm252_vm3, %v2018_v47, 0.0 }
 0xd4b   :  { %2023 = vadd.xlane.f32.xlu1 %v2022_v2  ;;  %v2003_v12 = vpop.xlane.xlu1 %2002 }
 0xd4c   :  { %v2011_v21 = vmul.f32 %v2003_v12, %v4698_v33 }
 0xd4e   :  { %v5268_v17 = vsub.f32 %v5245_v28, %v2011_v21 }
 0xd50   :  { %v2019_v3 = vmul.f32 %v5268_v17, %v5268_v17 }
 0xd52   :  { %v2025_v4 = vsel %vm252_vm3, %v2019_v3, 0.0 }
 0xd53   :  { %v2006_v14 = vpop.xlane.xlu2 %2005  ;;  %2026 = vadd.xlane.f32.xlu2 %v2025_v4 }
 0xd54   :  { %v2012_v36 = vmul.f32 %v2006_v14, %v4698_v33 }
 0xd56   :  { %v5275_v46 = vsub.f32 %v5250_v32, %v2012_v36  ;;  %v4167_v36 = vld [vmem:[%s4741_s20 + $0xa0] sm:$0xff] }
 0xd57   :  { %2436 = vmatpush.msra.mxu0 %v4167_v36 }
 0xd58   :  { %v2020_v13 = vmul.f32 %v5275_v46, %v5275_v46 }
 0xd5a   :  { %v2028_v5 = vsel %vm252_vm3, %v2020_v13, 0.0 }
 0xd5b   :  { %v2009_v6 = vpop.xlane.xlu0 %2008  ;;  %2029 = vadd.xlane.f32.xlu0 %v2028_v5 }
 0xd5c   :  { %v2013_v15 = vmul.f32 %v2009_v6, %v4698_v33 }
 0xd5e   :  { %v5282_v45 = vsub.f32 %v5255_v38, %v2013_v15 }
 0xd60   :  { %v2021_v7 = vmul.f32 %v5282_v45, %v5282_v45 }
 0xd62   :  { %v2031_v8 = vsel %vm252_vm3, %v2021_v7, 0.0 }
 0xd63   :  { %2032 = vadd.xlane.f32.xlu1 %v2031_v8 }
 0xdbe   :  { %v2024_v58 = vpop.xlane.xlu1 %2023 }
 0xdbf   :  { %v2034_v43 = vmul.f32 %v2024_v58, %v4698_v33 }
 0xdc1   :  { %v2038_v62 = vadd.f32 1e-05, %v2034_v43 }
 0xdc3   :  { %4513 = vrsqrt.f32 %v2038_v62  ;;  %vm2048_vm9 = vweird.f32 %v2038_v62 }
 0xdc6   :  { %v2027_v63 = vpop.xlane.xlu2 %2026 }
 0xdc7   :  { %v2035_v50 = vmul.f32 %v2027_v63, %v4698_v33  ;;  %v4398_v63 = vld [vmem:[%s4731_s12 + $0x4] ss:$0 sm:$0xff] }
 0xdc9   :  { %v4514_v0 = vpop.eup %4513  ;;  %v2039_v9 = vadd.f32 1e-05, %v2035_v50 }
 0xdca   :  { %v2043_v10 = vmul.f32 %v4514_v0, %v2038_v62  ;;  %vm2049_vm8 = vweird.f32 %v4514_v0 }
 0xdcb   :  { %4515 = vrsqrt.f32 %v2039_v9  ;;  %vm2050_vm10 = vmor %vm2048_vm9, %vm2049_vm8  ;;  %vm2058_vm12 = vweird.f32 %v2039_v9 }
 0xdcc   :  { %v2044_v11 = vmul.f32 %v4514_v0, %v2043_v10 }
 0xdce   :  { %v2045_v1 = vmul.f32 0.5, %v2044_v11  ;;  %v2030_v18 = vpop.xlane.xlu0 %2029  ;;  %v4399_v11 = vld [vmem:[%s4772_s28 + $0x4] ss:$0 sm:$0xff] }
 0xdcf   :  { %v2036_v19 = vmul.f32 %v2030_v18, %v4698_v33 }
 0xdd0   :  { %v2046_v20 = vsub.f32 1.5, %v2045_v1  ;;  %v4400_v1 = vld [vmem:[%s4784_s2 + $0x4] ss:$0 sm:$0xff] }
 0xdd1   :  { %v4516_v44 = vpop.eup %4515  ;;  %v2040_v22 = vadd.f32 1e-05, %v2036_v19 }
 0xdd2   :  { %v2047_v24 = vmul.f32 %v4514_v0, %v2046_v20  ;;  %v2053_v26 = vmul.f32 %v4516_v44, %v2039_v9  ;;  %vm2059_vm11 = vweird.f32 %v4516_v44 }
 0xdd3   :  { %4517 = vrsqrt.f32 %v2040_v22  ;;  %vm2060_vm13 = vmor %vm2058_vm12, %vm2059_vm11  ;;  %vm2068_vm15 = vweird.f32 %v2040_v22 }
 0xdd4   :  { %v2051_v29 = vsel %vm2050_vm10, %v4514_v0, %v2047_v24  ;;  %v2054_v30 = vmul.f32 %v4516_v44, %v2053_v26 }
 0xdd5   :  { %v2082_v35 = vmul.f32 %v2051_v29, %v5261_v51 }
 0xdd6   :  { %v2055_v42 = vmul.f32 0.5, %v2054_v30  ;;  %v2033_v39 = vpop.xlane.xlu1 %2032 }
 0xdd7   :  { %v2089_v47 = vmul.f32 %v5303_v27, %v2082_v35  ;;  %v2037_v2 = vmul.f32 %v2033_v39, %v4698_v33  ;;  %v4179_v39 = vld [vmem:[%s4736_s16 + $0xb8] sm:$0xff] }
 0xdd8   :  { %v2056_v12 = vsub.f32 1.5, %v2055_v42 }
 0xdd9   :  { %v4518_v21 = vpop.eup %4517  ;;  %v5312_v3 = vadd.f32 %v4397_v34, %v2089_v47  ;;  %v2041_v4 = vadd.f32 1e-05, %v2037_v2  ;;  %v4178_v47 = vld [vmem:[%s4736_s16 + $0xb0] sm:$0xff]  ;;  %v4177_v2 = vld [vmem:[%s4736_s16 + $0xa8] sm:$0xff] }
 0xdda   :  { %v2057_v14 = vmul.f32 %v4516_v44, %v2056_v12  ;;  %v2063_v51 = vmul.f32 %v4518_v21, %v2040_v22  ;;  %vm2069_vm14 = vweird.f32 %v4518_v21  ;;  %v4176_v12 = vld [vmem:[%s4736_s16 + $0xa0] sm:$0xff] }
 0xddb   :  { %4519 = vrsqrt.f32 %v2041_v4  ;;  %4132 = vmatmul.msk.f32.vlgmr.msrb.gmra.mxu3 %vm252_vm3, %v5312_v3  ;;  %4141 = vmatmul.msk.f32.vlgmr.msrb.gmra.mxu1 %vm252_vm3, %v5312_v3  ;;  %vm2070_vm0 = vmor %vm2068_vm15, %vm2069_vm14  ;;  %vm2078_vm7 = vweird.f32 %v2041_v4 }
 0xddc   :  { %v2061_v13 = vsel %vm2060_vm13, %v4516_v44, %v2057_v14  ;;  %v2064_v5 = vmul.f32 %v4518_v21, %v2063_v51  ;;  %4150 = vmatmul.msk.f32.vlgmr.msrb.gmra.mxu0 %vm252_vm3, %v5312_v3 }
 0xddd   :  { %v2083_v6 = vmul.f32 %v2061_v13, %v5268_v17 }
 0xdde   :  { %v2065_v15 = vmul.f32 0.5, %v2064_v5 }
 0xddf   :  { %v2090_v7 = vmul.f32 %v5303_v27, %v2083_v6 }
 0xde0   :  { %v2066_v8 = vsub.f32 1.5, %v2065_v15 }
 0xde1   :  { %v4520_v25 = vpop.eup %4519  ;;  %v5323_v16 = vadd.f32 %v4397_v34, %v2090_v7 }
 0xde2   :  { %v2067_v59 = vmul.f32 %v4518_v21, %v2066_v8  ;;  %v2073_v48 = vmul.f32 %v4520_v25, %v2041_v4  ;;  %vm2079_vm4 = vweird.f32 %v4520_v25 }
 0xde3   :  { %4133 = vmatmul.msk.f32.gmra.mxu3 %vm252_vm3, %v5323_v16  ;;  %4142 = vmatmul.msk.f32.gmra.mxu1 %vm252_vm3, %v5323_v16  ;;  %vm2080_vm8 = vmor %vm2078_vm7, %vm2079_vm4 }
 0xde4   :  { %v2071_v17 = vsel %vm2070_vm0, %v4518_v21, %v2067_v59  ;;  %v2074_v49 = vmul.f32 %v4520_v25, %v2073_v48  ;;  %4151 = vmatmul.msk.f32.gmra.mxu0 %vm252_vm3, %v5323_v16 }
 0xde5   :  { %v2084_v40 = vmul.f32 %v2071_v17, %v5275_v46 }
 0xde6   :  { %v2075_v52 = vmul.f32 0.5, %v2074_v49  ;;  %v4402_v49 = vld [vmem:[%s4731_s12 + $0x5] ss:$0 sm:$0xff] }
 0xde7   :  { %v2091_v61 = vmul.f32 %v5303_v27, %v2084_v40 }
 0xde8   :  { %v2076_v53 = vsub.f32 1.5, %v2075_v52 }
 0xde9   :  { %v5333_v55 = vadd.f32 %v4397_v34, %v2091_v61 }
 0xdea   :  { %v2077_v56 = vmul.f32 %v4520_v25, %v2076_v53 }
 0xdeb   :  { %4134 = vmatmul.msk.f32.gmra.mxu3 %vm252_vm3, %v5333_v55  ;;  %4143 = vmatmul.msk.f32.gmra.mxu1 %vm252_vm3, %v5333_v55 }
 0xdec   :  { %v2081_v57 = vsel %vm2080_vm8, %v4520_v25, %v2077_v56  ;;  %4152 = vmatmul.msk.f32.gmra.mxu0 %vm252_vm3, %v5333_v55 }
 0xded   :  { %v2085_v46 = vmul.f32 %v2081_v57, %v5282_v45 }
 0xdef   :  { %v2092_v58 = vmul.f32 %v5303_v27, %v2085_v46 }
 0xdf1   :  { %v5343_v43 = vadd.f32 %v4397_v34, %v2092_v58 }
 0xdf3   :  { %4135 = vmatmul.msk.f32.gmra.mxu3 %vm252_vm3, %v5343_v43  ;;  %4144 = vmatmul.msk.f32.gmra.mxu1 %vm252_vm3, %v5343_v43 }
 0xdf4   :  { %4153 = vmatmul.msk.f32.gmra.mxu0 %vm252_vm3, %v5343_v43 }
 0xdfc   :  { %4172 = vmatmul.msk.f32.vlgmr.msra.gmra.mxu0 %vm252_vm3, %v5312_v3 }
 0xe04   :  { %4173 = vmatmul.msk.f32.gmra.mxu0 %vm252_vm3, %v5323_v16 }
 0xe0c   :  { %4174 = vmatmul.msk.f32.gmra.mxu0 %vm252_vm3, %v5333_v55 }
 0xe14   :  { %4175 = vmatmul.msk.f32.gmra.mxu0 %vm252_vm3, %v5343_v43 }
 0xe58   :  { %v2178_v45 = vpop.f32.mrf.mxu1 }
 0xe59   :  { %v2217_v62 = vpop.f32.mrf.mxu0  ;;  %v2179_v18 = vadd.f32 %v4398_v63, %v2178_v45 }
 0xe5a   :  { %v2218_v22 = vadd.f32 %v4399_v11, %v2217_v62 }
 0xe5e   :  { %v2139_v50 = vpop.f32.mrf.mxu3 }
 0xe5f   :  { %v2140_v20 = vadd.f32 %v4400_v1, %v2139_v50 }
 0xe60   :  { %v2181_v0 = vpop.f32.mrf.mxu1 }
 0xe61   :  { %v2182_v9 = vadd.f32 %v4398_v63, %v2181_v0  ;;  %v2220_v10 = vpop.f32.mrf.mxu0 }
 0xe62   :  { %v2221_v19 = vadd.f32 %v4399_v11, %v2220_v10 }
 0xe63   :  { %4154 = vmatpush.xpose.msk.msra.mxu3 %vm485_vm1, %v2182_v9 }
 0xe66   :  { %v2142_v24 = vpop.f32.mrf.mxu3 }
 0xe67   :  { %4155 = vmatpush.xpose.msk.msra.mxu3 %vm485_vm1, %v2179_v18  ;;  %v2143_v27 = vadd.f32 %v4400_v1, %v2142_v24 }
 0xe68   :  { %v2184_v44 = vpop.f32.mrf.mxu1 }
 0xe69   :  { %v2223_v26 = vpop.f32.mrf.mxu0  ;;  %v2185_v42 = vadd.f32 %v4398_v63, %v2184_v44 }
 0xe6a   :  { %4156 = vmatmul.msk.f32.vlgmr.msra.gmra.mxu3 %vm485_vm1, %v2140_v20  ;;  %v2224_v35 = vadd.f32 %v4399_v11, %v2223_v26 }
 0xe6b   :  { %2371 = vmatpush.msrb.mxu3 %v2221_v19 }
 0xe6d   :  { %2372 = vmatpush.msrb.mxu3 %v2218_v22 }
 0xe6e   :  { %v2145_v34 = vpop.f32.mrf.mxu3 }
 0xe6f   :  { %v2146_v41 = vadd.f32 %v4400_v1, %v2145_v34 }
 0xe70   :  { %v2187_v29 = vpop.f32.mrf.mxu1 }
 0xe71   :  { %v2188_v30 = vadd.f32 %v4398_v63, %v2187_v29  ;;  %v2226_v31 = vpop.f32.mrf.mxu0 }
 0xe72   :  { %v2227_v37 = vadd.f32 %v4399_v11, %v2226_v31  ;;  %4157 = vmatmul.msk.f32.gmra.mxu3 %vm485_vm1, %v2143_v27 }
 0xe73   :  { %4158 = vmatpush.xpose.msk.msrb.mxu2 %vm485_vm1, %v2188_v30 }
 0xe74   :  { %2400 = vmatpush.msra.mxu1 %v2227_v37 }
 0xe76   :  { %2401 = vmatpush.msra.mxu1 %v2224_v35  ;;  %v2148_v21 = vpop.f32.mrf.mxu3 }
 0xe77   :  { %4159 = vmatpush.xpose.msk.msrb.mxu2 %vm485_vm1, %v2185_v42  ;;  %v2149_v4 = vadd.f32 %v4400_v1, %v2148_v21 }
 0xe7a   :  { %4160 = vmatmul.msk.f32.vlgmr.msrb.gmra.mxu2 %vm485_vm1, %v2146_v41 }
 0xe7b   :  { %2472 = vmatpush.msra.mxu2 %v4179_v39 }
 0xe7d   :  { %2473 = vmatpush.msra.mxu2 %v4178_v47  ;;  %v2438_v47 = vpop.f32.mrf.mxu0 }
 0xe7f   :  { %2474 = vmatpush.msra.mxu2 %v4177_v2 }
 0xe81   :  { %2475 = vmatpush.msra.mxu2 %v4176_v12 }
 0xe82   :  { %4161 = vmatmul.msk.f32.gmra.mxu2 %vm485_vm1, %v2149_v4  ;;  %v4401_v4 = vld [vmem:[%s4784_s2 + $0x5] ss:$0 sm:$0xff] }
 0xe8a   :  { %4181 = vmatmul.msk.f32.vlgmr.msra.gmra.mxu2 %vm252_vm3, %v5312_v3 }
 0xe92   :  { %4182 = vmatmul.msk.f32.gmra.mxu2 %vm252_vm3, %v5323_v16 }
 0xe9a   :  { %4183 = vmatmul.msk.f32.gmra.mxu2 %vm252_vm3, %v5333_v55 }
 0xea2   :  { %4184 = vmatmul.msk.f32.gmra.mxu2 %vm252_vm3, %v5343_v43 }
 0xeed   :  { %v2258_v15 = vpop.f32.mrf.mxu3 }
 0xeee   :  { %v2299_v25 = vmul.f32 0.35355338, %v2258_v15 }
 0xef0   :  { %v2303_v48 = vsel %vm4847_vm5, %v2299_v25, -1e+30 }
 0xef1   :  { %v2307_v17 = vsel %vm150_vm2, %v2303_v48, -inf }
 0xef5   :  { %v2261_v45 = vpop.f32.mrf.mxu3 }
 0xef6   :  { %v2300_v0 = vmul.f32 0.35355338, %v2261_v45 }
 0xef8   :  { %v2304_v11 = vsel %vm4854_vm6, %v2300_v0, -1e+30 }
 0xef9   :  { %v2310_v19 = vsel %vm150_vm2, %v2304_v11, -inf }
 0xefd   :  { %v2293_v14 = vpop.f32.mrf.mxu2 }
 0xefe   :  { %v2301_v51 = vmul.f32 0.35355338, %v2293_v14 }
 0xf00   :  { %v2305_v36 = vsel %vm4847_vm5, %v2301_v51, -1e+30 }
 0xf01   :  { %v2313_v13 = vsel %vm150_vm2, %v2305_v36, -inf }
 0xf02   :  { %2314 = vmax.xlane.f32.xlu2 %v2313_v13 }
 0xf05   :  { %v2296_v5 = vpop.f32.mrf.mxu2 }
 0xf06   :  { %v2302_v6 = vmul.f32 0.35355338, %v2296_v5  ;;  %v2441_v5 = vpop.f32.mrf.mxu0 }
 0xf08   :  { %v2306_v7 = vsel %vm4854_vm6, %v2302_v6, -1e+30  ;;  %v2442_v6 = vadd.f32 %v4401_v4, %v2441_v5 }
 0xf09   :  { %v2316_v8 = vsel %vm150_vm2, %v2306_v7, -inf }
 0xf0a   :  { %2317 = vmax.xlane.f32.xlu0 %v2316_v8 }
 0xf0d   :  { %v2477_v59 = vpop.f32.mrf.mxu2 }
 0xf0e   :  { %v2478_v61 = vadd.f32 %v4402_v49, %v2477_v59  ;;  %v2444_v15 = vpop.f32.mrf.mxu0  ;;  %v4188_v59 = vld [vmem:[%s4747_s24 + $0xb8] sm:$0xff] }
 0xf0f   :  { %2511 = vmatpush.msra.mxu3 %v4188_v59 }
 0xf12   :  { %2308 = vmax.xlane.f32.xlu0 %v2307_v17  ;;  %v4186_v17 = vld [vmem:[%s4747_s24 + $0xa8] sm:$0xff] }
 0xf15   :  { %v2480_v40 = vpop.f32.mrf.mxu2 }
 0xf16   :  { %v2481_v52 = vadd.f32 %v4402_v49, %v2480_v40  ;;  %v2447_v8 = vpop.f32.mrf.mxu0  ;;  %v4166_v40 = vld [vmem:[%s4890_s8 + $0x20] sm:$0xff] }
 0xf17   :  { %v2448_v25 = vadd.f32 %v4401_v4, %v2447_v8 }
 0xf18   :  { %4194 = vmatpush.xpose.msk.msrb.mxu1 %vm485_vm1, %v2481_v52 }
 0xf1c   :  { %4195 = vmatpush.xpose.msk.msrb.mxu1 %vm485_vm1, %v2478_v61 }
 0xf1d   :  { %v2483_v24 = vpop.f32.mrf.mxu2 }
 0xf1e   :  { %v2484_v39 = vadd.f32 %v4402_v49, %v2483_v24 }
 0xf25   :  { %v2486_v27 = vpop.f32.mrf.mxu2 }
 0xf26   :  { %v2487_v34 = vadd.f32 %v4402_v49, %v2486_v27  ;;  %v4185_v49 = vld [vmem:[%s4747_s24 + $0xa0] sm:$0xff] }
 0xf75   :  { %v2315_v53 = vpop.xlane.xlu2 %2314 }
 0xf76   :  { %v2321_v56 = vsub.f32 %v2305_v36, %v2315_v53  ;;  %v2439_v36 = vadd.f32 %v4401_v4, %v2438_v47 }
 0xf78   :  { %v2327_v57 = vmul.f32 1.442695, %v2321_v56 }
 0xf7a   :  { %4521 = vpow2.f32 %v2327_v57 }
 0xf7d   :  { %v2318_v46 = vpop.xlane.xlu0 %2317 }
 0xf7e   :  { %v2322_v58 = vsub.f32 %v2306_v7, %v2318_v46  ;;  %v2445_v7 = vadd.f32 %v4401_v4, %v2444_v15 }
 0xf80   :  { %v4522_v62 = vpop.eup %4521  ;;  %v2329_v63 = vmul.f32 1.442695, %v2322_v58 }
 0xf81   :  { %v2337_v50 = vsel %vm150_vm2, %v4522_v62, 0.0 }
 0xf82   :  { %4523 = vpow2.f32 %v2329_v63  ;;  %2338 = vadd.xlane.f32.xlu1 %v2337_v50 }
 0xf85   :  { %v2309_v9 = vpop.xlane.xlu0 %2308 }
 0xf86   :  { %v2319_v10 = vsub.f32 %v2303_v48, %v2309_v9  ;;  %v4187_v48 = vld [vmem:[%s4747_s24 + $0xb0] sm:$0xff] }
 0xf87   :  { %2512 = vmatpush.msra.mxu3 %v4187_v48 }
 0xf88   :  { %v4524_v1 = vpop.eup %4523  ;;  %v2323_v18 = vmul.f32 1.442695, %v2319_v10 }
 0xf89   :  { %v2340_v20 = vsel %vm150_vm2, %v4524_v1, 0.0  ;;  %2513 = vmatpush.msra.mxu3 %v4186_v17 }
 0xf8a   :  { %4525 = vpow2.f32 %v2323_v18  ;;  %2311 = vmax.xlane.f32.xlu1 %v2310_v19  ;;  %2341 = vadd.xlane.f32.xlu2 %v2340_v20 }
 0xf8b   :  { %2514 = vmatpush.msra.mxu3 %v4185_v49 }
 0xf90   :  { %v4526_v44 = vpop.eup %4525 }
 0xf91   :  { %v2331_v22 = vsel %vm150_vm2, %v4526_v44, 0.0 }
 0xf92   :  { %2332 = vadd.xlane.f32.xlu2 %v2331_v22 }
 0xff5   :  { %v2339_v26 = vpop.xlane.xlu1 %2338 }
 0xff6   :  { %4527 = vrcp.f32 %v2339_v26 }
 0xffc   :  { %v4528_v29 = vpop.eup %4527 }
 0xffd   :  { %v2349_v30 = vmul.f32 %v4528_v29, %v4522_v62  ;;  %v2312_v31 = vpop.xlane.xlu1 %2311  ;;  %v2342_v37 = vpop.xlane.xlu2 %2341 }
 0xffe   :  { %v2320_v35 = vsub.f32 %v2304_v11, %v2312_v31  ;;  %4529 = vrcp.f32 %v2342_v37 }
 0xfff   :  { %4164 = vmatmul.msk.f32.vlgmr.msra.gmra.mxu1 %vm150_vm2, %v2349_v30 }
0x1000   :  { %v2325_v42 = vmul.f32 1.442695, %v2320_v35  ;;  %4198 = vmatpush.xpose.msk.msra.mxu1 %vm485_vm1, %v2487_v34 }
0x1002   :  { %4531 = vpow2.f32 %v2325_v42 }
0x1004   :  { %v4530_v41 = vpop.eup %4529  ;;  %4199 = vmatpush.xpose.msk.msra.mxu1 %vm485_vm1, %v2484_v39 }
0x1005   :  { %v2333_v2 = vpop.xlane.xlu2 %2332  ;;  %v2350_v12 = vmul.f32 %v4530_v41, %v4524_v1  ;;  %v4403_v41 = vld [vmem:[%s4772_s28 + $0x5] ss:$0 sm:$0xff] }
0x1006   :  { %4533 = vrcp.f32 %v2333_v2 }
0x1007   :  { %4165 = vmatmul.msk.f32.gmra.mxu1 %vm150_vm2, %v2350_v12 }
0x1008   :  { %v4532_v21 = vpop.eup %4531 }
0x1009   :  { %v2334_v14 = vsel %vm150_vm2, %v4532_v21, 0.0 }
0x100a   :  { %2335 = vadd.xlane.f32.xlu0 %v2334_v14 }
0x100c   :  { %v4534_v51 = vpop.eup %4533 }
0x100d   :  { %v2347_v13 = vmul.f32 %v4534_v51, %v4526_v44 }
0x100f   :  { %4162 = vmatmul.msk.f32.vlgmr.msrb.gmra.mxu3 %vm150_vm2, %v2347_v13  ;;  %4196 = vmatmul.msk.f32.vlgmr.msrb.gmra.mxu1 %vm485_vm1, %v2439_v36 }
0x1010   :  { %2778 = vmatpush.msrb.mxu1 %v4166_v40 }
0x1017   :  { %4197 = vmatmul.msk.f32.gmra.mxu1 %vm485_vm1, %v2442_v6 }
0x101f   :  { %4200 = vmatmul.msk.f32.vlgmr.msra.gmra.mxu1 %vm485_vm1, %v2445_v7 }
0x1027   :  { %4201 = vmatmul.msk.f32.gmra.mxu1 %vm485_vm1, %v2448_v25 }
0x107c   :  { %v2403_v52 = vpop.f32.mrf.mxu1 }
0x107d   :  { %v2336_v61 = vpop.xlane.xlu0 %2335 }
0x107e   :  { %4535 = vrcp.f32 %v2336_v61  ;;  %v4227_v61 = vld [vmem:[%s4736_s16 + $0xd8] sm:$0xff] }
0x1084   :  { %v4536_v53 = vpop.eup %4535  ;;  %v2406_v56 = vpop.f32.mrf.mxu1 }
0x1085   :  { %v2348_v57 = vmul.f32 %v4536_v53, %v4532_v21  ;;  %v4217_v53 = vld [vmem:[%s4741_s20 + $0xd0] sm:$0xff] }
0x1087   :  { %4163 = vmatmul.msk.f32.gmra.mxu3 %vm150_vm2, %v2348_v57  ;;  %v4216_v57 = vld [vmem:[%s4741_s20 + $0xc8] sm:$0xff] }
0x108c   :  { %v2557_v46 = vpop.f32.mrf.mxu1 }
0x108d   :  { %v2598_v58 = vmul.f32 0.35355338, %v2557_v46  ;;  %v4225_v46 = vld [vmem:[%s4736_s16 + $0xc8] sm:$0xff] }
0x108f   :  { %4190 = vmatmul.msk.f32.vlgmr.msra.gmra.mxu3 %vm252_vm3, %v5312_v3  ;;  %v2602_v45 = vsel %vm4847_vm5, %v2598_v58, -1e+30 }
0x1090   :  { %v2606_v62 = vsel %vm150_vm2, %v2602_v45, -inf }
0x1091   :  { %2607 = vmax.xlane.f32.xlu0 %v2606_v62 }
0x1092   :  { %v2374_v63 = vpop.f32.mrf.mxu3 }
0x1093   :  { %4211 = vmatmul.msk.f32.vlgmr.msrb.gmra.mxu1 %vm485_vm1, %v2374_v63  ;;  %v4215_v63 = vld [vmem:[%s4741_s20 + $0xc0] sm:$0xff] }
0x1094   :  { %v2560_v50 = vpop.f32.mrf.mxu1 }
0x1095   :  { %v2599_v1 = vmul.f32 0.35355338, %v2560_v50 }
0x1097   :  { %4191 = vmatmul.msk.f32.gmra.mxu3 %vm252_vm3, %v5323_v16  ;;  %v2603_v20 = vsel %vm4854_vm6, %v2599_v1, -1e+30 }
0x1098   :  { %v2609_v22 = vsel %vm150_vm2, %v2603_v20, -inf }
0x109c   :  { %v2592_v0 = vpop.f32.mrf.mxu1 }
0x109d   :  { %v2600_v9 = vmul.f32 0.35355338, %v2592_v0 }
0x109f   :  { %4192 = vmatmul.msk.f32.gmra.mxu3 %vm252_vm3, %v5333_v55  ;;  %v2604_v10 = vsel %vm4847_vm5, %v2600_v9, -1e+30 }
0x10a0   :  { %v2612_v11 = vsel %vm150_vm2, %v2604_v10, -inf }
0x10a1   :  { %2613 = vmax.xlane.f32.xlu1 %v2612_v11 }
0x10a4   :  { %v2595_v18 = vpop.f32.mrf.mxu1 }
0x10a5   :  { %v2601_v19 = vmul.f32 0.35355338, %v2595_v18 }
0x10a7   :  { %4193 = vmatmul.msk.f32.gmra.mxu3 %vm252_vm3, %v5343_v43  ;;  %v2605_v44 = vsel %vm4854_vm6, %v2601_v19, -1e+30 }
0x10a8   :  { %v2615_v24 = vsel %vm150_vm2, %v2605_v44, -inf }
0x10a9   :  { %2610 = vmax.xlane.f32.xlu1 %v2609_v22  ;;  %2616 = vmax.xlane.f32.xlu2 %v2615_v24  ;;  %v4236_v24 = vld [vmem:[%s4747_s24 + $0xd8] sm:$0xff] }
0x1104   :  { %v2608_v26 = vpop.xlane.xlu0 %2607 }
0x1105   :  { %v2618_v27 = vsub.f32 %v2602_v45, %v2608_v26  ;;  %v4224_v45 = vld [vmem:[%s4736_s16 + $0xc0] sm:$0xff]  ;;  %v4235_v26 = vld [vmem:[%s4747_s24 + $0xd0] sm:$0xff] }
0x1107   :  { %v2622_v29 = vmul.f32 1.442695, %v2618_v27  ;;  %v4234_v27 = vld [vmem:[%s4747_s24 + $0xc8] sm:$0xff] }
0x1109   :  { %4537 = vpow2.f32 %v2622_v29  ;;  %v4233_v29 = vld [vmem:[%s4747_s24 + $0xc0] sm:$0xff] }
0x110a   :  { %v2377_v30 = vpop.f32.mrf.mxu3 }
0x110b   :  { %4212 = vmatmul.msk.f32.gmra.mxu1 %vm485_vm1, %v2377_v30 }
0x110f   :  { %v4538_v31 = vpop.eup %4537 }
0x1110   :  { %v2630_v37 = vsel %vm150_vm2, %v4538_v31, 0.0 }
0x1111   :  { %2631 = vadd.xlane.f32.xlu1 %v2630_v37 }
0x1112   :  { %v2516_v34 = vpop.f32.mrf.mxu3 }
0x1113   :  { %4213 = vmatmul.msk.f32.gmra.mxu1 %vm485_vm1, %v2403_v52  ;;  %v2517_v4 = vadd.f32 %v4403_v41, %v2516_v34  ;;  %v4218_v52 = vld [vmem:[%s4741_s20 + $0xd8] sm:$0xff] }
0x1114   :  { %v2614_v35 = vpop.xlane.xlu1 %2613 }
0x1115   :  { %v2620_v42 = vsub.f32 %v2604_v10, %v2614_v35  ;;  %v4271_v35 = vld [vmem:[%s4736_s16 + $0xf8] sm:$0xff] }
0x1117   :  { %v2626_v39 = vmul.f32 1.442695, %v2620_v42  ;;  %v4270_v42 = vld [vmem:[%s4736_s16 + $0xf0] sm:$0xff] }
0x1119   :  { %4539 = vpow2.f32 %v2626_v39  ;;  %v4269_v39 = vld [vmem:[%s4736_s16 + $0xe8] sm:$0xff] }
0x111a   :  { %v2519_v47 = vpop.f32.mrf.mxu3 }
0x111b   :  { %v2520_v2 = vadd.f32 %v4403_v41, %v2519_v47  ;;  %4214 = vmatmul.msk.f32.gmra.mxu1 %vm485_vm1, %v2406_v56  ;;  %v4226_v56 = vld [vmem:[%s4736_s16 + $0xd0] sm:$0xff]  ;;  %v4405_v47 = vld [vmem:[%s4731_s12 + $0x6] ss:$0 sm:$0xff] }
0x111c   :  { %v2611_v12 = vpop.xlane.xlu1 %2610  ;;  %v2617_v21 = vpop.xlane.xlu2 %2616 }
0x111d   :  { %v2619_v14 = vsub.f32 %v2603_v20, %v2611_v12  ;;  %v2621_v51 = vsub.f32 %v2605_v44, %v2617_v21  ;;  %2670 = vmatpush.msrb.mxu0 %v2520_v2  ;;  %v4206_v44 = vld [vmem:[%s4890_s8 + $0x28] sm:$0xff]  ;;  %v4268_v21 = vld [vmem:[%s4736_s16 + $0xe0] sm:$0xff]  ;;  %s5709_s16 = sld [smem:[%s5771_s0 + %s4632_s3]]  }
0x111e   :  { %2737 = vmatpush.msrb.mxu3 %v4206_v44 }
0x111f   :  { %v4540_v36 = vpop.eup %4539  ;;  %v2624_v13 = vmul.f32 1.442695, %v2619_v14  ;;  %v2628_v5 = vmul.f32 1.442695, %v2621_v51  ;;  %2671 = vmatpush.msrb.mxu0 %v2517_v4  ;;  %v4404_v4 = vld [vmem:[%s4784_s2 + $0x6] ss:$0 sm:$0xff] }
0x1120   :  { %v2636_v6 = vsel %vm150_vm2, %v4540_v36, 0.0  ;;  %2892 = vmatpush.msra.mxu3 %v4236_v24 }
0x1121   :  { %4541 = vpow2.f32 %v2624_v13  ;;  %2637 = vadd.xlane.f32.xlu2 %v2636_v6  ;;  %2814 = vmatpush.msra.mxu0 %v4218_v52 }
0x1122   :  { %4543 = vpow2.f32 %v2628_v5  ;;  %v2522_v15 = vpop.f32.mrf.mxu3  ;;  %2893 = vmatpush.msra.mxu3 %v4235_v26 }
0x1123   :  { %v2523_v49 = vadd.f32 %v4403_v41, %v2522_v15  ;;  %2815 = vmatpush.msra.mxu0 %v4217_v53 }
0x1124   :  { %2894 = vmatpush.msra.mxu3 %v4234_v27 }
0x1125   :  { %2816 = vmatpush.msra.mxu0 %v4216_v57 }
0x1126   :  { %2895 = vmatpush.msra.mxu3 %v4233_v29 }
0x1127   :  { %v4542_v7 = vpop.eup %4541  ;;  %2817 = vmatpush.msra.mxu0 %v4215_v63 }
0x1128   :  { %v4544_v8 = vpop.eup %4543  ;;  %v2633_v25 = vsel %vm150_vm2, %v4542_v7, 0.0 }
0x1129   :  { %2634 = vadd.xlane.f32.xlu2 %v2633_v25  ;;  %v2639_v59 = vsel %vm150_vm2, %v4544_v8, 0.0 }
0x112a   :  { %2640 = vadd.xlane.f32.xlu0 %v2639_v59  ;;  %v2525_v48 = vpop.f32.mrf.mxu3 }
0x112b   :  { %v2526_v17 = vadd.f32 %v4403_v41, %v2525_v48 }
0x112d   :  { %2699 = vmatpush.msrb.mxu2 %v2526_v17  ;;  %v5513_v17 = vpop.f32.mrf.mxu1 }
0x112f   :  { %2700 = vmatpush.msrb.mxu2 %v2523_v49 }
0x1131   :  { %2853 = vmatpush.msra.mxu2 %v4227_v61 }
0x1133   :  { %2854 = vmatpush.msra.mxu2 %v4226_v56 }
0x1135   :  { %2855 = vmatpush.msra.mxu2 %v4225_v46 }
0x1137   :  { %2856 = vmatpush.msra.mxu2 %v4224_v45 }
0x1184   :  { %v2632_v40 = vpop.xlane.xlu1 %2631 }
0x1185   :  { %4545 = vrcp.f32 %v2632_v40 }
0x1188   :  { %v5517_v40 = vpop.f32.mrf.mxu1 }
0x118b   :  { %v4546_v58 = vpop.eup %4545 }
0x118c   :  { %v2646_v62 = vmul.f32 %v4546_v58, %v4538_v31 }
0x118e   :  { %4202 = vmatmul.msk.f32.vlgmr.msrb.gmra.mxu0 %vm150_vm2, %v2646_v62 }
0x1190   :  { %v5521_v61 = vpop.f32.mrf.mxu1 }
0x1194   :  { %v2638_v50 = vpop.xlane.xlu2 %2637 }
0x1195   :  { %4547 = vrcp.f32 %v2638_v50 }
0x1198   :  { %v2789_v56 = vpop.f32.mrf.mxu1 }
0x119b   :  { %v4548_v0 = vpop.eup %4547 }
0x119c   :  { %v2648_v9 = vmul.f32 %v4548_v0, %v4540_v36  ;;  %v2635_v10 = vpop.xlane.xlu2 %2634  ;;  %v4406_v0 = vld [vmem:[%s4772_s28 + $0x6] ss:$0 sm:$0xff] }
0x119d   :  { %4549 = vrcp.f32 %v2635_v10  ;;  %v2641_v11 = vpop.xlane.xlu0 %2640 }
0x119e   :  { %4551 = vrcp.f32 %v2641_v11  ;;  %4204 = vmatmul.msk.f32.vlgmr.msrb.gmra.mxu2 %vm150_vm2, %v2648_v9  ;;  %v4254_v11 = vld [vmem:[%s4890_s8 + $0x30] sm:$0xff] }
0x11a3   :  { %v4550_v1 = vpop.eup %4549 }
0x11a4   :  { %v4552_v18 = vpop.eup %4551  ;;  %v2647_v19 = vmul.f32 %v4550_v1, %v4542_v7 }
0x11a5   :  { %v2649_v20 = vmul.f32 %v4552_v18, %v4544_v8 }
0x11a6   :  { %4203 = vmatmul.msk.f32.gmra.mxu0 %vm150_vm2, %v2647_v19 }
0x11a7   :  { %4205 = vmatmul.msk.f32.gmra.mxu2 %vm150_vm2, %v2649_v20 }
0x11ae   :  { %4220 = vmatmul.msk.f32.vlgmr.msra.gmra.mxu0 %vm252_vm3, %v5312_v3 }
0x11af   :  { %4229 = vmatmul.msk.f32.vlgmr.msra.gmra.mxu2 %vm252_vm3, %v5312_v3 }
0x11b6   :  { %4221 = vmatmul.msk.f32.gmra.mxu0 %vm252_vm3, %v5323_v16 }
0x11b7   :  { %4230 = vmatmul.msk.f32.gmra.mxu2 %vm252_vm3, %v5323_v16 }
0x11be   :  { %4222 = vmatmul.msk.f32.gmra.mxu0 %vm252_vm3, %v5333_v55 }
0x11bf   :  { %4231 = vmatmul.msk.f32.gmra.mxu2 %vm252_vm3, %v5333_v55 }
0x11c6   :  { %4223 = vmatmul.msk.f32.gmra.mxu0 %vm252_vm3, %v5343_v43 }
0x11c7   :  { %4232 = vmatmul.msk.f32.gmra.mxu2 %vm252_vm3, %v5343_v43 }
0x120b   :  { %v2673_v22 = vpop.f32.mrf.mxu0 }
0x120c   :  { %4207 = vmatmul.msk.f32.vlgmr.msrb.gmra.mxu3 %vm485_vm1, %v2673_v22 }
0x120d   :  { %3197 = vmatpush.msrb.mxu3 %v4271_v35 }
0x120f   :  { %3198 = vmatpush.msrb.mxu3 %v4270_v42 }
0x1211   :  { %3199 = vmatpush.msrb.mxu3 %v4269_v39 }
0x1213   :  { %3200 = vmatpush.msrb.mxu3 %v4268_v21 }
0x1221   :  { %v2702_v30 = vpop.f32.mrf.mxu2 }
0x1223   :  { %v2676_v31 = vpop.f32.mrf.mxu0 }
0x1224   :  { %4208 = vmatmul.msk.f32.gmra.mxu3 %vm485_vm1, %v2676_v31 }
0x122a   :  { %v2705_v37 = vpop.f32.mrf.mxu2 }
0x122b   :  { %v2819_v41 = vpop.f32.mrf.mxu0 }
0x122c   :  { %4209 = vmatmul.msk.f32.gmra.mxu3 %vm485_vm1, %v2702_v30  ;;  %v2820_v51 = vadd.f32 %v4404_v4, %v2819_v41 }
0x1232   :  { %v2858_v34 = vpop.f32.mrf.mxu2 }
0x1233   :  { %v2859_v14 = vadd.f32 %v4405_v47, %v2858_v34  ;;  %v2822_v13 = vpop.f32.mrf.mxu0 }
0x1234   :  { %4210 = vmatmul.msk.f32.gmra.mxu3 %vm485_vm1, %v2705_v37  ;;  %v2823_v5 = vadd.f32 %v4404_v4, %v2822_v13 }
0x123a   :  { %v2861_v2 = vpop.f32.mrf.mxu2 }
0x123b   :  { %v2862_v12 = vadd.f32 %v4405_v47, %v2861_v2  ;;  %v2825_v7 = vpop.f32.mrf.mxu0 }
0x123c   :  { %4238 = vmatmul.msk.f32.vlgmr.msra.gmra.mxu3 %vm252_vm3, %v5312_v3  ;;  %v2826_v25 = vadd.f32 %v4404_v4, %v2825_v7 }
0x123d   :  { %4242 = vmatpush.xpose.msk.msra.mxu1 %vm485_vm1, %v2862_v12 }
0x1241   :  { %4243 = vmatpush.xpose.msk.msra.mxu1 %vm485_vm1, %v2859_v14 }
0x1242   :  { %v2864_v36 = vpop.f32.mrf.mxu2 }
0x1243   :  { %v2865_v8 = vadd.f32 %v4405_v47, %v2864_v36  ;;  %v2828_v59 = vpop.f32.mrf.mxu0 }
0x1244   :  { %4244 = vmatmul.msk.f32.vlgmr.msra.gmra.mxu1 %vm485_vm1, %v2820_v51  ;;  %4239 = vmatmul.msk.f32.gmra.mxu3 %vm252_vm3, %v5323_v16  ;;  %v2829_v48 = vadd.f32 %v4404_v4, %v2828_v59 }
0x124a   :  { %v2867_v6 = vpop.f32.mrf.mxu2 }
0x124b   :  { %v2868_v15 = vadd.f32 %v4405_v47, %v2867_v6  ;;  %v4407_v47 = vld [vmem:[%s4731_s12 + $0x7] ss:$0 sm:$0xff] }
0x124c   :  { %4245 = vmatmul.msk.f32.gmra.mxu1 %vm485_vm1, %v2823_v5  ;;  %4240 = vmatmul.msk.f32.gmra.mxu3 %vm252_vm3, %v5333_v55 }
0x124d   :  { %4246 = vmatpush.xpose.msk.msrb.mxu0 %vm485_vm1, %v2868_v15 }
0x1251   :  { %4247 = vmatpush.xpose.msk.msrb.mxu0 %vm485_vm1, %v2865_v8 }
0x1254   :  { %4248 = vmatmul.msk.f32.vlgmr.msrb.gmra.mxu0 %vm485_vm1, %v2826_v25  ;;  %4241 = vmatmul.msk.f32.gmra.mxu3 %vm252_vm3, %v5343_v43 }
0x1255   :  { %3118 = vmatpush.msra.mxu0 %v4254_v11  ;;  %v4259_v11 = vld [vmem:[%s4741_s20 + $0xe0] sm:$0xff] }
0x125c   :  { %4249 = vmatmul.msk.f32.gmra.mxu0 %vm485_vm1, %v2829_v48  ;;  %4273 = vmatmul.msk.f32.vlgmr.msrb.gmra.mxu3 %vm252_vm3, %v5312_v3 }
0x1264   :  { %4274 = vmatmul.msk.f32.gmra.mxu3 %vm252_vm3, %v5323_v16 }
0x126c   :  { %4275 = vmatmul.msk.f32.gmra.mxu3 %vm252_vm3, %v5333_v55 }
0x1274   :  { %4276 = vmatmul.msk.f32.gmra.mxu3 %vm252_vm3, %v5343_v43 }
0x128f   :  { %v5515_v49 = vpop.f32.mrf.mxu3 }
0x12a7   :  { %v5519_v52 = vpop.f32.mrf.mxu3 }
0x12af   :  { %v5523_v53 = vpop.f32.mrf.mxu3 }
0x12b7   :  { %v2748_v57 = vpop.f32.mrf.mxu3 }
0x12b8   :  { %v5525_v46 = vadd.f32 %v2789_v56, %v2748_v57 }
0x12bf   :  { %v2897_v58 = vpop.f32.mrf.mxu3 }
0x12c0   :  { %v2898_v18 = vadd.f32 %v4406_v0, %v2897_v58 }
0x12c1   :  { %v2938_v45 = vpop.f32.mrf.mxu1 }
0x12c2   :  { %v2979_v62 = vmul.f32 0.35355338, %v2938_v45 }
0x12c4   :  { %v2983_v63 = vsel %vm4847_vm5, %v2979_v62, -1e+30 }
0x12c5   :  { %v2987_v50 = vsel %vm150_vm2, %v2983_v63, -inf }
0x12c6   :  { %2988 = vmax.xlane.f32.xlu0 %v2987_v50 }
0x12c7   :  { %v2900_v9 = vpop.f32.mrf.mxu3 }
0x12c8   :  { %v2901_v10 = vadd.f32 %v4406_v0, %v2900_v9  ;;  %v4261_v9 = vld [vmem:[%s4741_s20 + $0xf0] sm:$0xff] }
0x12c9   :  { %v2941_v1 = vpop.f32.mrf.mxu1 }
0x12ca   :  { %v2980_v19 = vmul.f32 0.35355338, %v2941_v1  ;;  %3051 = vmatpush.msrb.mxu2 %v2901_v10  ;;  %v4260_v10 = vld [vmem:[%s4741_s20 + $0xe8] sm:$0xff] }
0x12cc   :  { %3052 = vmatpush.msrb.mxu2 %v2898_v18  ;;  %v2984_v20 = vsel %vm4854_vm6, %v2980_v19, -1e+30  ;;  %v4280_v19 = vld [vmem:[%s4747_s24 + $0xf8] sm:$0xff] }
0x12cd   :  { %v2990_v44 = vsel %vm150_vm2, %v2984_v20, -inf }
0x12ce   :  { %2991 = vmax.xlane.f32.xlu1 %v2990_v44  ;;  %v4278_v44 = vld [vmem:[%s4747_s24 + $0xe8] sm:$0xff] }
0x12cf   :  { %v2903_v22 = vpop.f32.mrf.mxu3 }
0x12d0   :  { %v2904_v34 = vadd.f32 %v4406_v0, %v2903_v22 }
0x12d1   :  { %v2973_v24 = vpop.f32.mrf.mxu0 }
0x12d2   :  { %v2981_v26 = vmul.f32 0.35355338, %v2973_v24  ;;  %v4277_v24 = vld [vmem:[%s4747_s24 + $0xe0] sm:$0xff] }
0x12d4   :  { %v2985_v27 = vsel %vm4847_vm5, %v2981_v26, -1e+30 }
0x12d5   :  { %v2993_v29 = vsel %vm150_vm2, %v2985_v27, -inf }
0x12d6   :  { %2994 = vmax.xlane.f32.xlu2 %v2993_v29 }
0x12d7   :  { %v2906_v30 = vpop.f32.mrf.mxu3 }
0x12d8   :  { %v2907_v31 = vadd.f32 %v4406_v0, %v2906_v30  ;;  %v4262_v0 = vld [vmem:[%s4741_s20 + $0xf8] sm:$0xff]  ;;  %s4633_s20 = smov 24  }
0x12d9   :  { %v2976_v37 = vpop.f32.mrf.mxu0  ;;  %3158 = vmatpush.msra.mxu2 %v4262_v0 }
0x12da   :  { %v2982_v35 = vmul.f32 0.35355338, %v2976_v37  ;;  %3080 = vmatpush.msrb.mxu1 %v2907_v31 }
0x12db   :  { %3159 = vmatpush.msra.mxu2 %v4261_v9 }
0x12dc   :  { %3081 = vmatpush.msrb.mxu1 %v2904_v34  ;;  %v2986_v42 = vsel %vm4854_vm6, %v2982_v35, -1e+30 }
0x12dd   :  { %v2996_v39 = vsel %vm150_vm2, %v2986_v42, -inf  ;;  %3160 = vmatpush.msra.mxu2 %v4260_v10  ;;  %v2787_v10 = vadd.f32 %v5521_v61, %v5523_v53 }
0x12de   :  { %2997 = vmax.xlane.f32.xlu0 %v2996_v39  ;;  %3236 = vmatpush.msra.mxu1 %v4280_v19 }
0x12df   :  { %v3202_v41 = vpop.f32.mrf.mxu3  ;;  %3161 = vmatpush.msra.mxu2 %v4259_v11 }
0x12e0   :  { %v3203_v21 = vadd.f32 %v4407_v47, %v3202_v41 }
0x12e7   :  { %v3205_v2 = vpop.f32.mrf.mxu3 }
0x12e8   :  { %v3206_v12 = vadd.f32 %v4407_v47, %v3205_v2 }
0x12ea   :  { %4286 = vmatpush.xpose.msk.msrb.mxu0 %vm485_vm1, %v3206_v12 }
0x12ee   :  { %4287 = vmatpush.xpose.msk.msrb.mxu0 %vm485_vm1, %v3203_v21 }
0x12ef   :  { %v3208_v1 = vpop.f32.mrf.mxu3 }
0x12f0   :  { %v3209_v31 = vadd.f32 %v4407_v47, %v3208_v1 }
0x12f7   :  { %v3211_v22 = vpop.f32.mrf.mxu3 }
0x12f8   :  { %v3212_v30 = vadd.f32 %v4407_v47, %v3211_v22 }
0x1339   :  { %v2989_v4 = vpop.xlane.xlu0 %2988 }
0x133a   :  { %v2999_v14 = vsub.f32 %v2983_v63, %v2989_v4 }
0x133c   :  { %v3003_v51 = vmul.f32 1.442695, %v2999_v14 }
0x133e   :  { %4553 = vpow2.f32 %v3003_v51 }
0x1341   :  { %v2992_v36 = vpop.xlane.xlu1 %2991 }
0x1342   :  { %v3000_v13 = vsub.f32 %v2984_v20, %v2992_v36  ;;  %v4279_v20 = vld [vmem:[%s4747_s24 + $0xf0] sm:$0xff] }
0x1343   :  { %3237 = vmatpush.msra.mxu1 %v4279_v20 }
0x1344   :  { %v4554_v5 = vpop.eup %4553  ;;  %v3005_v6 = vmul.f32 1.442695, %v3000_v13 }
0x1345   :  { %v3011_v15 = vsel %vm150_vm2, %v4554_v5, 0.0  ;;  %3238 = vmatpush.msra.mxu1 %v4278_v44 }
0x1346   :  { %4555 = vpow2.f32 %v3005_v6  ;;  %3012 = vadd.xlane.f32.xlu1 %v3011_v15 }
0x1347   :  { %3239 = vmatpush.msra.mxu1 %v4277_v24 }
0x1349   :  { %v2995_v7 = vpop.xlane.xlu2 %2994 }
0x134a   :  { %v3001_v8 = vsub.f32 %v2985_v27, %v2995_v7 }
0x134c   :  { %v4556_v25 = vpop.eup %4555  ;;  %v3007_v59 = vmul.f32 1.442695, %v3001_v8 }
0x134d   :  { %v3014_v48 = vsel %vm150_vm2, %v4556_v25, 0.0 }
0x134e   :  { %4557 = vpow2.f32 %v3007_v59  ;;  %3015 = vadd.xlane.f32.xlu2 %v3014_v48 }
0x1351   :  { %v2998_v56 = vpop.xlane.xlu0 %2997 }
0x1352   :  { %v3002_v57 = vsub.f32 %v2986_v42, %v2998_v56 }
0x1354   :  { %v4558_v58 = vpop.eup %4557  ;;  %v3009_v45 = vmul.f32 1.442695, %v3002_v57 }
0x1355   :  { %v3017_v62 = vsel %vm150_vm2, %v4558_v58, 0.0 }
0x1356   :  { %4559 = vpow2.f32 %v3009_v45  ;;  %3018 = vadd.xlane.f32.xlu0 %v3017_v62  ;;  %v2781_v45 = vadd.f32 %v5513_v17, %v5515_v49 }
0x135c   :  { %v4560_v63 = vpop.eup %4559 }
0x135d   :  { %v3020_v50 = vsel %vm150_vm2, %v4560_v63, 0.0 }
0x135e   :  { %3021 = vadd.xlane.f32.xlu1 %v3020_v50  ;;  %v2784_v50 = vadd.f32 %v5517_v40, %v5519_v52 }
0x13b9   :  { %v3013_v18 = vpop.xlane.xlu1 %3012 }
0x13ba   :  { %4561 = vrcp.f32 %v3013_v18 }
0x13c0   :  { %v4562_v26 = vpop.eup %4561 }
0x13c1   :  { %v3027_v27 = vmul.f32 %v4562_v26, %v4554_v5  ;;  %v3016_v29 = vpop.xlane.xlu2 %3015  ;;  %v4409_v5 = vld [vmem:[%s4772_s28 + $0x7] ss:$0 sm:$0xff] }
0x13c2   :  { %4563 = vrcp.f32 %v3016_v29 }
0x13c3   :  { %4250 = vmatmul.msk.f32.vlgmr.msrb.gmra.mxu2 %vm150_vm2, %v3027_v27 }
0x13c4   :  { %4290 = vmatpush.xpose.msk.msrb.mxu2 %vm485_vm1, %v3212_v30 }
0x13c8   :  { %v4564_v37 = vpop.eup %4563  ;;  %4291 = vmatpush.xpose.msk.msrb.mxu2 %vm485_vm1, %v3209_v31 }
0x13c9   :  { %v3019_v34 = vpop.xlane.xlu0 %3018  ;;  %v3028_v35 = vmul.f32 %v4564_v37, %v4556_v25 }
0x13ca   :  { %4565 = vrcp.f32 %v3019_v34 }
0x13cb   :  { %4251 = vmatmul.msk.f32.gmra.mxu2 %vm150_vm2, %v3028_v35 }
0x13d0   :  { %v4566_v42 = vpop.eup %4565 }
0x13d1   :  { %v3029_v39 = vmul.f32 %v4566_v42, %v4558_v58  ;;  %v3022_v41 = vpop.xlane.xlu1 %3021 }
0x13d2   :  { %4567 = vrcp.f32 %v3022_v41 }
0x13d3   :  { %4252 = vmatmul.msk.f32.vlgmr.msrb.gmra.mxu1 %vm150_vm2, %v3029_v39  ;;  %4264 = vmatmul.msk.f32.vlgmr.msra.gmra.mxu2 %vm252_vm3, %v5312_v3 }
0x13d8   :  { %v4568_v2 = vpop.eup %4567 }
0x13d9   :  { %v3030_v12 = vmul.f32 %v4568_v2, %v4560_v63 }
0x13db   :  { %4253 = vmatmul.msk.f32.gmra.mxu1 %vm150_vm2, %v3030_v12  ;;  %4265 = vmatmul.msk.f32.gmra.mxu2 %vm252_vm3, %v5323_v16 }
0x13e3   :  { %4266 = vmatmul.msk.f32.gmra.mxu2 %vm252_vm3, %v5333_v55  ;;  %4282 = vmatmul.msk.f32.vlgmr.msra.gmra.mxu1 %vm252_vm3, %v5312_v3 }
0x13eb   :  { %4267 = vmatmul.msk.f32.gmra.mxu2 %vm252_vm3, %v5343_v43  ;;  %4283 = vmatmul.msk.f32.gmra.mxu1 %vm252_vm3, %v5323_v16 }
0x13f3   :  { %4284 = vmatmul.msk.f32.gmra.mxu1 %vm252_vm3, %v5333_v55  ;;  %v4408_v55 = vld [vmem:[%s4784_s2 + $0x7] ss:$0 sm:$0xff]  ;;  %s5715_s2 = sld [smem:[%s5771_s0 + %s4633_s20]]  }
0x13fb   :  { %4285 = vmatmul.msk.f32.gmra.mxu1 %vm252_vm3, %v5343_v43 }
0x1446   :  { %v3054_v47 = vpop.f32.mrf.mxu2 }
0x1447   :  { %4255 = vmatmul.msk.f32.vlgmr.msra.gmra.mxu0 %vm485_vm1, %v3054_v47 }
0x144e   :  { %v3057_v21 = vpop.f32.mrf.mxu2 }
0x144f   :  { %4256 = vmatmul.msk.f32.gmra.mxu0 %vm485_vm1, %v3057_v21 }
0x1450   :  { %v3083_v3 = vpop.f32.mrf.mxu1 }
0x1456   :  { %v3163_v4 = vpop.f32.mrf.mxu2 }
0x1457   :  { %4257 = vmatmul.msk.f32.gmra.mxu0 %vm485_vm1, %v3083_v3  ;;  %v3164_v36 = vadd.f32 %v4408_v55, %v3163_v4 }
0x1458   :  { %v3086_v14 = vpop.f32.mrf.mxu1 }
0x145e   :  { %v3166_v51 = vpop.f32.mrf.mxu2 }
0x145f   :  { %4258 = vmatmul.msk.f32.gmra.mxu0 %vm485_vm1, %v3086_v14  ;;  %v3167_v8 = vadd.f32 %v4408_v55, %v3166_v51 }
0x1460   :  { %v3241_v16 = vpop.f32.mrf.mxu1 }
0x1461   :  { %v3242_v7 = vadd.f32 %v4409_v5, %v3241_v16 }
0x1466   :  { %v3169_v13 = vpop.f32.mrf.mxu2 }
0x1467   :  { %v3170_v43 = vadd.f32 %v4408_v55, %v3169_v13  ;;  %4288 = vmatmul.msk.f32.vlgmr.msrb.gmra.mxu0 %vm485_vm1, %v3164_v36 }
0x1468   :  { %v3244_v6 = vpop.f32.mrf.mxu1 }
0x1469   :  { %v3245_v15 = vadd.f32 %v4409_v5, %v3244_v6  ;;  %4292 = vmatmul.msk.f32.vlgmr.msrb.gmra.mxu2 %vm485_vm1, %v3170_v43 }
0x146b   :  { %3395 = vmatpush.msra.mxu3 %v3245_v15 }
0x146d   :  { %3396 = vmatpush.msra.mxu3 %v3242_v7 }
0x146e   :  { %v3172_v25 = vpop.f32.mrf.mxu2 }
0x146f   :  { %v3173_v59 = vadd.f32 %v4408_v55, %v3172_v25  ;;  %4289 = vmatmul.msk.f32.gmra.mxu0 %vm485_vm1, %v3167_v8 }
0x1470   :  { %v3247_v48 = vpop.f32.mrf.mxu1 }
0x1471   :  { %4293 = vmatmul.msk.f32.gmra.mxu2 %vm485_vm1, %v3173_v59  ;;  %v3248_v58 = vadd.f32 %v4409_v5, %v3247_v48 }
0x1478   :  { %v3250_v56 = vpop.f32.mrf.mxu1 }
0x1479   :  { %v3251_v57 = vadd.f32 %v4409_v5, %v3250_v56 }
0x147b   :  { %3424 = vmatpush.msrb.mxu1 %v3251_v57 }
0x147d   :  { %3425 = vmatpush.msrb.mxu1 %v3248_v58 }
0x14c4   :  { %v3120_v62 = vpop.f32.mrf.mxu0 }
0x14c5   :  { %v5590_v63 = vadd.f32 %v3120_v62, %v2781_v45  ;;  %v4298_v45 = vld [vmem:[%s4890_s8 + $0x38] sm:$0xff]  ;;  %s4634_s8 = smov 26  }
0x14c6   :  { %3462 = vmatpush.msra.mxu0 %v4298_v45  ;;  %s5729_s23 = sld [smem:[%s5771_s0 + %s4634_s8]]  }
0x14cc   :  { %v3123_v0 = vpop.f32.mrf.mxu0 }
0x14cd   :  { %v5594_v9 = vadd.f32 %v3123_v0, %v2784_v50 }
0x14d4   :  { %v3126_v11 = vpop.f32.mrf.mxu0 }
0x14d5   :  { %v5598_v1 = vadd.f32 %v3126_v11, %v2787_v10 }
0x14dc   :  { %v3129_v18 = vpop.f32.mrf.mxu0 }
0x14dd   :  { %v5601_v19 = vadd.f32 %v3129_v18, %v5525_v46 }
0x14e4   :  { %v3282_v17 = vpop.f32.mrf.mxu0 }
0x14e5   :  { %v3323_v49 = vmul.f32 0.35355338, %v3282_v17  ;;  %v4410_v17 = vld [vmem:[%s5106_s14 + $0x1] ss:$0 sm:$0xff] }
0x14e7   :  { %v3327_v20 = vsel %vm4847_vm5, %v3323_v49, -1e+30 }
0x14e8   :  { %v3331_v40 = vsel %vm150_vm2, %v3327_v20, -inf }
0x14e9   :  { %3332 = vmax.xlane.f32.xlu2 %v3331_v40 }
0x14ec   :  { %v3285_v52 = vpop.f32.mrf.mxu0  ;;  %v3317_v44 = vpop.f32.mrf.mxu2 }
0x14ed   :  { %v3324_v22 = vmul.f32 0.35355338, %v3285_v52  ;;  %v3325_v24 = vmul.f32 0.35355338, %v3317_v44 }
0x14ef   :  { %v3329_v61 = vsel %vm4847_vm5, %v3325_v24, -1e+30  ;;  %v3328_v53 = vsel %vm4854_vm6, %v3324_v22, -1e+30 }
0x14f0   :  { %v3337_v46 = vsel %vm150_vm2, %v3329_v61, -inf  ;;  %v3334_v26 = vsel %vm150_vm2, %v3328_v53, -inf }
0x14f1   :  { %3338 = vmax.xlane.f32.xlu1 %v3337_v46  ;;  %3335 = vmax.xlane.f32.xlu0 %v3334_v26 }
0x14f4   :  { %v3320_v27 = vpop.f32.mrf.mxu2 }
0x14f5   :  { %v3326_v29 = vmul.f32 0.35355338, %v3320_v27 }
0x14f7   :  { %v3330_v30 = vsel %vm4854_vm6, %v3326_v29, -1e+30 }
0x14f8   :  { %v3340_v31 = vsel %vm150_vm2, %v3330_v30, -inf }
0x14f9   :  { %3341 = vmax.xlane.f32.xlu2 %v3340_v31 }
0x155c   :  { %v3333_v37 = vpop.xlane.xlu2 %3332 }
0x155d   :  { %v3343_v54 = vsub.f32 %v3327_v20, %v3333_v37 }
0x155f   :  { %v3347_v34 = vmul.f32 1.442695, %v3343_v54 }
0x1561   :  { %4569 = vpow2.f32 %v3347_v34 }
0x1564   :  { %v3339_v35 = vpop.xlane.xlu1 %3338  ;;  %v3336_v42 = vpop.xlane.xlu0 %3335 }
0x1565   :  { %v3345_v39 = vsub.f32 %v3329_v61, %v3339_v35  ;;  %v3344_v41 = vsub.f32 %v3328_v53, %v3336_v42 }
0x1567   :  { %v4570_v2 = vpop.eup %4569  ;;  %v3351_v12 = vmul.f32 1.442695, %v3345_v39  ;;  %v3349_v47 = vmul.f32 1.442695, %v3344_v41 }
0x1568   :  { %v3355_v21 = vsel %vm150_vm2, %v4570_v2, 0.0 }
0x1569   :  { %4571 = vpow2.f32 %v3351_v12  ;;  %3356 = vadd.xlane.f32.xlu0 %v3355_v21 }
0x156a   :  { %4573 = vpow2.f32 %v3349_v47 }
0x156c   :  { %v3342_v60 = vpop.xlane.xlu2 %3341 }
0x156d   :  { %v3346_v3 = vsub.f32 %v3330_v30, %v3342_v60 }
0x156f   :  { %v4572_v4 = vpop.eup %4571  ;;  %v3353_v14 = vmul.f32 1.442695, %v3346_v3 }
0x1570   :  { %v4574_v51 = vpop.eup %4573  ;;  %v3361_v16 = vsel %vm150_vm2, %v4572_v4, 0.0 }
0x1571   :  { %4575 = vpow2.f32 %v3353_v14  ;;  %3362 = vadd.xlane.f32.xlu2 %v3361_v16  ;;  %v3358_v55 = vsel %vm150_vm2, %v4574_v51, 0.0  ;;  %v4308_v16 = vld [vmem:[%s5191_s6 + $0x30] sm:$0xff] }
0x1572   :  { %3359 = vadd.xlane.f32.xlu1 %v3358_v55  ;;  %v4307_v55 = vld [vmem:[%s5191_s6 + $0x28] sm:$0xff] }
0x1577   :  { %v4576_v36 = vpop.eup %4575 }
0x1578   :  { %v3364_v13 = vsel %vm150_vm2, %v4576_v36, 0.0 }
0x1579   :  { %3365 = vadd.xlane.f32.xlu0 %v3364_v13 }
0x15dc   :  { %v3357_v5 = vpop.xlane.xlu0 %3356 }
0x15dd   :  { %4577 = vrcp.f32 %v3357_v5 }
0x15e3   :  { %v4578_v43 = vpop.eup %4577 }
0x15e4   :  { %v3371_v6 = vmul.f32 %v4578_v43, %v4570_v2  ;;  %v3363_v15 = vpop.xlane.xlu2 %3362 }
0x15e5   :  { %4579 = vrcp.f32 %v3363_v15  ;;  %v3360_v7 = vpop.xlane.xlu1 %3359 }
0x15e6   :  { %4581 = vrcp.f32 %v3360_v7  ;;  %4294 = vmatmul.msk.f32.vlgmr.msra.gmra.mxu3 %vm150_vm2, %v3371_v6 }
0x15eb   :  { %v4580_v8 = vpop.eup %4579 }
0x15ec   :  { %v4582_v25 = vpop.eup %4581  ;;  %v3373_v59 = vmul.f32 %v4580_v8, %v4572_v4  ;;  %v3366_v48 = vpop.xlane.xlu0 %3365 }
0x15ed   :  { %4583 = vrcp.f32 %v3366_v48  ;;  %v3372_v56 = vmul.f32 %v4582_v25, %v4574_v51  ;;  %v4309_v51 = vld [vmem:[%s5191_s6 + $0x38] sm:$0xff] }
0x15ee   :  { %4296 = vmatmul.msk.f32.vlgmr.msrb.gmra.mxu1 %vm150_vm2, %v3373_v59  ;;  %3633 = vmatpush.msra.mxu2 %v4309_v51 }
0x15ef   :  { %4295 = vmatmul.msk.f32.gmra.mxu3 %vm150_vm2, %v3372_v56 }
0x15f0   :  { %3634 = vmatpush.msra.mxu2 %v4308_v16  ;;  %v4327_v16 = vld [vmem:[%s5202_s15 + $0xe0] sm:$0xff] }
0x15f2   :  { %3635 = vmatpush.msra.mxu2 %v4307_v55  ;;  %v4326_v55 = vld [vmem:[%s5202_s15 + $0xd8] sm:$0xff] }
0x15f3   :  { %v4584_v57 = vpop.eup %4583 }
0x15f4   :  { %v3374_v58 = vmul.f32 %v4584_v57, %v4576_v36  ;;  %v4306_v36 = vld [vmem:[%s5191_s6 + $0x20] sm:$0xff]  ;;  %s4637_s6 = smov 27  }
0x15f5   :  { %3636 = vmatpush.msra.mxu2 %v4306_v36  ;;  %v4325_v36 = vld [vmem:[%s5202_s15 + $0xd0] sm:$0xff]  ;;  %s3947_s13 = sld [smem:[%s5771_s0 + %s4637_s6]]  }
0x15f6   :  { %4297 = vmatmul.msk.f32.gmra.mxu1 %vm150_vm2, %v3374_v58 }
0x1669   :  { %v3398_v62 = vpop.f32.mrf.mxu3 }
0x166a   :  { %4299 = vmatmul.msk.f32.vlgmr.msra.gmra.mxu0 %vm485_vm1, %v3398_v62 }
0x166b   :  { %v3427_v0 = vpop.f32.mrf.mxu1 }
0x1672   :  { %v3401_v50 = vpop.f32.mrf.mxu3 }
0x1673   :  { %4300 = vmatmul.msk.f32.gmra.mxu0 %vm485_vm1, %v3401_v50  ;;  %v3430_v10 = vpop.f32.mrf.mxu1 }
0x167b   :  { %4301 = vmatmul.msk.f32.gmra.mxu0 %vm485_vm1, %v3427_v0  ;;  %v4411_v0 = vld [vmem:[%s5144_s19 + $0x1] ss:$0 sm:$0xff] }
0x1683   :  { %4302 = vmatmul.msk.f32.gmra.mxu0 %vm485_vm1, %v3430_v10 }
0x16e7   :  { %v3464_v11 = vpop.f32.mrf.mxu0 }
0x16e8   :  { %v3476_v18 = vadd.f32 %v3464_v11, %v5590_v63 }
0x16ea   :  { %v3480_v49 = vadd.f32 %v3476_v18, %v5240_v23  ;;  %v4330_v18 = vld [vmem:[%s5202_s15 + $0xf8] sm:$0xff] }
0x16eb   :  { %3708 = vmatpush.msrb.mxu3 %v4330_v18 }
0x16ec   :  { %v3489_v20 = vadd.f32 %v4410_v17, %v3480_v49  ;;  %v4412_v49 = vld [vmem:[%s5151_s25 + $0x1] ss:$0 sm:$0xff]  ;;  %s4635_s25 = smov 25  }
0x16ed   :  { %s3945_s29 = sld [smem:[%s5771_s0 + %s4635_s25]]  }
0x16ee   :  { %v3497_v40 = vsel %vm252_vm3, %v3489_v20, 0.0 }
0x16ef   :  { %3498 = vadd.xlane.f32.xlu1 %v3497_v40 }
0x16f0   :  { %v3467_v52 = vpop.f32.mrf.mxu0 }
0x16f1   :  { %v3477_v44 = vadd.f32 %v3467_v52, %v5594_v9  ;;  %v4328_v52 = vld [vmem:[%s5202_s15 + $0xe8] sm:$0xff] }
0x16f3   :  { %v3481_v22 = vadd.f32 %v3477_v44, %v5245_v28 }
0x16f5   :  { %v5634_v24 = vadd.f32 %v4410_v17, %v3481_v22 }
0x16f7   :  { %v3500_v61 = vsel %vm252_vm3, %v5634_v24, 0.0 }
0x16f8   :  { %3501 = vadd.xlane.f32.xlu2 %v3500_v61  ;;  %v3470_v53 = vpop.f32.mrf.mxu0 }
0x16f9   :  { %v3478_v63 = vadd.f32 %v3470_v53, %v5598_v1 }
0x16fb   :  { %v3482_v23 = vadd.f32 %v3478_v63, %v5250_v32 }
0x16fd   :  { %v3491_v46 = vadd.f32 %v4410_v17, %v3482_v23 }
0x16ff   :  { %v3503_v26 = vsel %vm252_vm3, %v3491_v46, 0.0 }
0x1700   :  { %3504 = vadd.xlane.f32.xlu0 %v3503_v26  ;;  %v3473_v27 = vpop.f32.mrf.mxu0 }
0x1701   :  { %v3479_v9 = vadd.f32 %v3473_v27, %v5601_v19 }
0x1703   :  { %v3483_v28 = vadd.f32 %v3479_v9, %v5255_v38 }
0x1705   :  { %v5643_v29 = vadd.f32 %v4410_v17, %v3483_v28  ;;  %v4329_v17 = vld [vmem:[%s5202_s15 + $0xf0] sm:$0xff] }
0x1706   :  { %3709 = vmatpush.msrb.mxu3 %v4329_v17 }
0x1707   :  { %v3506_v30 = vsel %vm252_vm3, %v5643_v29, 0.0 }
0x1708   :  { %3507 = vadd.xlane.f32.xlu1 %v3506_v30  ;;  %3710 = vmatpush.msrb.mxu3 %v4328_v52 }
0x170a   :  { %3711 = vmatpush.msrb.mxu3 %v4327_v16 }
0x170c   :  { %3712 = vmatpush.msrb.mxu3 %v4326_v55 }
0x170e   :  { %3713 = vmatpush.msrb.mxu3 %v4325_v36 }
0x1762   :  { %v3499_v31 = vpop.xlane.xlu1 %3498 }
0x1763   :  { %v3509_v1 = vmul.f32 %v3499_v31, %v4698_v33 }
0x1765   :  { %v3513_v37 = vsub.f32 %v3489_v20, %v3509_v1 }
0x1767   :  { %v3517_v32 = vmul.f32 %v3513_v37, %v3513_v37 }
0x1769   :  { %v3521_v54 = vsel %vm252_vm3, %v3517_v32, 0.0 }
0x176a   :  { %3522 = vadd.xlane.f32.xlu2 %v3521_v54 }
0x176b   :  { %v3502_v34 = vpop.xlane.xlu2 %3501 }
0x176c   :  { %v3510_v35 = vmul.f32 %v3502_v34, %v4698_v33 }
0x176e   :  { %v5651_v19 = vsub.f32 %v5634_v24, %v3510_v35 }
0x1770   :  { %v3518_v38 = vmul.f32 %v5651_v19, %v5651_v19 }
0x1772   :  { %v3524_v42 = vsel %vm252_vm3, %v3518_v38, 0.0 }
0x1773   :  { %3525 = vadd.xlane.f32.xlu0 %v3524_v42  ;;  %v3505_v39 = vpop.xlane.xlu0 %3504 }
0x1774   :  { %v3511_v41 = vmul.f32 %v3505_v39, %v4698_v33 }
0x1776   :  { %v5657_v2 = vsub.f32 %v3491_v46, %v3511_v41 }
0x1778   :  { %v3519_v12 = vmul.f32 %v5657_v2, %v5657_v2 }
0x177a   :  { %v3527_v47 = vsel %vm252_vm3, %v3519_v12, 0.0 }
0x177b   :  { %3528 = vadd.xlane.f32.xlu1 %v3527_v47  ;;  %v3508_v21 = vpop.xlane.xlu1 %3507 }
0x177c   :  { %v3512_v60 = vmul.f32 %v3508_v21, %v4698_v33 }
0x177e   :  { %v5664_v3 = vsub.f32 %v5643_v29, %v3512_v60 }
0x1780   :  { %v3520_v4 = vmul.f32 %v5664_v3, %v5664_v3 }
0x1782   :  { %v3530_v14 = vsel %vm252_vm3, %v3520_v4, 0.0 }
0x1783   :  { %3531 = vadd.xlane.f32.xlu2 %v3530_v14 }
0x17dd   :  { %v3523_v13 = vpop.xlane.xlu2 %3522 }
0x17de   :  { %v3533_v5 = vmul.f32 %v3523_v13, %v4698_v33  ;;  %v4324_v13 = vld [vmem:[%s5202_s15 + $0xc8] sm:$0xff] }
0x17df   :  { %3714 = vmatpush.msrb.mxu3 %v4324_v13 }
0x17e0   :  { %v3537_v43 = vadd.f32 1e-05, %v3533_v5  ;;  %v4323_v5 = vld [vmem:[%s5202_s15 + $0xc0] sm:$0xff] }
0x17e1   :  { %3715 = vmatpush.msrb.mxu3 %v4323_v5 }
0x17e2   :  { %4585 = vrsqrt.f32 %v3537_v43  ;;  %vm3547_vm1 = vweird.f32 %v3537_v43 }
0x17e6   :  { %v3526_v6 = vpop.xlane.xlu0 %3525 }
0x17e7   :  { %v3534_v15 = vmul.f32 %v3526_v6, %v4698_v33  ;;  %v4320_v6 = vld [vmem:[%s5202_s15 + $0xa8] sm:$0xff] }
0x17e8   :  { %v4586_v7 = vpop.eup %4585 }
0x17e9   :  { %v3542_v8 = vmul.f32 %v4586_v7, %v3537_v43  ;;  %v3538_v25 = vadd.f32 1e-05, %v3534_v15  ;;  %vm3548_vm2 = vweird.f32 %v4586_v7  ;;  %v4321_v43 = vld [vmem:[%s5202_s15 + $0xb0] sm:$0xff]  ;;  %v4319_v15 = vld [vmem:[%s5202_s15 + $0xa0] sm:$0xff] }
0x17ea   :  { %vm3549_vm5 = vmor %vm3547_vm1, %vm3548_vm2 }
0x17eb   :  { %v3543_v59 = vmul.f32 %v4586_v7, %v3542_v8  ;;  %4587 = vrsqrt.f32 %v3538_v25  ;;  %vm3557_vm9 = vweird.f32 %v3538_v25  ;;  %v4317_v8 = vld [vmem:[%s5202_s15 + $0x90] sm:$0xff] }
0x17ed   :  { %v3544_v48 = vmul.f32 0.5, %v3543_v59  ;;  %v4315_v59 = vld [vmem:[%s5202_s15 + $0x80] sm:$0xff] }
0x17ee   :  { %v3529_v56 = vpop.xlane.xlu1 %3528 }
0x17ef   :  { %v3545_v57 = vsub.f32 1.5, %v3544_v48  ;;  %v3535_v58 = vmul.f32 %v3529_v56, %v4698_v33  ;;  %v4413_v48 = vld [vmem:[%s5186_s30 + $0x1] ss:$0 sm:$0xff]  ;;  %s4636_s30 = smov 29  }
0x17f0   :  { %s3949_s5 = sld [smem:[%s5771_s0 + %s4636_s30]]  }
0x17f1   :  { %v4588_v45 = vpop.eup %4587  ;;  %v3546_v62 = vmul.f32 %v4586_v7, %v3545_v57  ;;  %v3539_v50 = vadd.f32 1e-05, %v3535_v58 }
0x17f2   :  { %v3552_v10 = vmul.f32 %v4588_v45, %v3538_v25  ;;  %vm3558_vm6 = vweird.f32 %v4588_v45  ;;  %v4316_v25 = vld [vmem:[%s5202_s15 + $0x88] sm:$0xff] }
0x17f3   :  { %v3550_v11 = vsel %vm3549_vm5, %v4586_v7, %v3546_v62  ;;  %4589 = vrsqrt.f32 %v3539_v50  ;;  %vm3559_vm10 = vmor %vm3557_vm9, %vm3558_vm6  ;;  %vm3567_vm12 = vweird.f32 %v3539_v50  ;;  %v4318_v7 = vld [vmem:[%s5202_s15 + $0x98] sm:$0xff]  ;;  %vm3914_vm6 = vcmask 15360  }
0x17f4   :  { %v3581_v20 = vmul.f32 %v3550_v11, %v3513_v37  ;;  %v3553_v40 = vmul.f32 %v4588_v45, %v3552_v10 }
0x17f6   :  { %v3588_v44 = vmul.f32 %v4411_v0, %v3581_v20  ;;  %v3554_v22 = vmul.f32 0.5, %v3553_v40  ;;  %v3532_v61 = vpop.xlane.xlu2 %3531 }
0x17f7   :  { %v3536_v53 = vmul.f32 %v3532_v61, %v4698_v33 }
0x17f8   :  { %v3595_v63 = vadd.f32 %v4412_v49, %v3588_v44  ;;  %v3555_v23 = vsub.f32 1.5, %v3554_v22 }
0x17f9   :  { %v4590_v46 = vpop.eup %4589  ;;  %v3540_v26 = vadd.f32 1e-05, %v3536_v53 }
0x17fa   :  { %v3556_v27 = vmul.f32 %v4588_v45, %v3555_v23  ;;  %v3562_v9 = vmul.f32 %v4590_v46, %v3539_v50  ;;  %4311 = vmatmul.msk.f32.vlgmr.msra.gmra.mxu2 %vm252_vm3, %v3595_v63  ;;  %vm3568_vm11 = vweird.f32 %v4590_v46 }
0x17fb   :  { %4591 = vrsqrt.f32 %v3540_v26  ;;  %vm3569_vm13 = vmor %vm3567_vm12, %vm3568_vm11  ;;  %vm3577_vm15 = vweird.f32 %v3540_v26 }
0x17fc   :  { %v3560_v28 = vsel %vm3559_vm10, %v4588_v45, %v3556_v27  ;;  %v3563_v30 = vmul.f32 %v4590_v46, %v3562_v9 }
0x17fd   :  { %v3582_v31 = vmul.f32 %v3560_v28, %v5651_v19 }
0x17fe   :  { %v3564_v1 = vmul.f32 0.5, %v3563_v30 }
0x17ff   :  { %v3589_v37 = vmul.f32 %v4411_v0, %v3582_v31 }
0x1800   :  { %v3565_v32 = vsub.f32 1.5, %v3564_v1 }
0x1801   :  { %v4592_v54 = vpop.eup %4591  ;;  %v3596_v34 = vadd.f32 %v4412_v49, %v3589_v37 }
0x1802   :  { %v3566_v35 = vmul.f32 %v4590_v46, %v3565_v32  ;;  %v3572_v38 = vmul.f32 %v4592_v54, %v3540_v26  ;;  %vm3578_vm14 = vweird.f32 %v4592_v54 }
0x1803   :  { %4312 = vmatmul.msk.f32.gmra.mxu2 %vm252_vm3, %v3596_v34  ;;  %vm3579_vm0 = vmor %vm3577_vm15, %vm3578_vm14 }
0x1804   :  { %v3570_v42 = vsel %vm3569_vm13, %v4590_v46, %v3566_v35  ;;  %v3573_v39 = vmul.f32 %v4592_v54, %v3572_v38 }
0x1805   :  { %v3583_v41 = vmul.f32 %v3570_v42, %v5657_v2 }
0x1806   :  { %v3574_v12 = vmul.f32 0.5, %v3573_v39 }
0x1807   :  { %v3590_v19 = vmul.f32 %v4411_v0, %v3583_v41 }
0x1808   :  { %v3575_v47 = vsub.f32 1.5, %v3574_v12 }
0x1809   :  { %v3597_v21 = vadd.f32 %v4412_v49, %v3590_v19 }
0x180a   :  { %v3576_v60 = vmul.f32 %v4592_v54, %v3575_v47 }
0x180b   :  { %4313 = vmatmul.msk.f32.gmra.mxu2 %vm252_vm3, %v3597_v21 }
0x180c   :  { %v3580_v4 = vsel %vm3579_vm0, %v4592_v54, %v3576_v60 }
0x180d   :  { %v3584_v14 = vmul.f32 %v3580_v4, %v5664_v3  ;;  %v4322_v3 = vld [vmem:[%s5202_s15 + $0xb8] sm:$0xff]  ;;  %s4638_s15 = smov 30  }
0x180e   :  { %3716 = vmatpush.msrb.mxu3 %v4322_v3  ;;  %s3950_s21 = sld [smem:[%s5771_s0 + %s4638_s15]]  }
0x180f   :  { %v3591_v2 = vmul.f32 %v4411_v0, %v3584_v14 }
0x1810   :  { %3717 = vmatpush.msrb.mxu3 %v4321_v43 }
0x1811   :  { %v3598_v51 = vadd.f32 %v4412_v49, %v3591_v2  ;;  %v4414_v2 = vld [vmem:[%s5222_s22 + $0x1] ss:$0 sm:$0xff]  ;;  %s4639_s22 = smov 31  }
0x1812   :  { %3718 = vmatpush.msrb.mxu3 %v4320_v6  ;;  %s3951_s12 = sld [smem:[%s5771_s0 + %s4639_s22]]  }
0x1813   :  { %4314 = vmatmul.msk.f32.gmra.mxu2 %vm252_vm3, %v3598_v51 }
0x1814   :  { %3719 = vmatpush.msrb.mxu3 %v4319_v15 }
0x1816   :  { %3720 = vmatpush.msrb.mxu3 %v4318_v7 }
0x1818   :  { %3721 = vmatpush.msrb.mxu3 %v4317_v8 }
0x181a   :  { %3722 = vmatpush.msrb.mxu3 %v4316_v25 }
0x181c   :  { %3723 = vmatpush.msrb.mxu3 %v4315_v59 }
0x187d   :  { %v3638_v56 = vpop.f32.mrf.mxu2 }
0x187e   :  { %v3639_v57 = vadd.f32 %v4413_v48, %v3638_v56 }
0x1880   :  { %v3650_v58 = vmul.f32 %v3639_v57, %v3639_v57 }
0x1882   :  { %v3654_v45 = vmul.f32 %v3650_v58, %v3639_v57  ;;  %v3798_v58 = vld [vmem:[%s3945_s29 + $0x18] sm:$0xff] }
0x1883   :  { %3821 = vmatpush.msra.mxu1 %v3798_v58 }
0x1884   :  { %v3658_v62 = vmul.f32 0.044715, %v3654_v45  ;;  %v3797_v45 = vld [vmem:[%s3945_s29 + $0x10] sm:$0xff] }
0x1885   :  { %3822 = vmatpush.msra.mxu1 %v3797_v45 }
0x1886   :  { %v3662_v50 = vadd.f32 %v3658_v62, %v3639_v57  ;;  %v3641_v0 = vpop.f32.mrf.mxu2 }
0x1887   :  { %v3642_v10 = vadd.f32 %v4413_v48, %v3641_v0 }
0x1888   :  { %v3666_v11 = vmul.f32 0.7978846, %v3662_v50  ;;  %v3796_v50 = vld [vmem:[%s3945_s29 + $0x8] sm:$0xff] }
0x1889   :  { %v3651_v18 = vmul.f32 %v3642_v10, %v3642_v10  ;;  %3823 = vmatpush.msra.mxu1 %v3796_v50 }
0x188a   :  { %4593 = vtanh.f32 %v3666_v11 }
0x188b   :  { %v3655_v17 = vmul.f32 %v3651_v18, %v3642_v10 }
0x188d   :  { %v3659_v49 = vmul.f32 0.044715, %v3655_v17 }
0x188e   :  { %v3644_v20 = vpop.f32.mrf.mxu2 }
0x188f   :  { %v3663_v40 = vadd.f32 %v3659_v49, %v3642_v10  ;;  %v3645_v52 = vadd.f32 %v4413_v48, %v3644_v20 }
0x1890   :  { %v4594_v44 = vpop.eup %4593 }
0x1891   :  { %v3674_v22 = vadd.f32 1.0, %v4594_v44  ;;  %v3652_v61 = vmul.f32 %v3645_v52, %v3645_v52  ;;  %v3667_v53 = vmul.f32 0.7978846, %v3663_v40 }
0x1893   :  { %v3678_v63 = vmul.f32 0.5, %v3674_v22  ;;  %v3656_v23 = vmul.f32 %v3652_v61, %v3645_v52  ;;  %4595 = vtanh.f32 %v3667_v53  ;;  %v3855_v53 = vld [vmem:[%s3949_s5 + $0x18] sm:$0xff] }
0x1895   :  { %v3682_v46 = vmul.f32 %v3678_v63, %v3639_v57  ;;  %v3660_v26 = vmul.f32 0.044715, %v3656_v23  ;;  %v3854_v63 = vld [vmem:[%s3949_s5 + $0x10] sm:$0xff]  ;;  %v4415_v23 = vld [vmem:[%s5709_s16] ss:$0 sm:$0xff]  ;;  %s4640_s16 = smov 28  }
0x1896   :  { %v3647_v27 = vpop.f32.mrf.mxu2  ;;  %s3948_s28 = sld [smem:[%s5771_s0 + %s4640_s16]]  }
0x1897   :  { %v3664_v9 = vadd.f32 %v3660_v26, %v3645_v52  ;;  %v3648_v28 = vadd.f32 %v4413_v48, %v3647_v27  ;;  %3724 = vmatmul.f32.vlgmr.msrb.gmra.mxu3 %v3682_v46  ;;  %v3853_v26 = vld [vmem:[%s3949_s5 + $0x8] sm:$0xff]  ;;  %v4416_v27 = vld [vmem:[%s5715_s2] ss:$0 sm:$0xff]  ;;  %s4641_s2 = smov 32  }
0x1898   :  { %s3952_s19 = sld [smem:[%s5771_s0 + %s4641_s2]]  }
0x1899   :  { %v4596_v30 = vpop.eup %4595  ;;  %v3653_v31 = vmul.f32 %v3648_v28, %v3648_v28  ;;  %v3668_v1 = vmul.f32 0.7978846, %v3664_v9 }
0x189a   :  { %v3675_v37 = vadd.f32 1.0, %v4596_v30 }
0x189b   :  { %v3657_v32 = vmul.f32 %v3653_v31, %v3648_v28  ;;  %4597 = vtanh.f32 %v3668_v1 }
0x189c   :  { %v3679_v54 = vmul.f32 0.5, %v3675_v37 }
0x189d   :  { %v3661_v34 = vmul.f32 0.044715, %v3657_v32 }
0x189e   :  { %v3683_v35 = vmul.f32 %v3679_v54, %v3642_v10  ;;  %v3795_v10 = vld [vmem:[%s3945_s29] sm:$0xff] }
0x189f   :  { %v3665_v38 = vadd.f32 %v3661_v34, %v3648_v28  ;;  %3824 = vmatpush.msra.mxu1 %v3795_v10 }
0x18a0   :  { %3726 = vmatmul.f32.gmra.mxu3 %v3683_v35 }
0x18a1   :  { %v4598_v42 = vpop.eup %4597  ;;  %v3669_v39 = vmul.f32 0.7978846, %v3665_v38  ;;  %3872 = vmatpush.msrb.mxu1 %v3855_v53 }
0x18a2   :  { %v3676_v41 = vadd.f32 1.0, %v4598_v42 }
0x18a3   :  { %4599 = vtanh.f32 %v3669_v39  ;;  %3873 = vmatpush.msrb.mxu1 %v3854_v63 }
0x18a4   :  { %v3680_v12 = vmul.f32 0.5, %v3676_v41 }
0x18a5   :  { %3874 = vmatpush.msrb.mxu1 %v3853_v26 }
0x18a6   :  { %v3684_v19 = vmul.f32 %v3680_v12, %v3645_v52 }
0x18a8   :  { %3729 = vmatmul.f32.gmra.mxu3 %v3684_v19  ;;  %v4417_v19 = vld [vmem:[%s5729_s23] ss:$0 sm:$0xff]  ;;  %s4642_s23 = smov 33  }
0x18a9   :  { %v4600_v47 = vpop.eup %4599  ;;  %s3953_s27 = sld [smem:[%s5771_s0 + %s4642_s23]]  }
0x18aa   :  { %v3677_v21 = vadd.f32 1.0, %v4600_v47 }
0x18ac   :  { %v3681_v60 = vmul.f32 0.5, %v3677_v21 }
0x18ae   :  { %v3685_v4 = vmul.f32 %v3681_v60, %v3648_v28  ;;  %v3852_v28 = vld [vmem:[%s3949_s5] sm:$0xff] }
0x18af   :  { %3875 = vmatpush.msrb.mxu1 %v3852_v28  ;;  %v4418_v60 = vld [vmem:[%s3947_s13] ss:$0 sm:$0xff] }
0x18b0   :  { %3731 = vmatmul.f32.gmra.mxu3 %v3685_v4 }
0x191a   :  { %v3725_v14 = vpop.f32.mrf.mxu3 }
0x1923   :  { %v3727_v51 = vpop.f32.mrf.mxu3 }
0x1924   :  { %v3728_v16 = vadd.f32 %v4414_v2, %v3727_v51  ;;  %v72_v51 = vstv %s3948_s28 }
0x1925   :  { %73 = vst [vmem:[#allocation2] sm:$0x1] %v72_v51 }
0x1926   :  { %v3735_v55 = vadd.f32 %v3728_v16, %v5634_v24 }
0x1928   :  { %v3739_v36 = vsel %vm252_vm3, %v3735_v55, 0.0 }
0x1929   :  { %3740 = vadd.xlane.f32.xlu0 %v3739_v36 }
0x192b   :  { %v3730_v13 = vpop.f32.mrf.mxu3 }
0x192c   :  { %v4421_v10 = vld [vmem:[#allocation2] ss:$0 sm:$0xff] }
0x1933   :  { %v3732_v5 = vpop.f32.mrf.mxu3 }
0x1934   :  { %v3733_v3 = vadd.f32 %v4414_v2, %v3732_v5  ;;  %v4420_v5 = vld [vmem:[%s3951_s12] ss:$0 sm:$0xff] }
0x1936   :  { %v3736_v43 = vadd.f32 %v3733_v3, %v5643_v29 }
0x1938   :  { %v3742_v24 = vsel %vm252_vm3, %v3736_v43, 0.0 }
0x1939   :  { %3743 = vadd.xlane.f32.xlu1 %v3742_v24 }
0x199c   :  { %v3741_v6 = vpop.xlane.xlu0 %3740 }
0x199d   :  { %v3745_v15 = vmul.f32 %v3741_v6, %v4698_v33 }
0x199f   :  { %v3747_v7 = vsub.f32 %v3735_v55, %v3745_v15  ;;  %v4419_v55 = vld [vmem:[%s3950_s21] ss:$0 sm:$0xff] }
0x19a1   :  { %v3749_v8 = vmul.f32 %v3747_v7, %v3747_v7 }
0x19a3   :  { %v3751_v25 = vsel %vm252_vm3, %v3749_v8, 0.0 }
0x19a4   :  { %3752 = vadd.xlane.f32.xlu2 %v3751_v25 }
0x19ac   :  { %v3744_v59 = vpop.xlane.xlu1 %3743 }
0x19ad   :  { %v3746_v29 = vmul.f32 %v3744_v59, %v4698_v33 }
0x19af   :  { %v5721_v48 = vsub.f32 %v3736_v43, %v3746_v29 }
0x19b1   :  { %v3750_v56 = vmul.f32 %v5721_v48, %v5721_v48 }
0x19b3   :  { %v3754_v57 = vsel %vm252_vm3, %v3750_v56, 0.0 }
0x19b4   :  { %3755 = vadd.xlane.f32.xlu0 %v3754_v57  ;;  %v74_v57 = vstv %s3952_s19 }
0x19b5   :  { %75 = vst [vmem:[#allocation3] sm:$0x1] %v74_v57 }
0x19bc   :  { %v4422_v58 = vld [vmem:[#allocation3] ss:$0 sm:$0xff] }
0x1a17   :  { %v3753_v62 = vpop.xlane.xlu2 %3752 }
0x1a18   :  { %v3757_v0 = vmul.f32 %v3753_v62, %v4698_v33 }
0x1a1a   :  { %v3759_v11 = vadd.f32 1e-05, %v3757_v0 }
0x1a1c   :  { %4601 = vrsqrt.f32 %v3759_v11  ;;  %vm3767_vm7 = vweird.f32 %v3759_v11 }
0x1a22   :  { %v4602_v18 = vpop.eup %4601 }
0x1a23   :  { %v3762_v17 = vmul.f32 %v4602_v18, %v3759_v11  ;;  %vm3768_vm4 = vweird.f32 %v4602_v18 }
0x1a24   :  { %vm3769_vm8 = vmor %vm3767_vm7, %vm3768_vm4 }
0x1a25   :  { %v3763_v49 = vmul.f32 %v4602_v18, %v3762_v17 }
0x1a27   :  { %v3764_v20 = vmul.f32 0.5, %v3763_v49  ;;  %v3756_v40 = vpop.xlane.xlu0 %3755 }
0x1a28   :  { %v3758_v52 = vmul.f32 %v3756_v40, %v4698_v33 }
0x1a29   :  { %v3765_v44 = vsub.f32 1.5, %v3764_v20 }
0x1a2a   :  { %v3760_v22 = vadd.f32 1e-05, %v3758_v52 }
0x1a2b   :  { %v3766_v61 = vmul.f32 %v4602_v18, %v3765_v44 }
0x1a2c   :  { %4603 = vrsqrt.f32 %v3760_v22  ;;  %vm3777_vm1 = vweird.f32 %v3760_v22 }
0x1a2d   :  { %v3770_v46 = vsel %vm3769_vm8, %v4602_v18, %v3766_v61 }
0x1a2e   :  { %v3781_v9 = vmul.f32 %v3770_v46, %v3747_v7 }
0x1a30   :  { %v3786_v30 = vmul.f32 %v4415_v23, %v3781_v9 }
0x1a32   :  { %v4604_v33 = vpop.eup %4603  ;;  %v3791_v31 = vadd.f32 %v4416_v27, %v3786_v30 }
0x1a33   :  { %v3772_v1 = vmul.f32 %v4604_v33, %v3760_v22  ;;  %vm3778_vm2 = vweird.f32 %v4604_v33 }
0x1a34   :  { %4605 = vtanh.f32 %v3791_v31  ;;  %vm3779_vm5 = vmor %vm3777_vm1, %vm3778_vm2 }
0x1a35   :  { %v3773_v37 = vmul.f32 %v4604_v33, %v3772_v1 }
0x1a37   :  { %v3774_v32 = vmul.f32 0.5, %v3773_v37 }
0x1a39   :  { %v3775_v54 = vsub.f32 1.5, %v3774_v32 }
0x1a3a   :  { %v4606_v34 = vpop.eup %4605 }
0x1a3b   :  { %v3776_v35 = vmul.f32 %v4604_v33, %v3775_v54  ;;  %4332 = vmatmul.msk.f32.vlgmr.msra.gmra.mxu1 %vm252_vm3, %v4606_v34 }
0x1a3d   :  { %v3780_v38 = vsel %vm3779_vm5, %v4604_v33, %v3776_v35 }
0x1a3e   :  { %v3782_v42 = vmul.f32 %v3780_v38, %v5721_v48 }
0x1a40   :  { %v3787_v39 = vmul.f32 %v4415_v23, %v3782_v42 }
0x1a42   :  { %v3792_v41 = vadd.f32 %v4416_v27, %v3787_v39 }
0x1a44   :  { %4607 = vtanh.f32 %v3792_v41 }
0x1a4a   :  { %v4608_v12 = vpop.eup %4607 }
0x1a4b   :  { %4333 = vmatmul.msk.f32.gmra.mxu1 %vm252_vm3, %v4608_v12 }
0x1a53   :  { %4334 = vmatmul.msk.f32.vlgmr.msrb.gmra.mxu1 %vm252_vm3, %v4606_v34 }
0x1a5b   :  { %4335 = vmatmul.msk.f32.gmra.mxu1 %vm252_vm3, %v4608_v12 }
0x1ab8   :  { %v3826_v47 = vpop.f32.mrf.mxu1 }
0x1ab9   :  { %v3827_v21 = vadd.f32 %v4417_v19, %v3826_v47 }
0x1abb   :  { %v3832_v4 = vmax.f32 %v3827_v21, 0.0 }
0x1abd   :  { %v3838_v14 = vmul.f32 %v4418_v60, %v3832_v4 }
0x1abf   :  { %v3840_v2 = vsel %vm252_vm3, %v3838_v14, 0.0 }
0x1ac0   :  { %3841 = vadd.xlane.f32.xlu0 %v3840_v2 }
0x1ac8   :  { %v3829_v16 = vpop.f32.mrf.mxu1 }
0x1ac9   :  { %v3830_v3 = vadd.f32 %v4417_v19, %v3829_v16 }
0x1acb   :  { %v3833_v6 = vmax.f32 %v3830_v3, 0.0 }
0x1acd   :  { %v3839_v59 = vmul.f32 %v4418_v60, %v3833_v6 }
0x1acf   :  { %v3843_v56 = vsel %vm252_vm3, %v3839_v59, 0.0 }
0x1ad0   :  { %v3877_v36 = vpop.f32.mrf.mxu1 }
0x1ad1   :  { %v3878_v13 = vadd.f32 %v4419_v55, %v3877_v36 }
0x1ad3   :  { %v3883_v43 = vmax.f32 %v3878_v13, 0.0 }
0x1ad5   :  { %v3889_v24 = vmul.f32 %v4420_v5, %v3883_v43 }
0x1ad7   :  { %v3891_v15 = vsel %vm252_vm3, %v3889_v24, 0.0 }
0x1ad8   :  { %v3880_v7 = vpop.f32.mrf.mxu1  ;;  %3892 = vadd.xlane.f32.xlu1 %v3891_v15 }
0x1ad9   :  { %v3881_v8 = vadd.f32 %v4419_v55, %v3880_v7 }
0x1adb   :  { %v3884_v25 = vmax.f32 %v3881_v8, 0.0 }
0x1add   :  { %v3890_v29 = vmul.f32 %v4420_v5, %v3884_v25 }
0x1adf   :  { %v3894_v48 = vsel %vm252_vm3, %v3890_v29, 0.0  ;;  %vm3911_vm3 = vcmask 7168  }
0x1ae0   :  { %3895 = vadd.xlane.f32.xlu2 %v3894_v48  ;;  %3844 = vadd.xlane.f32.xlu1 %v3843_v56 }
0x1b33   :  { %v3842_v11 = vpop.xlane.xlu0 %3841 }
0x1b34   :  { %v3850_v18 = vadd.f32 %v4421_v10, %v3842_v11 }
0x1b4b   :  { %v3893_v45 = vpop.xlane.xlu1 %3892 }
0x1b4c   :  { %v3901_v62 = vadd.f32 %v4422_v58, %v3893_v45 }
0x1b4e   :  { %3905 = vrot.lane.b32.xlu2 %v3901_v62, %s4611_s11 }
0x1b53   :  { %v3896_v50 = vpop.xlane.xlu2 %3895  ;;  %v3845_v20 = vpop.xlane.xlu1 %3844 }
0x1b54   :  { %v3902_v0 = vadd.f32 %v4422_v58, %v3896_v50  ;;  %v3851_v40 = vadd.f32 %v4421_v10, %v3845_v20 }
0x1b56   :  { %3907 = vrot.lane.b32.xlu0 %v3902_v0, %s4611_s11 }
0x1ba8   :  { %v3906_v17 = vpop.permute.xlu2 %3905 }
0x1ba9   :  { %v3912_v49 = vsel %vm3911_vm3, %v3850_v18, %v3906_v17 }
0x1baa   :  { %3915 = vst.msk [vmem:[%s3953_s27] sm:$0xff] %vm3914_vm6, %v3912_v49 }
0x1bc8   :  { %v3908_v52 = vpop.permute.xlu0 %3907 }
0x1bc9   :  { %v3913_v44 = vsel %vm3911_vm3, %v3851_v40, %v3908_v52 }
0x1bca   :  { %3916 = vst.msk [vmem:[%s3953_s27 + $0x8] sm:$0xff] %vm3914_vm6, %v3913_v44 }

</bundles_post_ra>
